<compile_context>
chip_gen: v7x
topology: tpu7x:2x2x1
jax: 0.10.0
libtpu: 0.0.40
codegen_flags: <defaults>
</compile_context>

<pallas_src>
import functools

import jax
import jax.numpy as jnp
from jax.experimental import pallas as pl
from jax.experimental.pallas import tpu as pltpu


# ---------------------------------------------------------------------------
# Synthetic small config (consistent with the module constructor):
#   input_dim=16, nb_steps=8, hidden_channels_list=[8,16,32], kernel=(3,3),
#   encoder strides [(1,1),(2,1),(2,1)], padding=(1,1), pooling_flag=False,
#   skip_connection_type='cat_', residual 'add_', nb_residual_block=1,
#   use_intermediate_output=False, output_channels=1.
# ---------------------------------------------------------------------------
BATCH = 2
INPUT_DIM = 16            # feature axis (H of the NCHW conv input)
NB_STEPS = 8              # time axis   (W of the NCHW conv input)
HIDDEN_CHANNELS = (8, 16, 32)
BETA = 0.9                # TODO(synk): LIF2d/LI2d neuron parameters guessed.
THRESH = 1.0

# Feature-axis sizes through the encoder (kernel 3, pad 1).
H0 = INPUT_DIM            # 16  encoder block 0 (stride 1)
H1 = (H0 - 1) // 2 + 1    # 8   encoder block 1 (stride 2)
H2 = (H1 - 1) // 2 + 1    # 4   encoder block 2 (stride 2)


# ---------------------------------------------------------------------------
# The fused Pallas kernel: whole forward pass on resident VMEM data.
# ---------------------------------------------------------------------------
def _unet_kernel(
    x_ref,
    a_e0, b_e0, a_e1, b_e1, a_e2, b_e2,
    a_r1, b_r1, a_r2, b_r2,
    a_d0, b_d0, a_d1, b_d1, a_ro, b_ro,
    out_ref,
    *, bt, nb_steps, beta, thresh,
):
    T, B = nb_steps, bt
    R = T * B                      # rows: time-major blocks of B batch rows

    def shifted_cat(x_f32):
        """[x(t-1) | x(t) | x(t+1)] lane-concat in bf16 (time-tap K-fusion).

        Time shifts are sublane rotations on the XLU; boundary time steps are
        masked to zero (conv 'same' padding along the time axis)."""
        row = jax.lax.broadcasted_iota(jnp.int32, x_f32.shape, 0)
        x_prev = jnp.where(row < B, 0.0, pltpu.roll(x_f32, B, axis=0))
        x_next = jnp.where(row >= R - B, 0.0, pltpu.roll(x_f32, R - B, axis=0))
        return jnp.concatenate([x_prev, x_f32, x_next], axis=1).astype(jnp.bfloat16)

    def conv(x_f32, a_ref, b_ref):
        """3x3 conv (H taps / stride / upsample folded into A) as ONE matmul,
        with the bias hoisted out of the time loop (single full-tile add)."""
        xc = shifted_cat(x_f32)
        return jnp.dot(xc, a_ref[...], preferred_element_type=jnp.float32) + b_ref[...]

    def lif(cur):
        """Fully unrolled LIF recurrence; results kept in registers and
        concatenated once (no per-step masked stores)."""
        n = cur.shape[1]
        mem = jnp.zeros((B, n), jnp.float32)
        outs = []
        for t in range(T):                       # static unroll (T == 8)
            mem = beta * mem + cur[t * B:(t + 1) * B, :]
            # TODO(synk): exact LIF2d update unknown; standard LIF with
            # subtractive reset (spike when mem >= thresh) is used.
            spk = (mem >= thresh).astype(jnp.float32)
            mem = mem - spk * thresh
            outs.append(spk)
        return jnp.concatenate(outs, axis=0)

    def li(cur):
        """Leaky-integrator readout (no spikes); single final store outside."""
        n = cur.shape[1]
        mem = jnp.zeros((B, n), jnp.float32)
        outs = []
        for t in range(T):
            mem = beta * mem + cur[t * B:(t + 1) * B, :]
            outs.append(mem)
        return jnp.concatenate(outs, axis=0)

    x = x_ref[...]                                           # (T*B, 1*H0) f32

    # ---- encoder -----------------------------------------------------------
    spk1 = lif(conv(x, a_e0, b_e0))                          # (T*B, 8*16)
    spk2 = lif(conv(spk1, a_e1, b_e1))                       # (T*B, 16*8)
    spk3 = lif(conv(spk2, a_e2, b_e2))                       # (T*B, 32*4)

    # ---- residual bottleneck ('add_' skip) ----------------------------------
    r1 = lif(conv(spk3, a_r1, b_r1))
    r2 = lif(conv(r1, a_r2, b_r2))
    # TODO(synk): placement of the residual add inside SpikingResConv2dBlock is
    # assumed to follow the second spiking layer ('add_' type).
    spk4 = r2 + spk3                                         # fused residual add

    # ---- decoder -------------------------------------------------------------
    d0 = lif(conv(spk4, a_d0, b_d0))                         # (T*B, 16*8)

    # decoder block 1: cat_(d0, enc1 spikes) fused into one K=768 matmul.
    cat1 = jnp.concatenate([d0, spk2], axis=1)               # (T*B, 256)
    d1 = lif(conv(cat1, a_d1, b_d1))                         # (T*B, 8*16)

    # ---- readout: cat_(d1, enc0 spikes), leaky integrator (no spikes) ---------
    cat2 = jnp.concatenate([d1, spk1], axis=1)               # (T*B, 256)
    out_ref[...] = li(conv(cat2, a_ro, b_ro))                # single store (T*B, 16)


# ---------------------------------------------------------------------------
# Weight folding (tiny per-weight einsums, plain XLA outside the kernel).
# ---------------------------------------------------------------------------
def _h_tap_maps(h_in, h_out, stride, upsample):
    """(3, h_out, h_in) linear maps along the feature axis, one per H-tap:
    optional bilinear x2 upsample followed by 'same' 3-tap selection w/ stride."""
    if upsample:
        # TODO(synk): Upsampling2d internals unknown; bilinear x2 along H assumed.
        h_mid = 2 * h_in
        up = jax.image.resize(jnp.eye(h_in, dtype=jnp.float32), (h_mid, h_in),
                              method="bilinear")
    else:
        h_mid = h_in
        up = jnp.eye(h_in, dtype=jnp.float32)
    ho = jnp.arange(h_out)[:, None]
    hm = jnp.arange(h_mid)[None, :]
    taps = [((hm == stride * ho + (dh - 1)).astype(jnp.float32) @ up)
            for dh in range(3)]
    return jnp.stack(taps, axis=0)


def _fold_conv(w, g):
    """Fold conv weight (Cout,Cin,3,3) with H-maps g (3,Hout,Hin) into a single
    K-stacked matmul operand A: (3*Cin*Hin, Cout*Hout), bf16.  Row order is
    time-tap major, matching the kernel's [prev | cur | next] lane concat."""
    a = jnp.einsum("ocdw,dhi->wcioh", w, g)
    ndw, ci, hi, co, ho = a.shape
    return a.reshape(ndw * ci * hi, co * ho).astype(jnp.bfloat16)


def _fold_bias(b, h_out):
    return jnp.broadcast_to(b[:, None], (b.shape[0], h_out)).reshape(1, -1).astype(
        jnp.float32)


def _fold_parameters(params):
    """Build the kernel operand list (order matches _unet_kernel's arguments)."""
    g_e0 = _h_tap_maps(H0, H0, 1, False)
    g_e1 = _h_tap_maps(H0, H1, 2, False)
    g_e2 = _h_tap_maps(H1, H2, 2, False)
    g_r = _h_tap_maps(H2, H2, 1, False)
    g_d0 = _h_tap_maps(H2, H1, 1, True)        # upsample 4->8, then conv (stride 1)
    g_d1 = _h_tap_maps(H1, H0, 1, True)        # upsample 8->16, then conv
    # TODO(synk): ReadoutConv2dBlock has upsample_flag=True but H already equals
    # output_dim here (encoder block 0 used stride 1), so no upsample is applied.
    g_ro = _h_tap_maps(H0, H0, 1, False)

    # 'cat_' layers fold the FULL weight (main||skip channels): the kernel
    # concatenates [main, skip] along lanes, so the split-K becomes one matmul.
    # TODO(synk): torch.cat((spk, skip), 1) order assumed (main half first).
    arrays = [
        _fold_conv(params["enc0_w"], g_e0), _fold_bias(params["enc0_b"], H0),
        _fold_conv(params["enc1_w"], g_e1), _fold_bias(params["enc1_b"], H1),
        _fold_conv(params["enc2_w"], g_e2), _fold_bias(params["enc2_b"], H2),
        _fold_conv(params["res1_w"], g_r), _fold_bias(params["res1_b"], H2),
        _fold_conv(params["res2_w"], g_r), _fold_bias(params["res2_b"], H2),
        _fold_conv(params["dec0_w"], g_d0), _fold_bias(params["dec0_b"], H1),
        _fold_conv(params["dec1_w"], g_d1), _fold_bias(params["dec1_b"], H0),
        _fold_conv(params["ro_w"], g_ro), _fold_bias(params["ro_b"], H0),
    ]
    return arrays


# ---------------------------------------------------------------------------
# Forward pass wrapper: batch-parallel grid, weights resident across steps.
# ---------------------------------------------------------------------------
def res_bottleneck_unet_snn(spk, params, *, batch_tile=None):
    """ResBottleneckUNetSNN forward: returns (readout membrane NCHW, [])."""
    B, cin, H, T = spk.shape
    arrays = _fold_parameters(params)

    bt = B if batch_tile is None else min(batch_tile, B)
    nt = -(-B // bt)                          # number of batch tiles (grid size)
    pad = nt * bt - B
    if pad:
        spk = jnp.concatenate(
            [spk, jnp.zeros((pad, cin, H, T), spk.dtype)], axis=0)
    bp = nt * bt

    # Batch tiles leading, time-major rows inside each tile: (nt, T*bt, Cin*H).
    x = spk.transpose(3, 0, 1, 2).reshape(T, bp, cin * H)
    x = (x.reshape(T, nt, bt, cin * H).transpose(1, 0, 2, 3)
          .reshape(nt, T * bt, cin * H).astype(jnp.float32))

    kernel = functools.partial(
        _unet_kernel, bt=bt, nb_steps=T, beta=BETA, thresh=THRESH)

    def w_spec(a):
        # Constant index map -> weights stay VMEM-resident across grid steps.
        return pl.BlockSpec(a.shape, lambda i: (0,) * a.ndim)

    out = pl.pallas_call(
        kernel,
        out_shape=jax.ShapeDtypeStruct((nt, T * bt, H), jnp.float32),
        grid=(nt,),
        in_specs=[pl.BlockSpec((None, T * bt, cin * H), lambda i: (i, 0, 0))]
                 + [w_spec(a) for a in arrays],
        out_specs=pl.BlockSpec((None, T * bt, H), lambda i: (i, 0, 0)),
        compiler_params=pltpu.CompilerParams(
            dimension_semantics=("parallel",)),
    )(x, *arrays)

    # (nt, T*bt, H) -> NCHW (B, 1, H, T)
    mem = (out.reshape(nt, T, bt, H).transpose(0, 2, 3, 1)
              .reshape(bp, 1, H, T))[:B]
    return mem, []    # (mem, output) with use_intermediate_output=False


# ---------------------------------------------------------------------------
# Deterministic parameter init (synthetic weights in the module's conv layout).
# ---------------------------------------------------------------------------
def init_params(key):
    def conv_init(k, cout, cin, ksz=3):
        kw_, kb_ = jax.random.split(k)
        fan_in = cin * ksz * ksz
        w = jax.random.normal(kw_, (cout, cin, ksz, ksz), jnp.float32) / jnp.sqrt(fan_in)
        b = 0.01 * jax.random.normal(kb_, (cout,), jnp.float32)
        return w, b

    keys = jax.random.split(key, 8)
    c0, c1, c2 = HIDDEN_CHANNELS
    p = {}
    p["enc0_w"], p["enc0_b"] = conv_init(keys[0], c0, 1)
    p["enc1_w"], p["enc1_b"] = conv_init(keys[1], c1, c0)
    p["enc2_w"], p["enc2_b"] = conv_init(keys[2], c2, c1)
    p["res1_w"], p["res1_b"] = conv_init(keys[3], c2, c2)
    p["res2_w"], p["res2_b"] = conv_init(keys[4], c2, c2)
    p["dec0_w"], p["dec0_b"] = conv_init(keys[5], c1, c2)
    p["dec1_w"], p["dec1_b"] = conv_init(keys[6], c0, 2 * c1)
    p["ro_w"], p["ro_b"] = conv_init(keys[7], 1, 2 * c0)
    return p


if __name__ == "__main__":
    key = jax.random.PRNGKey(0)
    kx, kp = jax.random.split(key)
    # Input spikes: (batch=2, channels=1, input_dim=16, nb_steps=8), binary.
    x = (jax.random.uniform(kx, (BATCH, 1, INPUT_DIM, NB_STEPS)) < 0.3).astype(jnp.float32)
    params = init_params(kp)

    mem, intermediate = jax.jit(res_bottleneck_unet_snn)(x, params)
    jax.block_until_ready(mem)

    assert mem.shape == (BATCH, 1, INPUT_DIM, NB_STEPS), mem.shape
    assert intermediate == []
    print("KERNEL_OK")
</pallas_src>

<mosaic_0001>
module attributes {stable_mosaic.version = 11 : i64} {
  func.func @_unet_kernel(%arg0: i32, %arg1: memref<1x16x16xf32, #tpu.memory_space<vmem>>, %arg2: memref<48x128xbf16, #tpu.memory_space<vmem>>, %arg3: memref<1x128xf32, #tpu.memory_space<vmem>>, %arg4: memref<384x128xbf16, #tpu.memory_space<vmem>>, %arg5: memref<1x128xf32, #tpu.memory_space<vmem>>, %arg6: memref<384x128xbf16, #tpu.memory_space<vmem>>, %arg7: memref<1x128xf32, #tpu.memory_space<vmem>>, %arg8: memref<384x128xbf16, #tpu.memory_space<vmem>>, %arg9: memref<1x128xf32, #tpu.memory_space<vmem>>, %arg10: memref<384x128xbf16, #tpu.memory_space<vmem>>, %arg11: memref<1x128xf32, #tpu.memory_space<vmem>>, %arg12: memref<384x128xbf16, #tpu.memory_space<vmem>>, %arg13: memref<1x128xf32, #tpu.memory_space<vmem>>, %arg14: memref<768x128xbf16, #tpu.memory_space<vmem>>, %arg15: memref<1x128xf32, #tpu.memory_space<vmem>>, %arg16: memref<768x16xbf16, #tpu.memory_space<vmem>>, %arg17: memref<1x16xf32, #tpu.memory_space<vmem>>, %arg18: memref<1x16x16xf32, #tpu.memory_space<vmem>>) attributes {dimension_semantics = [#tpu.dimension_semantics<parallel>], iteration_bounds = array<i64: 1>, scalar_prefetch = 0 : i64, scratch_operands = 0 : i64, tpu.core_type = #tpu.core_type<tc>, window_params = [{transform_indices = @transform_0, window_bounds = array<i64: 1, 16, 16>}, {pipeline_mode = #tpu.pipeline_mode<synchronous>, transform_indices = @transform_1, window_bounds = array<i64: 48, 128>}, {pipeline_mode = #tpu.pipeline_mode<synchronous>, transform_indices = @transform_2, window_bounds = array<i64: 1, 128>}, {pipeline_mode = #tpu.pipeline_mode<synchronous>, transform_indices = @transform_3, window_bounds = array<i64: 384, 128>}, {pipeline_mode = #tpu.pipeline_mode<synchronous>, transform_indices = @transform_4, window_bounds = array<i64: 1, 128>}, {pipeline_mode = #tpu.pipeline_mode<synchronous>, transform_indices = @transform_5, window_bounds = array<i64: 384, 128>}, {pipeline_mode = #tpu.pipeline_mode<synchronous>, transform_indices = @transform_6, window_bounds = array<i64: 1, 128>}, {pipeline_mode = #tpu.pipeline_mode<synchronous>, transform_indices = @transform_7, window_bounds = array<i64: 384, 128>}, {pipeline_mode = #tpu.pipeline_mode<synchronous>, transform_indices = @transform_8, window_bounds = array<i64: 1, 128>}, {pipeline_mode = #tpu.pipeline_mode<synchronous>, transform_indices = @transform_9, window_bounds = array<i64: 384, 128>}, {pipeline_mode = #tpu.pipeline_mode<synchronous>, transform_indices = @transform_10, window_bounds = array<i64: 1, 128>}, {pipeline_mode = #tpu.pipeline_mode<synchronous>, transform_indices = @transform_11, window_bounds = array<i64: 384, 128>}, {pipeline_mode = #tpu.pipeline_mode<synchronous>, transform_indices = @transform_12, window_bounds = array<i64: 1, 128>}, {pipeline_mode = #tpu.pipeline_mode<synchronous>, transform_indices = @transform_13, window_bounds = array<i64: 768, 128>}, {pipeline_mode = #tpu.pipeline_mode<synchronous>, transform_indices = @transform_14, window_bounds = array<i64: 1, 128>}, {pipeline_mode = #tpu.pipeline_mode<synchronous>, transform_indices = @transform_15, window_bounds = array<i64: 768, 16>}, {pipeline_mode = #tpu.pipeline_mode<synchronous>, transform_indices = @transform_16, window_bounds = array<i64: 1, 16>}, {transform_indices = @transform_17, window_bounds = array<i64: 1, 16, 16>}]} {
    %c0 = arith.constant 0 : index
    %c0_0 = arith.constant 0 : index
    %c0_1 = arith.constant 0 : index
    %0 = vector.load %arg1[%c0, %c0_0, %c0_1] : memref<1x16x16xf32, #tpu.memory_space<vmem>>, vector<1x16x16xf32>
    %1 = vector.shape_cast %0 : vector<1x16x16xf32> to vector<16x16xf32>
    %2 = tpu.iota {dimensions = array<i32: 0>} : vector<16x16xi32>
    %c2_i32 = arith.constant 2 : i32
    %3 = vector.broadcast %c2_i32 : i32 to vector<16x16xi32>
    %4 = arith.cmpi slt, %2, %3 : vector<16x16xi32>
    %c2_i32_2 = arith.constant 2 : i32
    %5 = tpu.dynamic_rotate %1 by %c2_i32_2 dim 0 : vector<16x16xf32>, i32 -> vector<16x16xf32>
    %cst = arith.constant 0.000000e+00 : f32
    %6 = vector.broadcast %cst : f32 to vector<16x16xf32>
    %7 = arith.select %4, %6, %5 : vector<16x16xi1>, vector<16x16xf32>
    %c14_i32 = arith.constant 14 : i32
    %8 = vector.broadcast %c14_i32 : i32 to vector<16x16xi32>
    %9 = arith.cmpi sge, %2, %8 : vector<16x16xi32>
    %c14_i32_3 = arith.constant 14 : i32
    %10 = tpu.dynamic_rotate %1 by %c14_i32_3 dim 0 : vector<16x16xf32>, i32 -> vector<16x16xf32>
    %cst_4 = arith.constant 0.000000e+00 : f32
    %11 = vector.broadcast %cst_4 : f32 to vector<16x16xf32>
    %12 = arith.select %9, %11, %10 : vector<16x16xi1>, vector<16x16xf32>
    %13 = tpu.concatenate %7, %1, %12 in 1 : vector<16x16xf32>, vector<16x16xf32>, vector<16x16xf32> -> vector<16x48xf32>
    %14 = arith.truncf %13 : vector<16x48xf32> to vector<16x48xbf16>
    %c0_5 = arith.constant 0 : index
    %c0_6 = arith.constant 0 : index
    %15 = vector.load %arg2[%c0_5, %c0_6] : memref<48x128xbf16, #tpu.memory_space<vmem>>, vector<48x128xbf16>
    %cst_7 = arith.constant dense<0.000000e+00> : vector<16x128xf32>
    %16 = tpu.matmul %14, %15, %cst_7 {dimension_numbers = #tpu.dot_dimension_numbers<[1], [0], [0], [1], [0, 0, 1, 1], [], []>} : vector<16x48xbf16>, vector<48x128xbf16>, vector<16x128xf32> -> vector<16x128xf32>
    %c0_8 = arith.constant 0 : index
    %c0_9 = arith.constant 0 : index
    %17 = vector.load %arg3[%c0_8, %c0_9] : memref<1x128xf32, #tpu.memory_space<vmem>>, vector<1x128xf32>
    %18 = vector.broadcast %17 : vector<1x128xf32> to vector<16x128xf32>
    %19 = arith.addf %16, %18 : vector<16x128xf32>
    %cst_10 = arith.constant 0.000000e+00 : f32
    %20 = vector.broadcast %cst_10 : f32 to vector<2x128xf32>
    %cst_11 = arith.constant 0.899999976 : f32
    %21 = vector.broadcast %cst_11 : f32 to vector<2x128xf32>
    %22 = arith.mulf %21, %20 : vector<2x128xf32>
    %23 = vector.extract_strided_slice %19 {offsets = [0, 0], sizes = [2, 128], strides = [1, 1]} : vector<16x128xf32> to vector<2x128xf32>
    %24 = arith.addf %22, %23 : vector<2x128xf32>
    %cst_12 = arith.constant 1.000000e+00 : f32
    %25 = vector.broadcast %cst_12 : f32 to vector<2x128xf32>
    %26 = arith.cmpf oge, %24, %25 : vector<2x128xf32>
    %27 = arith.extui %26 : vector<2x128xi1> to vector<2x128xi32>
    %28 = arith.sitofp %27 : vector<2x128xi32> to vector<2x128xf32>
    %cst_13 = arith.constant 1.000000e+00 : f32
    %29 = vector.broadcast %cst_13 : f32 to vector<2x128xf32>
    %30 = arith.mulf %28, %29 : vector<2x128xf32>
    %31 = arith.subf %24, %30 : vector<2x128xf32>
    %cst_14 = arith.constant 0.899999976 : f32
    %32 = vector.broadcast %cst_14 : f32 to vector<2x128xf32>
    %33 = arith.mulf %32, %31 : vector<2x128xf32>
    %34 = vector.extract_strided_slice %19 {offsets = [2, 0], sizes = [2, 128], strides = [1, 1]} : vector<16x128xf32> to vector<2x128xf32>
    %35 = arith.addf %33, %34 : vector<2x128xf32>
    %cst_15 = arith.constant 1.000000e+00 : f32
    %36 = vector.broadcast %cst_15 : f32 to vector<2x128xf32>
    %37 = arith.cmpf oge, %35, %36 : vector<2x128xf32>
    %38 = arith.extui %37 : vector<2x128xi1> to vector<2x128xi32>
    %39 = arith.sitofp %38 : vector<2x128xi32> to vector<2x128xf32>
    %cst_16 = arith.constant 1.000000e+00 : f32
    %40 = vector.broadcast %cst_16 : f32 to vector<2x128xf32>
    %41 = arith.mulf %39, %40 : vector<2x128xf32>
    %42 = arith.subf %35, %41 : vector<2x128xf32>
    %cst_17 = arith.constant 0.899999976 : f32
    %43 = vector.broadcast %cst_17 : f32 to vector<2x128xf32>
    %44 = arith.mulf %43, %42 : vector<2x128xf32>
    %45 = vector.extract_strided_slice %19 {offsets = [4, 0], sizes = [2, 128], strides = [1, 1]} : vector<16x128xf32> to vector<2x128xf32>
    %46 = arith.addf %44, %45 : vector<2x128xf32>
    %cst_18 = arith.constant 1.000000e+00 : f32
    %47 = vector.broadcast %cst_18 : f32 to vector<2x128xf32>
    %48 = arith.cmpf oge, %46, %47 : vector<2x128xf32>
    %49 = arith.extui %48 : vector<2x128xi1> to vector<2x128xi32>
    %50 = arith.sitofp %49 : vector<2x128xi32> to vector<2x128xf32>
    %cst_19 = arith.constant 1.000000e+00 : f32
    %51 = vector.broadcast %cst_19 : f32 to vector<2x128xf32>
    %52 = arith.mulf %50, %51 : vector<2x128xf32>
    %53 = arith.subf %46, %52 : vector<2x128xf32>
    %cst_20 = arith.constant 0.899999976 : f32
    %54 = vector.broadcast %cst_20 : f32 to vector<2x128xf32>
    %55 = arith.mulf %54, %53 : vector<2x128xf32>
    %56 = vector.extract_strided_slice %19 {offsets = [6, 0], sizes = [2, 128], strides = [1, 1]} : vector<16x128xf32> to vector<2x128xf32>
    %57 = arith.addf %55, %56 : vector<2x128xf32>
    %cst_21 = arith.constant 1.000000e+00 : f32
    %58 = vector.broadcast %cst_21 : f32 to vector<2x128xf32>
    %59 = arith.cmpf oge, %57, %58 : vector<2x128xf32>
    %60 = arith.extui %59 : vector<2x128xi1> to vector<2x128xi32>
    %61 = arith.sitofp %60 : vector<2x128xi32> to vector<2x128xf32>
    %cst_22 = arith.constant 1.000000e+00 : f32
    %62 = vector.broadcast %cst_22 : f32 to vector<2x128xf32>
    %63 = arith.mulf %61, %62 : vector<2x128xf32>
    %64 = arith.subf %57, %63 : vector<2x128xf32>
    %cst_23 = arith.constant 0.899999976 : f32
    %65 = vector.broadcast %cst_23 : f32 to vector<2x128xf32>
    %66 = arith.mulf %65, %64 : vector<2x128xf32>
    %67 = vector.extract_strided_slice %19 {offsets = [8, 0], sizes = [2, 128], strides = [1, 1]} : vector<16x128xf32> to vector<2x128xf32>
    %68 = arith.addf %66, %67 : vector<2x128xf32>
    %cst_24 = arith.constant 1.000000e+00 : f32
    %69 = vector.broadcast %cst_24 : f32 to vector<2x128xf32>
    %70 = arith.cmpf oge, %68, %69 : vector<2x128xf32>
    %71 = arith.extui %70 : vector<2x128xi1> to vector<2x128xi32>
    %72 = arith.sitofp %71 : vector<2x128xi32> to vector<2x128xf32>
    %cst_25 = arith.constant 1.000000e+00 : f32
    %73 = vector.broadcast %cst_25 : f32 to vector<2x128xf32>
    %74 = arith.mulf %72, %73 : vector<2x128xf32>
    %75 = arith.subf %68, %74 : vector<2x128xf32>
    %cst_26 = arith.constant 0.899999976 : f32
    %76 = vector.broadcast %cst_26 : f32 to vector<2x128xf32>
    %77 = arith.mulf %76, %75 : vector<2x128xf32>
    %78 = vector.extract_strided_slice %19 {offsets = [10, 0], sizes = [2, 128], strides = [1, 1]} : vector<16x128xf32> to vector<2x128xf32>
    %79 = arith.addf %77, %78 : vector<2x128xf32>
    %cst_27 = arith.constant 1.000000e+00 : f32
    %80 = vector.broadcast %cst_27 : f32 to vector<2x128xf32>
    %81 = arith.cmpf oge, %79, %80 : vector<2x128xf32>
    %82 = arith.extui %81 : vector<2x128xi1> to vector<2x128xi32>
    %83 = arith.sitofp %82 : vector<2x128xi32> to vector<2x128xf32>
    %cst_28 = arith.constant 1.000000e+00 : f32
    %84 = vector.broadcast %cst_28 : f32 to vector<2x128xf32>
    %85 = arith.mulf %83, %84 : vector<2x128xf32>
    %86 = arith.subf %79, %85 : vector<2x128xf32>
    %cst_29 = arith.constant 0.899999976 : f32
    %87 = vector.broadcast %cst_29 : f32 to vector<2x128xf32>
    %88 = arith.mulf %87, %86 : vector<2x128xf32>
    %89 = vector.extract_strided_slice %19 {offsets = [12, 0], sizes = [2, 128], strides = [1, 1]} : vector<16x128xf32> to vector<2x128xf32>
    %90 = arith.addf %88, %89 : vector<2x128xf32>
    %cst_30 = arith.constant 1.000000e+00 : f32
    %91 = vector.broadcast %cst_30 : f32 to vector<2x128xf32>
    %92 = arith.cmpf oge, %90, %91 : vector<2x128xf32>
    %93 = arith.extui %92 : vector<2x128xi1> to vector<2x128xi32>
    %94 = arith.sitofp %93 : vector<2x128xi32> to vector<2x128xf32>
    %cst_31 = arith.constant 1.000000e+00 : f32
    %95 = vector.broadcast %cst_31 : f32 to vector<2x128xf32>
    %96 = arith.mulf %94, %95 : vector<2x128xf32>
    %97 = arith.subf %90, %96 : vector<2x128xf32>
    %cst_32 = arith.constant 0.899999976 : f32
    %98 = vector.broadcast %cst_32 : f32 to vector<2x128xf32>
    %99 = arith.mulf %98, %97 : vector<2x128xf32>
    %100 = vector.extract_strided_slice %19 {offsets = [14, 0], sizes = [2, 128], strides = [1, 1]} : vector<16x128xf32> to vector<2x128xf32>
    %101 = arith.addf %99, %100 : vector<2x128xf32>
    %cst_33 = arith.constant 1.000000e+00 : f32
    %102 = vector.broadcast %cst_33 : f32 to vector<2x128xf32>
    %103 = arith.cmpf oge, %101, %102 : vector<2x128xf32>
    %104 = arith.extui %103 : vector<2x128xi1> to vector<2x128xi32>
    %105 = arith.sitofp %104 : vector<2x128xi32> to vector<2x128xf32>
    %106 = tpu.concatenate %28, %39, %50, %61, %72, %83, %94, %105 in 0 : vector<2x128xf32>, vector<2x128xf32>, vector<2x128xf32>, vector<2x128xf32>, vector<2x128xf32>, vector<2x128xf32>, vector<2x128xf32>, vector<2x128xf32> -> vector<16x128xf32>
    %107 = tpu.iota {dimensions = array<i32: 0>} : vector<16x128xi32>
    %c2_i32_34 = arith.constant 2 : i32
    %108 = vector.broadcast %c2_i32_34 : i32 to vector<16x128xi32>
    %109 = arith.cmpi slt, %107, %108 : vector<16x128xi32>
    %c2_i32_35 = arith.constant 2 : i32
    %110 = tpu.dynamic_rotate %106 by %c2_i32_35 dim 0 : vector<16x128xf32>, i32 -> vector<16x128xf32>
    %cst_36 = arith.constant 0.000000e+00 : f32
    %111 = vector.broadcast %cst_36 : f32 to vector<16x128xf32>
    %112 = arith.select %109, %111, %110 : vector<16x128xi1>, vector<16x128xf32>
    %c14_i32_37 = arith.constant 14 : i32
    %113 = vector.broadcast %c14_i32_37 : i32 to vector<16x128xi32>
    %114 = arith.cmpi sge, %107, %113 : vector<16x128xi32>
    %c14_i32_38 = arith.constant 14 : i32
    %115 = tpu.dynamic_rotate %106 by %c14_i32_38 dim 0 : vector<16x128xf32>, i32 -> vector<16x128xf32>
    %cst_39 = arith.constant 0.000000e+00 : f32
    %116 = vector.broadcast %cst_39 : f32 to vector<16x128xf32>
    %117 = arith.select %114, %116, %115 : vector<16x128xi1>, vector<16x128xf32>
    %118 = tpu.concatenate %112, %106, %117 in 1 : vector<16x128xf32>, vector<16x128xf32>, vector<16x128xf32> -> vector<16x384xf32>
    %119 = arith.truncf %118 : vector<16x384xf32> to vector<16x384xbf16>
    %c0_40 = arith.constant 0 : index
    %c0_41 = arith.constant 0 : index
    %120 = vector.load %arg4[%c0_40, %c0_41] : memref<384x128xbf16, #tpu.memory_space<vmem>>, vector<384x128xbf16>
    %cst_42 = arith.constant dense<0.000000e+00> : vector<16x128xf32>
    %121 = tpu.matmul %119, %120, %cst_42 {dimension_numbers = #tpu.dot_dimension_numbers<[1], [0], [0], [1], [0, 0, 1, 1], [], []>} : vector<16x384xbf16>, vector<384x128xbf16>, vector<16x128xf32> -> vector<16x128xf32>
    %c0_43 = arith.constant 0 : index
    %c0_44 = arith.constant 0 : index
    %122 = vector.load %arg5[%c0_43, %c0_44] : memref<1x128xf32, #tpu.memory_space<vmem>>, vector<1x128xf32>
    %123 = vector.broadcast %122 : vector<1x128xf32> to vector<16x128xf32>
    %124 = arith.addf %121, %123 : vector<16x128xf32>
    %cst_45 = arith.constant 0.000000e+00 : f32
    %125 = vector.broadcast %cst_45 : f32 to vector<2x128xf32>
    %cst_46 = arith.constant 0.899999976 : f32
    %126 = vector.broadcast %cst_46 : f32 to vector<2x128xf32>
    %127 = arith.mulf %126, %125 : vector<2x128xf32>
    %128 = vector.extract_strided_slice %124 {offsets = [0, 0], sizes = [2, 128], strides = [1, 1]} : vector<16x128xf32> to vector<2x128xf32>
    %129 = arith.addf %127, %128 : vector<2x128xf32>
    %cst_47 = arith.constant 1.000000e+00 : f32
    %130 = vector.broadcast %cst_47 : f32 to vector<2x128xf32>
    %131 = arith.cmpf oge, %129, %130 : vector<2x128xf32>
    %132 = arith.extui %131 : vector<2x128xi1> to vector<2x128xi32>
    %133 = arith.sitofp %132 : vector<2x128xi32> to vector<2x128xf32>
    %cst_48 = arith.constant 1.000000e+00 : f32
    %134 = vector.broadcast %cst_48 : f32 to vector<2x128xf32>
    %135 = arith.mulf %133, %134 : vector<2x128xf32>
    %136 = arith.subf %129, %135 : vector<2x128xf32>
    %cst_49 = arith.constant 0.899999976 : f32
    %137 = vector.broadcast %cst_49 : f32 to vector<2x128xf32>
    %138 = arith.mulf %137, %136 : vector<2x128xf32>
    %139 = vector.extract_strided_slice %124 {offsets = [2, 0], sizes = [2, 128], strides = [1, 1]} : vector<16x128xf32> to vector<2x128xf32>
    %140 = arith.addf %138, %139 : vector<2x128xf32>
    %cst_50 = arith.constant 1.000000e+00 : f32
    %141 = vector.broadcast %cst_50 : f32 to vector<2x128xf32>
    %142 = arith.cmpf oge, %140, %141 : vector<2x128xf32>
    %143 = arith.extui %142 : vector<2x128xi1> to vector<2x128xi32>
    %144 = arith.sitofp %143 : vector<2x128xi32> to vector<2x128xf32>
    %cst_51 = arith.constant 1.000000e+00 : f32
    %145 = vector.broadcast %cst_51 : f32 to vector<2x128xf32>
    %146 = arith.mulf %144, %145 : vector<2x128xf32>
    %147 = arith.subf %140, %146 : vector<2x128xf32>
    %cst_52 = arith.constant 0.899999976 : f32
    %148 = vector.broadcast %cst_52 : f32 to vector<2x128xf32>
    %149 = arith.mulf %148, %147 : vector<2x128xf32>
    %150 = vector.extract_strided_slice %124 {offsets = [4, 0], sizes = [2, 128], strides = [1, 1]} : vector<16x128xf32> to vector<2x128xf32>
    %151 = arith.addf %149, %150 : vector<2x128xf32>
    %cst_53 = arith.constant 1.000000e+00 : f32
    %152 = vector.broadcast %cst_53 : f32 to vector<2x128xf32>
    %153 = arith.cmpf oge, %151, %152 : vector<2x128xf32>
    %154 = arith.extui %153 : vector<2x128xi1> to vector<2x128xi32>
    %155 = arith.sitofp %154 : vector<2x128xi32> to vector<2x128xf32>
    %cst_54 = arith.constant 1.000000e+00 : f32
    %156 = vector.broadcast %cst_54 : f32 to vector<2x128xf32>
    %157 = arith.mulf %155, %156 : vector<2x128xf32>
    %158 = arith.subf %151, %157 : vector<2x128xf32>
    %cst_55 = arith.constant 0.899999976 : f32
    %159 = vector.broadcast %cst_55 : f32 to vector<2x128xf32>
    %160 = arith.mulf %159, %158 : vector<2x128xf32>
    %161 = vector.extract_strided_slice %124 {offsets = [6, 0], sizes = [2, 128], strides = [1, 1]} : vector<16x128xf32> to vector<2x128xf32>
    %162 = arith.addf %160, %161 : vector<2x128xf32>
    %cst_56 = arith.constant 1.000000e+00 : f32
    %163 = vector.broadcast %cst_56 : f32 to vector<2x128xf32>
    %164 = arith.cmpf oge, %162, %163 : vector<2x128xf32>
    %165 = arith.extui %164 : vector<2x128xi1> to vector<2x128xi32>
    %166 = arith.sitofp %165 : vector<2x128xi32> to vector<2x128xf32>
    %cst_57 = arith.constant 1.000000e+00 : f32
    %167 = vector.broadcast %cst_57 : f32 to vector<2x128xf32>
    %168 = arith.mulf %166, %167 : vector<2x128xf32>
    %169 = arith.subf %162, %168 : vector<2x128xf32>
    %cst_58 = arith.constant 0.899999976 : f32
    %170 = vector.broadcast %cst_58 : f32 to vector<2x128xf32>
    %171 = arith.mulf %170, %169 : vector<2x128xf32>
    %172 = vector.extract_strided_slice %124 {offsets = [8, 0], sizes = [2, 128], strides = [1, 1]} : vector<16x128xf32> to vector<2x128xf32>
    %173 = arith.addf %171, %172 : vector<2x128xf32>
    %cst_59 = arith.constant 1.000000e+00 : f32
    %174 = vector.broadcast %cst_59 : f32 to vector<2x128xf32>
    %175 = arith.cmpf oge, %173, %174 : vector<2x128xf32>
    %176 = arith.extui %175 : vector<2x128xi1> to vector<2x128xi32>
    %177 = arith.sitofp %176 : vector<2x128xi32> to vector<2x128xf32>
    %cst_60 = arith.constant 1.000000e+00 : f32
    %178 = vector.broadcast %cst_60 : f32 to vector<2x128xf32>
    %179 = arith.mulf %177, %178 : vector<2x128xf32>
    %180 = arith.subf %173, %179 : vector<2x128xf32>
    %cst_61 = arith.constant 0.899999976 : f32
    %181 = vector.broadcast %cst_61 : f32 to vector<2x128xf32>
    %182 = arith.mulf %181, %180 : vector<2x128xf32>
    %183 = vector.extract_strided_slice %124 {offsets = [10, 0], sizes = [2, 128], strides = [1, 1]} : vector<16x128xf32> to vector<2x128xf32>
    %184 = arith.addf %182, %183 : vector<2x128xf32>
    %cst_62 = arith.constant 1.000000e+00 : f32
    %185 = vector.broadcast %cst_62 : f32 to vector<2x128xf32>
    %186 = arith.cmpf oge, %184, %185 : vector<2x128xf32>
    %187 = arith.extui %186 : vector<2x128xi1> to vector<2x128xi32>
    %188 = arith.sitofp %187 : vector<2x128xi32> to vector<2x128xf32>
    %cst_63 = arith.constant 1.000000e+00 : f32
    %189 = vector.broadcast %cst_63 : f32 to vector<2x128xf32>
    %190 = arith.mulf %188, %189 : vector<2x128xf32>
    %191 = arith.subf %184, %190 : vector<2x128xf32>
    %cst_64 = arith.constant 0.899999976 : f32
    %192 = vector.broadcast %cst_64 : f32 to vector<2x128xf32>
    %193 = arith.mulf %192, %191 : vector<2x128xf32>
    %194 = vector.extract_strided_slice %124 {offsets = [12, 0], sizes = [2, 128], strides = [1, 1]} : vector<16x128xf32> to vector<2x128xf32>
    %195 = arith.addf %193, %194 : vector<2x128xf32>
    %cst_65 = arith.constant 1.000000e+00 : f32
    %196 = vector.broadcast %cst_65 : f32 to vector<2x128xf32>
    %197 = arith.cmpf oge, %195, %196 : vector<2x128xf32>
    %198 = arith.extui %197 : vector<2x128xi1> to vector<2x128xi32>
    %199 = arith.sitofp %198 : vector<2x128xi32> to vector<2x128xf32>
    %cst_66 = arith.constant 1.000000e+00 : f32
    %200 = vector.broadcast %cst_66 : f32 to vector<2x128xf32>
    %201 = arith.mulf %199, %200 : vector<2x128xf32>
    %202 = arith.subf %195, %201 : vector<2x128xf32>
    %cst_67 = arith.constant 0.899999976 : f32
    %203 = vector.broadcast %cst_67 : f32 to vector<2x128xf32>
    %204 = arith.mulf %203, %202 : vector<2x128xf32>
    %205 = vector.extract_strided_slice %124 {offsets = [14, 0], sizes = [2, 128], strides = [1, 1]} : vector<16x128xf32> to vector<2x128xf32>
    %206 = arith.addf %204, %205 : vector<2x128xf32>
    %cst_68 = arith.constant 1.000000e+00 : f32
    %207 = vector.broadcast %cst_68 : f32 to vector<2x128xf32>
    %208 = arith.cmpf oge, %206, %207 : vector<2x128xf32>
    %209 = arith.extui %208 : vector<2x128xi1> to vector<2x128xi32>
    %210 = arith.sitofp %209 : vector<2x128xi32> to vector<2x128xf32>
    %211 = tpu.concatenate %133, %144, %155, %166, %177, %188, %199, %210 in 0 : vector<2x128xf32>, vector<2x128xf32>, vector<2x128xf32>, vector<2x128xf32>, vector<2x128xf32>, vector<2x128xf32>, vector<2x128xf32>, vector<2x128xf32> -> vector<16x128xf32>
    %212 = tpu.iota {dimensions = array<i32: 0>} : vector<16x128xi32>
    %c2_i32_69 = arith.constant 2 : i32
    %213 = vector.broadcast %c2_i32_69 : i32 to vector<16x128xi32>
    %214 = arith.cmpi slt, %212, %213 : vector<16x128xi32>
    %c2_i32_70 = arith.constant 2 : i32
    %215 = tpu.dynamic_rotate %211 by %c2_i32_70 dim 0 : vector<16x128xf32>, i32 -> vector<16x128xf32>
    %cst_71 = arith.constant 0.000000e+00 : f32
    %216 = vector.broadcast %cst_71 : f32 to vector<16x128xf32>
    %217 = arith.select %214, %216, %215 : vector<16x128xi1>, vector<16x128xf32>
    %c14_i32_72 = arith.constant 14 : i32
    %218 = vector.broadcast %c14_i32_72 : i32 to vector<16x128xi32>
    %219 = arith.cmpi sge, %212, %218 : vector<16x128xi32>
    %c14_i32_73 = arith.constant 14 : i32
    %220 = tpu.dynamic_rotate %211 by %c14_i32_73 dim 0 : vector<16x128xf32>, i32 -> vector<16x128xf32>
    %cst_74 = arith.constant 0.000000e+00 : f32
    %221 = vector.broadcast %cst_74 : f32 to vector<16x128xf32>
    %222 = arith.select %219, %221, %220 : vector<16x128xi1>, vector<16x128xf32>
    %223 = tpu.concatenate %217, %211, %222 in 1 : vector<16x128xf32>, vector<16x128xf32>, vector<16x128xf32> -> vector<16x384xf32>
    %224 = arith.truncf %223 : vector<16x384xf32> to vector<16x384xbf16>
    %c0_75 = arith.constant 0 : index
    %c0_76 = arith.constant 0 : index
    %225 = vector.load %arg6[%c0_75, %c0_76] : memref<384x128xbf16, #tpu.memory_space<vmem>>, vector<384x128xbf16>
    %cst_77 = arith.constant dense<0.000000e+00> : vector<16x128xf32>
    %226 = tpu.matmul %224, %225, %cst_77 {dimension_numbers = #tpu.dot_dimension_numbers<[1], [0], [0], [1], [0, 0, 1, 1], [], []>} : vector<16x384xbf16>, vector<384x128xbf16>, vector<16x128xf32> -> vector<16x128xf32>
    %c0_78 = arith.constant 0 : index
    %c0_79 = arith.constant 0 : index
    %227 = vector.load %arg7[%c0_78, %c0_79] : memref<1x128xf32, #tpu.memory_space<vmem>>, vector<1x128xf32>
    %228 = vector.broadcast %227 : vector<1x128xf32> to vector<16x128xf32>
    %229 = arith.addf %226, %228 : vector<16x128xf32>
    %cst_80 = arith.constant 0.000000e+00 : f32
    %230 = vector.broadcast %cst_80 : f32 to vector<2x128xf32>
    %cst_81 = arith.constant 0.899999976 : f32
    %231 = vector.broadcast %cst_81 : f32 to vector<2x128xf32>
    %232 = arith.mulf %231, %230 : vector<2x128xf32>
    %233 = vector.extract_strided_slice %229 {offsets = [0, 0], sizes = [2, 128], strides = [1, 1]} : vector<16x128xf32> to vector<2x128xf32>
    %234 = arith.addf %232, %233 : vector<2x128xf32>
    %cst_82 = arith.constant 1.000000e+00 : f32
    %235 = vector.broadcast %cst_82 : f32 to vector<2x128xf32>
    %236 = arith.cmpf oge, %234, %235 : vector<2x128xf32>
    %237 = arith.extui %236 : vector<2x128xi1> to vector<2x128xi32>
    %238 = arith.sitofp %237 : vector<2x128xi32> to vector<2x128xf32>
    %cst_83 = arith.constant 1.000000e+00 : f32
    %239 = vector.broadcast %cst_83 : f32 to vector<2x128xf32>
    %240 = arith.mulf %238, %239 : vector<2x128xf32>
    %241 = arith.subf %234, %240 : vector<2x128xf32>
    %cst_84 = arith.constant 0.899999976 : f32
    %242 = vector.broadcast %cst_84 : f32 to vector<2x128xf32>
    %243 = arith.mulf %242, %241 : vector<2x128xf32>
    %244 = vector.extract_strided_slice %229 {offsets = [2, 0], sizes = [2, 128], strides = [1, 1]} : vector<16x128xf32> to vector<2x128xf32>
    %245 = arith.addf %243, %244 : vector<2x128xf32>
    %cst_85 = arith.constant 1.000000e+00 : f32
    %246 = vector.broadcast %cst_85 : f32 to vector<2x128xf32>
    %247 = arith.cmpf oge, %245, %246 : vector<2x128xf32>
    %248 = arith.extui %247 : vector<2x128xi1> to vector<2x128xi32>
    %249 = arith.sitofp %248 : vector<2x128xi32> to vector<2x128xf32>
    %cst_86 = arith.constant 1.000000e+00 : f32
    %250 = vector.broadcast %cst_86 : f32 to vector<2x128xf32>
    %251 = arith.mulf %249, %250 : vector<2x128xf32>
    %252 = arith.subf %245, %251 : vector<2x128xf32>
    %cst_87 = arith.constant 0.899999976 : f32
    %253 = vector.broadcast %cst_87 : f32 to vector<2x128xf32>
    %254 = arith.mulf %253, %252 : vector<2x128xf32>
    %255 = vector.extract_strided_slice %229 {offsets = [4, 0], sizes = [2, 128], strides = [1, 1]} : vector<16x128xf32> to vector<2x128xf32>
    %256 = arith.addf %254, %255 : vector<2x128xf32>
    %cst_88 = arith.constant 1.000000e+00 : f32
    %257 = vector.broadcast %cst_88 : f32 to vector<2x128xf32>
    %258 = arith.cmpf oge, %256, %257 : vector<2x128xf32>
    %259 = arith.extui %258 : vector<2x128xi1> to vector<2x128xi32>
    %260 = arith.sitofp %259 : vector<2x128xi32> to vector<2x128xf32>
    %cst_89 = arith.constant 1.000000e+00 : f32
    %261 = vector.broadcast %cst_89 : f32 to vector<2x128xf32>
    %262 = arith.mulf %260, %261 : vector<2x128xf32>
    %263 = arith.subf %256, %262 : vector<2x128xf32>
    %cst_90 = arith.constant 0.899999976 : f32
    %264 = vector.broadcast %cst_90 : f32 to vector<2x128xf32>
    %265 = arith.mulf %264, %263 : vector<2x128xf32>
    %266 = vector.extract_strided_slice %229 {offsets = [6, 0], sizes = [2, 128], strides = [1, 1]} : vector<16x128xf32> to vector<2x128xf32>
    %267 = arith.addf %265, %266 : vector<2x128xf32>
    %cst_91 = arith.constant 1.000000e+00 : f32
    %268 = vector.broadcast %cst_91 : f32 to vector<2x128xf32>
    %269 = arith.cmpf oge, %267, %268 : vector<2x128xf32>
    %270 = arith.extui %269 : vector<2x128xi1> to vector<2x128xi32>
    %271 = arith.sitofp %270 : vector<2x128xi32> to vector<2x128xf32>
    %cst_92 = arith.constant 1.000000e+00 : f32
    %272 = vector.broadcast %cst_92 : f32 to vector<2x128xf32>
    %273 = arith.mulf %271, %272 : vector<2x128xf32>
    %274 = arith.subf %267, %273 : vector<2x128xf32>
    %cst_93 = arith.constant 0.899999976 : f32
    %275 = vector.broadcast %cst_93 : f32 to vector<2x128xf32>
    %276 = arith.mulf %275, %274 : vector<2x128xf32>
    %277 = vector.extract_strided_slice %229 {offsets = [8, 0], sizes = [2, 128], strides = [1, 1]} : vector<16x128xf32> to vector<2x128xf32>
    %278 = arith.addf %276, %277 : vector<2x128xf32>
    %cst_94 = arith.constant 1.000000e+00 : f32
    %279 = vector.broadcast %cst_94 : f32 to vector<2x128xf32>
    %280 = arith.cmpf oge, %278, %279 : vector<2x128xf32>
    %281 = arith.extui %280 : vector<2x128xi1> to vector<2x128xi32>
    %282 = arith.sitofp %281 : vector<2x128xi32> to vector<2x128xf32>
    %cst_95 = arith.constant 1.000000e+00 : f32
    %283 = vector.broadcast %cst_95 : f32 to vector<2x128xf32>
    %284 = arith.mulf %282, %283 : vector<2x128xf32>
    %285 = arith.subf %278, %284 : vector<2x128xf32>
    %cst_96 = arith.constant 0.899999976 : f32
    %286 = vector.broadcast %cst_96 : f32 to vector<2x128xf32>
    %287 = arith.mulf %286, %285 : vector<2x128xf32>
    %288 = vector.extract_strided_slice %229 {offsets = [10, 0], sizes = [2, 128], strides = [1, 1]} : vector<16x128xf32> to vector<2x128xf32>
    %289 = arith.addf %287, %288 : vector<2x128xf32>
    %cst_97 = arith.constant 1.000000e+00 : f32
    %290 = vector.broadcast %cst_97 : f32 to vector<2x128xf32>
    %291 = arith.cmpf oge, %289, %290 : vector<2x128xf32>
    %292 = arith.extui %291 : vector<2x128xi1> to vector<2x128xi32>
    %293 = arith.sitofp %292 : vector<2x128xi32> to vector<2x128xf32>
    %cst_98 = arith.constant 1.000000e+00 : f32
    %294 = vector.broadcast %cst_98 : f32 to vector<2x128xf32>
    %295 = arith.mulf %293, %294 : vector<2x128xf32>
    %296 = arith.subf %289, %295 : vector<2x128xf32>
    %cst_99 = arith.constant 0.899999976 : f32
    %297 = vector.broadcast %cst_99 : f32 to vector<2x128xf32>
    %298 = arith.mulf %297, %296 : vector<2x128xf32>
    %299 = vector.extract_strided_slice %229 {offsets = [12, 0], sizes = [2, 128], strides = [1, 1]} : vector<16x128xf32> to vector<2x128xf32>
    %300 = arith.addf %298, %299 : vector<2x128xf32>
    %cst_100 = arith.constant 1.000000e+00 : f32
    %301 = vector.broadcast %cst_100 : f32 to vector<2x128xf32>
    %302 = arith.cmpf oge, %300, %301 : vector<2x128xf32>
    %303 = arith.extui %302 : vector<2x128xi1> to vector<2x128xi32>
    %304 = arith.sitofp %303 : vector<2x128xi32> to vector<2x128xf32>
    %cst_101 = arith.constant 1.000000e+00 : f32
    %305 = vector.broadcast %cst_101 : f32 to vector<2x128xf32>
    %306 = arith.mulf %304, %305 : vector<2x128xf32>
    %307 = arith.subf %300, %306 : vector<2x128xf32>
    %cst_102 = arith.constant 0.899999976 : f32
    %308 = vector.broadcast %cst_102 : f32 to vector<2x128xf32>
    %309 = arith.mulf %308, %307 : vector<2x128xf32>
    %310 = vector.extract_strided_slice %229 {offsets = [14, 0], sizes = [2, 128], strides = [1, 1]} : vector<16x128xf32> to vector<2x128xf32>
    %311 = arith.addf %309, %310 : vector<2x128xf32>
    %cst_103 = arith.constant 1.000000e+00 : f32
    %312 = vector.broadcast %cst_103 : f32 to vector<2x128xf32>
    %313 = arith.cmpf oge, %311, %312 : vector<2x128xf32>
    %314 = arith.extui %313 : vector<2x128xi1> to vector<2x128xi32>
    %315 = arith.sitofp %314 : vector<2x128xi32> to vector<2x128xf32>
    %316 = tpu.concatenate %238, %249, %260, %271, %282, %293, %304, %315 in 0 : vector<2x128xf32>, vector<2x128xf32>, vector<2x128xf32>, vector<2x128xf32>, vector<2x128xf32>, vector<2x128xf32>, vector<2x128xf32>, vector<2x128xf32> -> vector<16x128xf32>
    %317 = tpu.iota {dimensions = array<i32: 0>} : vector<16x128xi32>
    %c2_i32_104 = arith.constant 2 : i32
    %318 = vector.broadcast %c2_i32_104 : i32 to vector<16x128xi32>
    %319 = arith.cmpi slt, %317, %318 : vector<16x128xi32>
    %c2_i32_105 = arith.constant 2 : i32
    %320 = tpu.dynamic_rotate %316 by %c2_i32_105 dim 0 : vector<16x128xf32>, i32 -> vector<16x128xf32>
    %cst_106 = arith.constant 0.000000e+00 : f32
    %321 = vector.broadcast %cst_106 : f32 to vector<16x128xf32>
    %322 = arith.select %319, %321, %320 : vector<16x128xi1>, vector<16x128xf32>
    %c14_i32_107 = arith.constant 14 : i32
    %323 = vector.broadcast %c14_i32_107 : i32 to vector<16x128xi32>
    %324 = arith.cmpi sge, %317, %323 : vector<16x128xi32>
    %c14_i32_108 = arith.constant 14 : i32
    %325 = tpu.dynamic_rotate %316 by %c14_i32_108 dim 0 : vector<16x128xf32>, i32 -> vector<16x128xf32>
    %cst_109 = arith.constant 0.000000e+00 : f32
    %326 = vector.broadcast %cst_109 : f32 to vector<16x128xf32>
    %327 = arith.select %324, %326, %325 : vector<16x128xi1>, vector<16x128xf32>
    %328 = tpu.concatenate %322, %316, %327 in 1 : vector<16x128xf32>, vector<16x128xf32>, vector<16x128xf32> -> vector<16x384xf32>
    %329 = arith.truncf %328 : vector<16x384xf32> to vector<16x384xbf16>
    %c0_110 = arith.constant 0 : index
    %c0_111 = arith.constant 0 : index
    %330 = vector.load %arg8[%c0_110, %c0_111] : memref<384x128xbf16, #tpu.memory_space<vmem>>, vector<384x128xbf16>
    %cst_112 = arith.constant dense<0.000000e+00> : vector<16x128xf32>
    %331 = tpu.matmul %329, %330, %cst_112 {dimension_numbers = #tpu.dot_dimension_numbers<[1], [0], [0], [1], [0, 0, 1, 1], [], []>} : vector<16x384xbf16>, vector<384x128xbf16>, vector<16x128xf32> -> vector<16x128xf32>
    %c0_113 = arith.constant 0 : index
    %c0_114 = arith.constant 0 : index
    %332 = vector.load %arg9[%c0_113, %c0_114] : memref<1x128xf32, #tpu.memory_space<vmem>>, vector<1x128xf32>
    %333 = vector.broadcast %332 : vector<1x128xf32> to vector<16x128xf32>
    %334 = arith.addf %331, %333 : vector<16x128xf32>
    %cst_115 = arith.constant 0.000000e+00 : f32
    %335 = vector.broadcast %cst_115 : f32 to vector<2x128xf32>
    %cst_116 = arith.constant 0.899999976 : f32
    %336 = vector.broadcast %cst_116 : f32 to vector<2x128xf32>
    %337 = arith.mulf %336, %335 : vector<2x128xf32>
    %338 = vector.extract_strided_slice %334 {offsets = [0, 0], sizes = [2, 128], strides = [1, 1]} : vector<16x128xf32> to vector<2x128xf32>
    %339 = arith.addf %337, %338 : vector<2x128xf32>
    %cst_117 = arith.constant 1.000000e+00 : f32
    %340 = vector.broadcast %cst_117 : f32 to vector<2x128xf32>
    %341 = arith.cmpf oge, %339, %340 : vector<2x128xf32>
    %342 = arith.extui %341 : vector<2x128xi1> to vector<2x128xi32>
    %343 = arith.sitofp %342 : vector<2x128xi32> to vector<2x128xf32>
    %cst_118 = arith.constant 1.000000e+00 : f32
    %344 = vector.broadcast %cst_118 : f32 to vector<2x128xf32>
    %345 = arith.mulf %343, %344 : vector<2x128xf32>
    %346 = arith.subf %339, %345 : vector<2x128xf32>
    %cst_119 = arith.constant 0.899999976 : f32
    %347 = vector.broadcast %cst_119 : f32 to vector<2x128xf32>
    %348 = arith.mulf %347, %346 : vector<2x128xf32>
    %349 = vector.extract_strided_slice %334 {offsets = [2, 0], sizes = [2, 128], strides = [1, 1]} : vector<16x128xf32> to vector<2x128xf32>
    %350 = arith.addf %348, %349 : vector<2x128xf32>
    %cst_120 = arith.constant 1.000000e+00 : f32
    %351 = vector.broadcast %cst_120 : f32 to vector<2x128xf32>
    %352 = arith.cmpf oge, %350, %351 : vector<2x128xf32>
    %353 = arith.extui %352 : vector<2x128xi1> to vector<2x128xi32>
    %354 = arith.sitofp %353 : vector<2x128xi32> to vector<2x128xf32>
    %cst_121 = arith.constant 1.000000e+00 : f32
    %355 = vector.broadcast %cst_121 : f32 to vector<2x128xf32>
    %356 = arith.mulf %354, %355 : vector<2x128xf32>
    %357 = arith.subf %350, %356 : vector<2x128xf32>
    %cst_122 = arith.constant 0.899999976 : f32
    %358 = vector.broadcast %cst_122 : f32 to vector<2x128xf32>
    %359 = arith.mulf %358, %357 : vector<2x128xf32>
    %360 = vector.extract_strided_slice %334 {offsets = [4, 0], sizes = [2, 128], strides = [1, 1]} : vector<16x128xf32> to vector<2x128xf32>
    %361 = arith.addf %359, %360 : vector<2x128xf32>
    %cst_123 = arith.constant 1.000000e+00 : f32
    %362 = vector.broadcast %cst_123 : f32 to vector<2x128xf32>
    %363 = arith.cmpf oge, %361, %362 : vector<2x128xf32>
    %364 = arith.extui %363 : vector<2x128xi1> to vector<2x128xi32>
    %365 = arith.sitofp %364 : vector<2x128xi32> to vector<2x128xf32>
    %cst_124 = arith.constant 1.000000e+00 : f32
    %366 = vector.broadcast %cst_124 : f32 to vector<2x128xf32>
    %367 = arith.mulf %365, %366 : vector<2x128xf32>
    %368 = arith.subf %361, %367 : vector<2x128xf32>
    %cst_125 = arith.constant 0.899999976 : f32
    %369 = vector.broadcast %cst_125 : f32 to vector<2x128xf32>
    %370 = arith.mulf %369, %368 : vector<2x128xf32>
    %371 = vector.extract_strided_slice %334 {offsets = [6, 0], sizes = [2, 128], strides = [1, 1]} : vector<16x128xf32> to vector<2x128xf32>
    %372 = arith.addf %370, %371 : vector<2x128xf32>
    %cst_126 = arith.constant 1.000000e+00 : f32
    %373 = vector.broadcast %cst_126 : f32 to vector<2x128xf32>
    %374 = arith.cmpf oge, %372, %373 : vector<2x128xf32>
    %375 = arith.extui %374 : vector<2x128xi1> to vector<2x128xi32>
    %376 = arith.sitofp %375 : vector<2x128xi32> to vector<2x128xf32>
    %cst_127 = arith.constant 1.000000e+00 : f32
    %377 = vector.broadcast %cst_127 : f32 to vector<2x128xf32>
    %378 = arith.mulf %376, %377 : vector<2x128xf32>
    %379 = arith.subf %372, %378 : vector<2x128xf32>
    %cst_128 = arith.constant 0.899999976 : f32
    %380 = vector.broadcast %cst_128 : f32 to vector<2x128xf32>
    %381 = arith.mulf %380, %379 : vector<2x128xf32>
    %382 = vector.extract_strided_slice %334 {offsets = [8, 0], sizes = [2, 128], strides = [1, 1]} : vector<16x128xf32> to vector<2x128xf32>
    %383 = arith.addf %381, %382 : vector<2x128xf32>
    %cst_129 = arith.constant 1.000000e+00 : f32
    %384 = vector.broadcast %cst_129 : f32 to vector<2x128xf32>
    %385 = arith.cmpf oge, %383, %384 : vector<2x128xf32>
    %386 = arith.extui %385 : vector<2x128xi1> to vector<2x128xi32>
    %387 = arith.sitofp %386 : vector<2x128xi32> to vector<2x128xf32>
    %cst_130 = arith.constant 1.000000e+00 : f32
    %388 = vector.broadcast %cst_130 : f32 to vector<2x128xf32>
    %389 = arith.mulf %387, %388 : vector<2x128xf32>
    %390 = arith.subf %383, %389 : vector<2x128xf32>
    %cst_131 = arith.constant 0.899999976 : f32
    %391 = vector.broadcast %cst_131 : f32 to vector<2x128xf32>
    %392 = arith.mulf %391, %390 : vector<2x128xf32>
    %393 = vector.extract_strided_slice %334 {offsets = [10, 0], sizes = [2, 128], strides = [1, 1]} : vector<16x128xf32> to vector<2x128xf32>
    %394 = arith.addf %392, %393 : vector<2x128xf32>
    %cst_132 = arith.constant 1.000000e+00 : f32
    %395 = vector.broadcast %cst_132 : f32 to vector<2x128xf32>
    %396 = arith.cmpf oge, %394, %395 : vector<2x128xf32>
    %397 = arith.extui %396 : vector<2x128xi1> to vector<2x128xi32>
    %398 = arith.sitofp %397 : vector<2x128xi32> to vector<2x128xf32>
    %cst_133 = arith.constant 1.000000e+00 : f32
    %399 = vector.broadcast %cst_133 : f32 to vector<2x128xf32>
    %400 = arith.mulf %398, %399 : vector<2x128xf32>
    %401 = arith.subf %394, %400 : vector<2x128xf32>
    %cst_134 = arith.constant 0.899999976 : f32
    %402 = vector.broadcast %cst_134 : f32 to vector<2x128xf32>
    %403 = arith.mulf %402, %401 : vector<2x128xf32>
    %404 = vector.extract_strided_slice %334 {offsets = [12, 0], sizes = [2, 128], strides = [1, 1]} : vector<16x128xf32> to vector<2x128xf32>
    %405 = arith.addf %403, %404 : vector<2x128xf32>
    %cst_135 = arith.constant 1.000000e+00 : f32
    %406 = vector.broadcast %cst_135 : f32 to vector<2x128xf32>
    %407 = arith.cmpf oge, %405, %406 : vector<2x128xf32>
    %408 = arith.extui %407 : vector<2x128xi1> to vector<2x128xi32>
    %409 = arith.sitofp %408 : vector<2x128xi32> to vector<2x128xf32>
    %cst_136 = arith.constant 1.000000e+00 : f32
    %410 = vector.broadcast %cst_136 : f32 to vector<2x128xf32>
    %411 = arith.mulf %409, %410 : vector<2x128xf32>
    %412 = arith.subf %405, %411 : vector<2x128xf32>
    %cst_137 = arith.constant 0.899999976 : f32
    %413 = vector.broadcast %cst_137 : f32 to vector<2x128xf32>
    %414 = arith.mulf %413, %412 : vector<2x128xf32>
    %415 = vector.extract_strided_slice %334 {offsets = [14, 0], sizes = [2, 128], strides = [1, 1]} : vector<16x128xf32> to vector<2x128xf32>
    %416 = arith.addf %414, %415 : vector<2x128xf32>
    %cst_138 = arith.constant 1.000000e+00 : f32
    %417 = vector.broadcast %cst_138 : f32 to vector<2x128xf32>
    %418 = arith.cmpf oge, %416, %417 : vector<2x128xf32>
    %419 = arith.extui %418 : vector<2x128xi1> to vector<2x128xi32>
    %420 = arith.sitofp %419 : vector<2x128xi32> to vector<2x128xf32>
    %421 = tpu.concatenate %343, %354, %365, %376, %387, %398, %409, %420 in 0 : vector<2x128xf32>, vector<2x128xf32>, vector<2x128xf32>, vector<2x128xf32>, vector<2x128xf32>, vector<2x128xf32>, vector<2x128xf32>, vector<2x128xf32> -> vector<16x128xf32>
    %422 = tpu.iota {dimensions = array<i32: 0>} : vector<16x128xi32>
    %c2_i32_139 = arith.constant 2 : i32
    %423 = vector.broadcast %c2_i32_139 : i32 to vector<16x128xi32>
    %424 = arith.cmpi slt, %422, %423 : vector<16x128xi32>
    %c2_i32_140 = arith.constant 2 : i32
    %425 = tpu.dynamic_rotate %421 by %c2_i32_140 dim 0 : vector<16x128xf32>, i32 -> vector<16x128xf32>
    %cst_141 = arith.constant 0.000000e+00 : f32
    %426 = vector.broadcast %cst_141 : f32 to vector<16x128xf32>
    %427 = arith.select %424, %426, %425 : vector<16x128xi1>, vector<16x128xf32>
    %c14_i32_142 = arith.constant 14 : i32
    %428 = vector.broadcast %c14_i32_142 : i32 to vector<16x128xi32>
    %429 = arith.cmpi sge, %422, %428 : vector<16x128xi32>
    %c14_i32_143 = arith.constant 14 : i32
    %430 = tpu.dynamic_rotate %421 by %c14_i32_143 dim 0 : vector<16x128xf32>, i32 -> vector<16x128xf32>
    %cst_144 = arith.constant 0.000000e+00 : f32
    %431 = vector.broadcast %cst_144 : f32 to vector<16x128xf32>
    %432 = arith.select %429, %431, %430 : vector<16x128xi1>, vector<16x128xf32>
    %433 = tpu.concatenate %427, %421, %432 in 1 : vector<16x128xf32>, vector<16x128xf32>, vector<16x128xf32> -> vector<16x384xf32>
    %434 = arith.truncf %433 : vector<16x384xf32> to vector<16x384xbf16>
    %c0_145 = arith.constant 0 : index
    %c0_146 = arith.constant 0 : index
    %435 = vector.load %arg10[%c0_145, %c0_146] : memref<384x128xbf16, #tpu.memory_space<vmem>>, vector<384x128xbf16>
    %cst_147 = arith.constant dense<0.000000e+00> : vector<16x128xf32>
    %436 = tpu.matmul %434, %435, %cst_147 {dimension_numbers = #tpu.dot_dimension_numbers<[1], [0], [0], [1], [0, 0, 1, 1], [], []>} : vector<16x384xbf16>, vector<384x128xbf16>, vector<16x128xf32> -> vector<16x128xf32>
    %c0_148 = arith.constant 0 : index
    %c0_149 = arith.constant 0 : index
    %437 = vector.load %arg11[%c0_148, %c0_149] : memref<1x128xf32, #tpu.memory_space<vmem>>, vector<1x128xf32>
    %438 = vector.broadcast %437 : vector<1x128xf32> to vector<16x128xf32>
    %439 = arith.addf %436, %438 : vector<16x128xf32>
    %cst_150 = arith.constant 0.000000e+00 : f32
    %440 = vector.broadcast %cst_150 : f32 to vector<2x128xf32>
    %cst_151 = arith.constant 0.899999976 : f32
    %441 = vector.broadcast %cst_151 : f32 to vector<2x128xf32>
    %442 = arith.mulf %441, %440 : vector<2x128xf32>
    %443 = vector.extract_strided_slice %439 {offsets = [0, 0], sizes = [2, 128], strides = [1, 1]} : vector<16x128xf32> to vector<2x128xf32>
    %444 = arith.addf %442, %443 : vector<2x128xf32>
    %cst_152 = arith.constant 1.000000e+00 : f32
    %445 = vector.broadcast %cst_152 : f32 to vector<2x128xf32>
    %446 = arith.cmpf oge, %444, %445 : vector<2x128xf32>
    %447 = arith.extui %446 : vector<2x128xi1> to vector<2x128xi32>
    %448 = arith.sitofp %447 : vector<2x128xi32> to vector<2x128xf32>
    %cst_153 = arith.constant 1.000000e+00 : f32
    %449 = vector.broadcast %cst_153 : f32 to vector<2x128xf32>
    %450 = arith.mulf %448, %449 : vector<2x128xf32>
    %451 = arith.subf %444, %450 : vector<2x128xf32>
    %cst_154 = arith.constant 0.899999976 : f32
    %452 = vector.broadcast %cst_154 : f32 to vector<2x128xf32>
    %453 = arith.mulf %452, %451 : vector<2x128xf32>
    %454 = vector.extract_strided_slice %439 {offsets = [2, 0], sizes = [2, 128], strides = [1, 1]} : vector<16x128xf32> to vector<2x128xf32>
    %455 = arith.addf %453, %454 : vector<2x128xf32>
    %cst_155 = arith.constant 1.000000e+00 : f32
    %456 = vector.broadcast %cst_155 : f32 to vector<2x128xf32>
    %457 = arith.cmpf oge, %455, %456 : vector<2x128xf32>
    %458 = arith.extui %457 : vector<2x128xi1> to vector<2x128xi32>
    %459 = arith.sitofp %458 : vector<2x128xi32> to vector<2x128xf32>
    %cst_156 = arith.constant 1.000000e+00 : f32
    %460 = vector.broadcast %cst_156 : f32 to vector<2x128xf32>
    %461 = arith.mulf %459, %460 : vector<2x128xf32>
    %462 = arith.subf %455, %461 : vector<2x128xf32>
    %cst_157 = arith.constant 0.899999976 : f32
    %463 = vector.broadcast %cst_157 : f32 to vector<2x128xf32>
    %464 = arith.mulf %463, %462 : vector<2x128xf32>
    %465 = vector.extract_strided_slice %439 {offsets = [4, 0], sizes = [2, 128], strides = [1, 1]} : vector<16x128xf32> to vector<2x128xf32>
    %466 = arith.addf %464, %465 : vector<2x128xf32>
    %cst_158 = arith.constant 1.000000e+00 : f32
    %467 = vector.broadcast %cst_158 : f32 to vector<2x128xf32>
    %468 = arith.cmpf oge, %466, %467 : vector<2x128xf32>
    %469 = arith.extui %468 : vector<2x128xi1> to vector<2x128xi32>
    %470 = arith.sitofp %469 : vector<2x128xi32> to vector<2x128xf32>
    %cst_159 = arith.constant 1.000000e+00 : f32
    %471 = vector.broadcast %cst_159 : f32 to vector<2x128xf32>
    %472 = arith.mulf %470, %471 : vector<2x128xf32>
    %473 = arith.subf %466, %472 : vector<2x128xf32>
    %cst_160 = arith.constant 0.899999976 : f32
    %474 = vector.broadcast %cst_160 : f32 to vector<2x128xf32>
    %475 = arith.mulf %474, %473 : vector<2x128xf32>
    %476 = vector.extract_strided_slice %439 {offsets = [6, 0], sizes = [2, 128], strides = [1, 1]} : vector<16x128xf32> to vector<2x128xf32>
    %477 = arith.addf %475, %476 : vector<2x128xf32>
    %cst_161 = arith.constant 1.000000e+00 : f32
    %478 = vector.broadcast %cst_161 : f32 to vector<2x128xf32>
    %479 = arith.cmpf oge, %477, %478 : vector<2x128xf32>
    %480 = arith.extui %479 : vector<2x128xi1> to vector<2x128xi32>
    %481 = arith.sitofp %480 : vector<2x128xi32> to vector<2x128xf32>
    %cst_162 = arith.constant 1.000000e+00 : f32
    %482 = vector.broadcast %cst_162 : f32 to vector<2x128xf32>
    %483 = arith.mulf %481, %482 : vector<2x128xf32>
    %484 = arith.subf %477, %483 : vector<2x128xf32>
    %cst_163 = arith.constant 0.899999976 : f32
    %485 = vector.broadcast %cst_163 : f32 to vector<2x128xf32>
    %486 = arith.mulf %485, %484 : vector<2x128xf32>
    %487 = vector.extract_strided_slice %439 {offsets = [8, 0], sizes = [2, 128], strides = [1, 1]} : vector<16x128xf32> to vector<2x128xf32>
    %488 = arith.addf %486, %487 : vector<2x128xf32>
    %cst_164 = arith.constant 1.000000e+00 : f32
    %489 = vector.broadcast %cst_164 : f32 to vector<2x128xf32>
    %490 = arith.cmpf oge, %488, %489 : vector<2x128xf32>
    %491 = arith.extui %490 : vector<2x128xi1> to vector<2x128xi32>
    %492 = arith.sitofp %491 : vector<2x128xi32> to vector<2x128xf32>
    %cst_165 = arith.constant 1.000000e+00 : f32
    %493 = vector.broadcast %cst_165 : f32 to vector<2x128xf32>
    %494 = arith.mulf %492, %493 : vector<2x128xf32>
    %495 = arith.subf %488, %494 : vector<2x128xf32>
    %cst_166 = arith.constant 0.899999976 : f32
    %496 = vector.broadcast %cst_166 : f32 to vector<2x128xf32>
    %497 = arith.mulf %496, %495 : vector<2x128xf32>
    %498 = vector.extract_strided_slice %439 {offsets = [10, 0], sizes = [2, 128], strides = [1, 1]} : vector<16x128xf32> to vector<2x128xf32>
    %499 = arith.addf %497, %498 : vector<2x128xf32>
    %cst_167 = arith.constant 1.000000e+00 : f32
    %500 = vector.broadcast %cst_167 : f32 to vector<2x128xf32>
    %501 = arith.cmpf oge, %499, %500 : vector<2x128xf32>
    %502 = arith.extui %501 : vector<2x128xi1> to vector<2x128xi32>
    %503 = arith.sitofp %502 : vector<2x128xi32> to vector<2x128xf32>
    %cst_168 = arith.constant 1.000000e+00 : f32
    %504 = vector.broadcast %cst_168 : f32 to vector<2x128xf32>
    %505 = arith.mulf %503, %504 : vector<2x128xf32>
    %506 = arith.subf %499, %505 : vector<2x128xf32>
    %cst_169 = arith.constant 0.899999976 : f32
    %507 = vector.broadcast %cst_169 : f32 to vector<2x128xf32>
    %508 = arith.mulf %507, %506 : vector<2x128xf32>
    %509 = vector.extract_strided_slice %439 {offsets = [12, 0], sizes = [2, 128], strides = [1, 1]} : vector<16x128xf32> to vector<2x128xf32>
    %510 = arith.addf %508, %509 : vector<2x128xf32>
    %cst_170 = arith.constant 1.000000e+00 : f32
    %511 = vector.broadcast %cst_170 : f32 to vector<2x128xf32>
    %512 = arith.cmpf oge, %510, %511 : vector<2x128xf32>
    %513 = arith.extui %512 : vector<2x128xi1> to vector<2x128xi32>
    %514 = arith.sitofp %513 : vector<2x128xi32> to vector<2x128xf32>
    %cst_171 = arith.constant 1.000000e+00 : f32
    %515 = vector.broadcast %cst_171 : f32 to vector<2x128xf32>
    %516 = arith.mulf %514, %515 : vector<2x128xf32>
    %517 = arith.subf %510, %516 : vector<2x128xf32>
    %cst_172 = arith.constant 0.899999976 : f32
    %518 = vector.broadcast %cst_172 : f32 to vector<2x128xf32>
    %519 = arith.mulf %518, %517 : vector<2x128xf32>
    %520 = vector.extract_strided_slice %439 {offsets = [14, 0], sizes = [2, 128], strides = [1, 1]} : vector<16x128xf32> to vector<2x128xf32>
    %521 = arith.addf %519, %520 : vector<2x128xf32>
    %cst_173 = arith.constant 1.000000e+00 : f32
    %522 = vector.broadcast %cst_173 : f32 to vector<2x128xf32>
    %523 = arith.cmpf oge, %521, %522 : vector<2x128xf32>
    %524 = arith.extui %523 : vector<2x128xi1> to vector<2x128xi32>
    %525 = arith.sitofp %524 : vector<2x128xi32> to vector<2x128xf32>
    %526 = tpu.concatenate %448, %459, %470, %481, %492, %503, %514, %525 in 0 : vector<2x128xf32>, vector<2x128xf32>, vector<2x128xf32>, vector<2x128xf32>, vector<2x128xf32>, vector<2x128xf32>, vector<2x128xf32>, vector<2x128xf32> -> vector<16x128xf32>
    %527 = arith.addf %526, %316 : vector<16x128xf32>
    %528 = tpu.iota {dimensions = array<i32: 0>} : vector<16x128xi32>
    %c2_i32_174 = arith.constant 2 : i32
    %529 = vector.broadcast %c2_i32_174 : i32 to vector<16x128xi32>
    %530 = arith.cmpi slt, %528, %529 : vector<16x128xi32>
    %c2_i32_175 = arith.constant 2 : i32
    %531 = tpu.dynamic_rotate %527 by %c2_i32_175 dim 0 : vector<16x128xf32>, i32 -> vector<16x128xf32>
    %cst_176 = arith.constant 0.000000e+00 : f32
    %532 = vector.broadcast %cst_176 : f32 to vector<16x128xf32>
    %533 = arith.select %530, %532, %531 : vector<16x128xi1>, vector<16x128xf32>
    %c14_i32_177 = arith.constant 14 : i32
    %534 = vector.broadcast %c14_i32_177 : i32 to vector<16x128xi32>
    %535 = arith.cmpi sge, %528, %534 : vector<16x128xi32>
    %c14_i32_178 = arith.constant 14 : i32
    %536 = tpu.dynamic_rotate %527 by %c14_i32_178 dim 0 : vector<16x128xf32>, i32 -> vector<16x128xf32>
    %cst_179 = arith.constant 0.000000e+00 : f32
    %537 = vector.broadcast %cst_179 : f32 to vector<16x128xf32>
    %538 = arith.select %535, %537, %536 : vector<16x128xi1>, vector<16x128xf32>
    %539 = tpu.concatenate %533, %527, %538 in 1 : vector<16x128xf32>, vector<16x128xf32>, vector<16x128xf32> -> vector<16x384xf32>
    %540 = arith.truncf %539 : vector<16x384xf32> to vector<16x384xbf16>
    %c0_180 = arith.constant 0 : index
    %c0_181 = arith.constant 0 : index
    %541 = vector.load %arg12[%c0_180, %c0_181] : memref<384x128xbf16, #tpu.memory_space<vmem>>, vector<384x128xbf16>
    %cst_182 = arith.constant dense<0.000000e+00> : vector<16x128xf32>
    %542 = tpu.matmul %540, %541, %cst_182 {dimension_numbers = #tpu.dot_dimension_numbers<[1], [0], [0], [1], [0, 0, 1, 1], [], []>} : vector<16x384xbf16>, vector<384x128xbf16>, vector<16x128xf32> -> vector<16x128xf32>
    %c0_183 = arith.constant 0 : index
    %c0_184 = arith.constant 0 : index
    %543 = vector.load %arg13[%c0_183, %c0_184] : memref<1x128xf32, #tpu.memory_space<vmem>>, vector<1x128xf32>
    %544 = vector.broadcast %543 : vector<1x128xf32> to vector<16x128xf32>
    %545 = arith.addf %542, %544 : vector<16x128xf32>
    %cst_185 = arith.constant 0.000000e+00 : f32
    %546 = vector.broadcast %cst_185 : f32 to vector<2x128xf32>
    %cst_186 = arith.constant 0.899999976 : f32
    %547 = vector.broadcast %cst_186 : f32 to vector<2x128xf32>
    %548 = arith.mulf %547, %546 : vector<2x128xf32>
    %549 = vector.extract_strided_slice %545 {offsets = [0, 0], sizes = [2, 128], strides = [1, 1]} : vector<16x128xf32> to vector<2x128xf32>
    %550 = arith.addf %548, %549 : vector<2x128xf32>
    %cst_187 = arith.constant 1.000000e+00 : f32
    %551 = vector.broadcast %cst_187 : f32 to vector<2x128xf32>
    %552 = arith.cmpf oge, %550, %551 : vector<2x128xf32>
    %553 = arith.extui %552 : vector<2x128xi1> to vector<2x128xi32>
    %554 = arith.sitofp %553 : vector<2x128xi32> to vector<2x128xf32>
    %cst_188 = arith.constant 1.000000e+00 : f32
    %555 = vector.broadcast %cst_188 : f32 to vector<2x128xf32>
    %556 = arith.mulf %554, %555 : vector<2x128xf32>
    %557 = arith.subf %550, %556 : vector<2x128xf32>
    %cst_189 = arith.constant 0.899999976 : f32
    %558 = vector.broadcast %cst_189 : f32 to vector<2x128xf32>
    %559 = arith.mulf %558, %557 : vector<2x128xf32>
    %560 = vector.extract_strided_slice %545 {offsets = [2, 0], sizes = [2, 128], strides = [1, 1]} : vector<16x128xf32> to vector<2x128xf32>
    %561 = arith.addf %559, %560 : vector<2x128xf32>
    %cst_190 = arith.constant 1.000000e+00 : f32
    %562 = vector.broadcast %cst_190 : f32 to vector<2x128xf32>
    %563 = arith.cmpf oge, %561, %562 : vector<2x128xf32>
    %564 = arith.extui %563 : vector<2x128xi1> to vector<2x128xi32>
    %565 = arith.sitofp %564 : vector<2x128xi32> to vector<2x128xf32>
    %cst_191 = arith.constant 1.000000e+00 : f32
    %566 = vector.broadcast %cst_191 : f32 to vector<2x128xf32>
    %567 = arith.mulf %565, %566 : vector<2x128xf32>
    %568 = arith.subf %561, %567 : vector<2x128xf32>
    %cst_192 = arith.constant 0.899999976 : f32
    %569 = vector.broadcast %cst_192 : f32 to vector<2x128xf32>
    %570 = arith.mulf %569, %568 : vector<2x128xf32>
    %571 = vector.extract_strided_slice %545 {offsets = [4, 0], sizes = [2, 128], strides = [1, 1]} : vector<16x128xf32> to vector<2x128xf32>
    %572 = arith.addf %570, %571 : vector<2x128xf32>
    %cst_193 = arith.constant 1.000000e+00 : f32
    %573 = vector.broadcast %cst_193 : f32 to vector<2x128xf32>
    %574 = arith.cmpf oge, %572, %573 : vector<2x128xf32>
    %575 = arith.extui %574 : vector<2x128xi1> to vector<2x128xi32>
    %576 = arith.sitofp %575 : vector<2x128xi32> to vector<2x128xf32>
    %cst_194 = arith.constant 1.000000e+00 : f32
    %577 = vector.broadcast %cst_194 : f32 to vector<2x128xf32>
    %578 = arith.mulf %576, %577 : vector<2x128xf32>
    %579 = arith.subf %572, %578 : vector<2x128xf32>
    %cst_195 = arith.constant 0.899999976 : f32
    %580 = vector.broadcast %cst_195 : f32 to vector<2x128xf32>
    %581 = arith.mulf %580, %579 : vector<2x128xf32>
    %582 = vector.extract_strided_slice %545 {offsets = [6, 0], sizes = [2, 128], strides = [1, 1]} : vector<16x128xf32> to vector<2x128xf32>
    %583 = arith.addf %581, %582 : vector<2x128xf32>
    %cst_196 = arith.constant 1.000000e+00 : f32
    %584 = vector.broadcast %cst_196 : f32 to vector<2x128xf32>
    %585 = arith.cmpf oge, %583, %584 : vector<2x128xf32>
    %586 = arith.extui %585 : vector<2x128xi1> to vector<2x128xi32>
    %587 = arith.sitofp %586 : vector<2x128xi32> to vector<2x128xf32>
    %cst_197 = arith.constant 1.000000e+00 : f32
    %588 = vector.broadcast %cst_197 : f32 to vector<2x128xf32>
    %589 = arith.mulf %587, %588 : vector<2x128xf32>
    %590 = arith.subf %583, %589 : vector<2x128xf32>
    %cst_198 = arith.constant 0.899999976 : f32
    %591 = vector.broadcast %cst_198 : f32 to vector<2x128xf32>
    %592 = arith.mulf %591, %590 : vector<2x128xf32>
    %593 = vector.extract_strided_slice %545 {offsets = [8, 0], sizes = [2, 128], strides = [1, 1]} : vector<16x128xf32> to vector<2x128xf32>
    %594 = arith.addf %592, %593 : vector<2x128xf32>
    %cst_199 = arith.constant 1.000000e+00 : f32
    %595 = vector.broadcast %cst_199 : f32 to vector<2x128xf32>
    %596 = arith.cmpf oge, %594, %595 : vector<2x128xf32>
    %597 = arith.extui %596 : vector<2x128xi1> to vector<2x128xi32>
    %598 = arith.sitofp %597 : vector<2x128xi32> to vector<2x128xf32>
    %cst_200 = arith.constant 1.000000e+00 : f32
    %599 = vector.broadcast %cst_200 : f32 to vector<2x128xf32>
    %600 = arith.mulf %598, %599 : vector<2x128xf32>
    %601 = arith.subf %594, %600 : vector<2x128xf32>
    %cst_201 = arith.constant 0.899999976 : f32
    %602 = vector.broadcast %cst_201 : f32 to vector<2x128xf32>
    %603 = arith.mulf %602, %601 : vector<2x128xf32>
    %604 = vector.extract_strided_slice %545 {offsets = [10, 0], sizes = [2, 128], strides = [1, 1]} : vector<16x128xf32> to vector<2x128xf32>
    %605 = arith.addf %603, %604 : vector<2x128xf32>
    %cst_202 = arith.constant 1.000000e+00 : f32
    %606 = vector.broadcast %cst_202 : f32 to vector<2x128xf32>
    %607 = arith.cmpf oge, %605, %606 : vector<2x128xf32>
    %608 = arith.extui %607 : vector<2x128xi1> to vector<2x128xi32>
    %609 = arith.sitofp %608 : vector<2x128xi32> to vector<2x128xf32>
    %cst_203 = arith.constant 1.000000e+00 : f32
    %610 = vector.broadcast %cst_203 : f32 to vector<2x128xf32>
    %611 = arith.mulf %609, %610 : vector<2x128xf32>
    %612 = arith.subf %605, %611 : vector<2x128xf32>
    %cst_204 = arith.constant 0.899999976 : f32
    %613 = vector.broadcast %cst_204 : f32 to vector<2x128xf32>
    %614 = arith.mulf %613, %612 : vector<2x128xf32>
    %615 = vector.extract_strided_slice %545 {offsets = [12, 0], sizes = [2, 128], strides = [1, 1]} : vector<16x128xf32> to vector<2x128xf32>
    %616 = arith.addf %614, %615 : vector<2x128xf32>
    %cst_205 = arith.constant 1.000000e+00 : f32
    %617 = vector.broadcast %cst_205 : f32 to vector<2x128xf32>
    %618 = arith.cmpf oge, %616, %617 : vector<2x128xf32>
    %619 = arith.extui %618 : vector<2x128xi1> to vector<2x128xi32>
    %620 = arith.sitofp %619 : vector<2x128xi32> to vector<2x128xf32>
    %cst_206 = arith.constant 1.000000e+00 : f32
    %621 = vector.broadcast %cst_206 : f32 to vector<2x128xf32>
    %622 = arith.mulf %620, %621 : vector<2x128xf32>
    %623 = arith.subf %616, %622 : vector<2x128xf32>
    %cst_207 = arith.constant 0.899999976 : f32
    %624 = vector.broadcast %cst_207 : f32 to vector<2x128xf32>
    %625 = arith.mulf %624, %623 : vector<2x128xf32>
    %626 = vector.extract_strided_slice %545 {offsets = [14, 0], sizes = [2, 128], strides = [1, 1]} : vector<16x128xf32> to vector<2x128xf32>
    %627 = arith.addf %625, %626 : vector<2x128xf32>
    %cst_208 = arith.constant 1.000000e+00 : f32
    %628 = vector.broadcast %cst_208 : f32 to vector<2x128xf32>
    %629 = arith.cmpf oge, %627, %628 : vector<2x128xf32>
    %630 = arith.extui %629 : vector<2x128xi1> to vector<2x128xi32>
    %631 = arith.sitofp %630 : vector<2x128xi32> to vector<2x128xf32>
    %632 = tpu.concatenate %554, %565, %576, %587, %598, %609, %620, %631 in 0 : vector<2x128xf32>, vector<2x128xf32>, vector<2x128xf32>, vector<2x128xf32>, vector<2x128xf32>, vector<2x128xf32>, vector<2x128xf32>, vector<2x128xf32> -> vector<16x128xf32>
    %633 = tpu.concatenate %632, %211 in 1 : vector<16x128xf32>, vector<16x128xf32> -> vector<16x256xf32>
    %634 = tpu.iota {dimensions = array<i32: 0>} : vector<16x256xi32>
    %c2_i32_209 = arith.constant 2 : i32
    %635 = vector.broadcast %c2_i32_209 : i32 to vector<16x256xi32>
    %636 = arith.cmpi slt, %634, %635 : vector<16x256xi32>
    %c2_i32_210 = arith.constant 2 : i32
    %637 = tpu.dynamic_rotate %633 by %c2_i32_210 dim 0 : vector<16x256xf32>, i32 -> vector<16x256xf32>
    %cst_211 = arith.constant 0.000000e+00 : f32
    %638 = vector.broadcast %cst_211 : f32 to vector<16x256xf32>
    %639 = arith.select %636, %638, %637 : vector<16x256xi1>, vector<16x256xf32>
    %c14_i32_212 = arith.constant 14 : i32
    %640 = vector.broadcast %c14_i32_212 : i32 to vector<16x256xi32>
    %641 = arith.cmpi sge, %634, %640 : vector<16x256xi32>
    %c14_i32_213 = arith.constant 14 : i32
    %642 = tpu.dynamic_rotate %633 by %c14_i32_213 dim 0 : vector<16x256xf32>, i32 -> vector<16x256xf32>
    %cst_214 = arith.constant 0.000000e+00 : f32
    %643 = vector.broadcast %cst_214 : f32 to vector<16x256xf32>
    %644 = arith.select %641, %643, %642 : vector<16x256xi1>, vector<16x256xf32>
    %645 = tpu.concatenate %639, %633, %644 in 1 : vector<16x256xf32>, vector<16x256xf32>, vector<16x256xf32> -> vector<16x768xf32>
    %646 = arith.truncf %645 : vector<16x768xf32> to vector<16x768xbf16>
    %c0_215 = arith.constant 0 : index
    %c0_216 = arith.constant 0 : index
    %647 = vector.load %arg14[%c0_215, %c0_216] : memref<768x128xbf16, #tpu.memory_space<vmem>>, vector<768x128xbf16>
    %cst_217 = arith.constant dense<0.000000e+00> : vector<16x128xf32>
    %648 = tpu.matmul %646, %647, %cst_217 {dimension_numbers = #tpu.dot_dimension_numbers<[1], [0], [0], [1], [0, 0, 1, 1], [], []>} : vector<16x768xbf16>, vector<768x128xbf16>, vector<16x128xf32> -> vector<16x128xf32>
    %c0_218 = arith.constant 0 : index
    %c0_219 = arith.constant 0 : index
    %649 = vector.load %arg15[%c0_218, %c0_219] : memref<1x128xf32, #tpu.memory_space<vmem>>, vector<1x128xf32>
    %650 = vector.broadcast %649 : vector<1x128xf32> to vector<16x128xf32>
    %651 = arith.addf %648, %650 : vector<16x128xf32>
    %cst_220 = arith.constant 0.000000e+00 : f32
    %652 = vector.broadcast %cst_220 : f32 to vector<2x128xf32>
    %cst_221 = arith.constant 0.899999976 : f32
    %653 = vector.broadcast %cst_221 : f32 to vector<2x128xf32>
    %654 = arith.mulf %653, %652 : vector<2x128xf32>
    %655 = vector.extract_strided_slice %651 {offsets = [0, 0], sizes = [2, 128], strides = [1, 1]} : vector<16x128xf32> to vector<2x128xf32>
    %656 = arith.addf %654, %655 : vector<2x128xf32>
    %cst_222 = arith.constant 1.000000e+00 : f32
    %657 = vector.broadcast %cst_222 : f32 to vector<2x128xf32>
    %658 = arith.cmpf oge, %656, %657 : vector<2x128xf32>
    %659 = arith.extui %658 : vector<2x128xi1> to vector<2x128xi32>
    %660 = arith.sitofp %659 : vector<2x128xi32> to vector<2x128xf32>
    %cst_223 = arith.constant 1.000000e+00 : f32
    %661 = vector.broadcast %cst_223 : f32 to vector<2x128xf32>
    %662 = arith.mulf %660, %661 : vector<2x128xf32>
    %663 = arith.subf %656, %662 : vector<2x128xf32>
    %cst_224 = arith.constant 0.899999976 : f32
    %664 = vector.broadcast %cst_224 : f32 to vector<2x128xf32>
    %665 = arith.mulf %664, %663 : vector<2x128xf32>
    %666 = vector.extract_strided_slice %651 {offsets = [2, 0], sizes = [2, 128], strides = [1, 1]} : vector<16x128xf32> to vector<2x128xf32>
    %667 = arith.addf %665, %666 : vector<2x128xf32>
    %cst_225 = arith.constant 1.000000e+00 : f32
    %668 = vector.broadcast %cst_225 : f32 to vector<2x128xf32>
    %669 = arith.cmpf oge, %667, %668 : vector<2x128xf32>
    %670 = arith.extui %669 : vector<2x128xi1> to vector<2x128xi32>
    %671 = arith.sitofp %670 : vector<2x128xi32> to vector<2x128xf32>
    %cst_226 = arith.constant 1.000000e+00 : f32
    %672 = vector.broadcast %cst_226 : f32 to vector<2x128xf32>
    %673 = arith.mulf %671, %672 : vector<2x128xf32>
    %674 = arith.subf %667, %673 : vector<2x128xf32>
    %cst_227 = arith.constant 0.899999976 : f32
    %675 = vector.broadcast %cst_227 : f32 to vector<2x128xf32>
    %676 = arith.mulf %675, %674 : vector<2x128xf32>
    %677 = vector.extract_strided_slice %651 {offsets = [4, 0], sizes = [2, 128], strides = [1, 1]} : vector<16x128xf32> to vector<2x128xf32>
    %678 = arith.addf %676, %677 : vector<2x128xf32>
    %cst_228 = arith.constant 1.000000e+00 : f32
    %679 = vector.broadcast %cst_228 : f32 to vector<2x128xf32>
    %680 = arith.cmpf oge, %678, %679 : vector<2x128xf32>
    %681 = arith.extui %680 : vector<2x128xi1> to vector<2x128xi32>
    %682 = arith.sitofp %681 : vector<2x128xi32> to vector<2x128xf32>
    %cst_229 = arith.constant 1.000000e+00 : f32
    %683 = vector.broadcast %cst_229 : f32 to vector<2x128xf32>
    %684 = arith.mulf %682, %683 : vector<2x128xf32>
    %685 = arith.subf %678, %684 : vector<2x128xf32>
    %cst_230 = arith.constant 0.899999976 : f32
    %686 = vector.broadcast %cst_230 : f32 to vector<2x128xf32>
    %687 = arith.mulf %686, %685 : vector<2x128xf32>
    %688 = vector.extract_strided_slice %651 {offsets = [6, 0], sizes = [2, 128], strides = [1, 1]} : vector<16x128xf32> to vector<2x128xf32>
    %689 = arith.addf %687, %688 : vector<2x128xf32>
    %cst_231 = arith.constant 1.000000e+00 : f32
    %690 = vector.broadcast %cst_231 : f32 to vector<2x128xf32>
    %691 = arith.cmpf oge, %689, %690 : vector<2x128xf32>
    %692 = arith.extui %691 : vector<2x128xi1> to vector<2x128xi32>
    %693 = arith.sitofp %692 : vector<2x128xi32> to vector<2x128xf32>
    %cst_232 = arith.constant 1.000000e+00 : f32
    %694 = vector.broadcast %cst_232 : f32 to vector<2x128xf32>
    %695 = arith.mulf %693, %694 : vector<2x128xf32>
    %696 = arith.subf %689, %695 : vector<2x128xf32>
    %cst_233 = arith.constant 0.899999976 : f32
    %697 = vector.broadcast %cst_233 : f32 to vector<2x128xf32>
    %698 = arith.mulf %697, %696 : vector<2x128xf32>
    %699 = vector.extract_strided_slice %651 {offsets = [8, 0], sizes = [2, 128], strides = [1, 1]} : vector<16x128xf32> to vector<2x128xf32>
    %700 = arith.addf %698, %699 : vector<2x128xf32>
    %cst_234 = arith.constant 1.000000e+00 : f32
    %701 = vector.broadcast %cst_234 : f32 to vector<2x128xf32>
    %702 = arith.cmpf oge, %700, %701 : vector<2x128xf32>
    %703 = arith.extui %702 : vector<2x128xi1> to vector<2x128xi32>
    %704 = arith.sitofp %703 : vector<2x128xi32> to vector<2x128xf32>
    %cst_235 = arith.constant 1.000000e+00 : f32
    %705 = vector.broadcast %cst_235 : f32 to vector<2x128xf32>
    %706 = arith.mulf %704, %705 : vector<2x128xf32>
    %707 = arith.subf %700, %706 : vector<2x128xf32>
    %cst_236 = arith.constant 0.899999976 : f32
    %708 = vector.broadcast %cst_236 : f32 to vector<2x128xf32>
    %709 = arith.mulf %708, %707 : vector<2x128xf32>
    %710 = vector.extract_strided_slice %651 {offsets = [10, 0], sizes = [2, 128], strides = [1, 1]} : vector<16x128xf32> to vector<2x128xf32>
    %711 = arith.addf %709, %710 : vector<2x128xf32>
    %cst_237 = arith.constant 1.000000e+00 : f32
    %712 = vector.broadcast %cst_237 : f32 to vector<2x128xf32>
    %713 = arith.cmpf oge, %711, %712 : vector<2x128xf32>
    %714 = arith.extui %713 : vector<2x128xi1> to vector<2x128xi32>
    %715 = arith.sitofp %714 : vector<2x128xi32> to vector<2x128xf32>
    %cst_238 = arith.constant 1.000000e+00 : f32
    %716 = vector.broadcast %cst_238 : f32 to vector<2x128xf32>
    %717 = arith.mulf %715, %716 : vector<2x128xf32>
    %718 = arith.subf %711, %717 : vector<2x128xf32>
    %cst_239 = arith.constant 0.899999976 : f32
    %719 = vector.broadcast %cst_239 : f32 to vector<2x128xf32>
    %720 = arith.mulf %719, %718 : vector<2x128xf32>
    %721 = vector.extract_strided_slice %651 {offsets = [12, 0], sizes = [2, 128], strides = [1, 1]} : vector<16x128xf32> to vector<2x128xf32>
    %722 = arith.addf %720, %721 : vector<2x128xf32>
    %cst_240 = arith.constant 1.000000e+00 : f32
    %723 = vector.broadcast %cst_240 : f32 to vector<2x128xf32>
    %724 = arith.cmpf oge, %722, %723 : vector<2x128xf32>
    %725 = arith.extui %724 : vector<2x128xi1> to vector<2x128xi32>
    %726 = arith.sitofp %725 : vector<2x128xi32> to vector<2x128xf32>
    %cst_241 = arith.constant 1.000000e+00 : f32
    %727 = vector.broadcast %cst_241 : f32 to vector<2x128xf32>
    %728 = arith.mulf %726, %727 : vector<2x128xf32>
    %729 = arith.subf %722, %728 : vector<2x128xf32>
    %cst_242 = arith.constant 0.899999976 : f32
    %730 = vector.broadcast %cst_242 : f32 to vector<2x128xf32>
    %731 = arith.mulf %730, %729 : vector<2x128xf32>
    %732 = vector.extract_strided_slice %651 {offsets = [14, 0], sizes = [2, 128], strides = [1, 1]} : vector<16x128xf32> to vector<2x128xf32>
    %733 = arith.addf %731, %732 : vector<2x128xf32>
    %cst_243 = arith.constant 1.000000e+00 : f32
    %734 = vector.broadcast %cst_243 : f32 to vector<2x128xf32>
    %735 = arith.cmpf oge, %733, %734 : vector<2x128xf32>
    %736 = arith.extui %735 : vector<2x128xi1> to vector<2x128xi32>
    %737 = arith.sitofp %736 : vector<2x128xi32> to vector<2x128xf32>
    %738 = tpu.concatenate %660, %671, %682, %693, %704, %715, %726, %737 in 0 : vector<2x128xf32>, vector<2x128xf32>, vector<2x128xf32>, vector<2x128xf32>, vector<2x128xf32>, vector<2x128xf32>, vector<2x128xf32>, vector<2x128xf32> -> vector<16x128xf32>
    %739 = tpu.concatenate %738, %106 in 1 : vector<16x128xf32>, vector<16x128xf32> -> vector<16x256xf32>
    %740 = tpu.iota {dimensions = array<i32: 0>} : vector<16x256xi32>
    %c2_i32_244 = arith.constant 2 : i32
    %741 = vector.broadcast %c2_i32_244 : i32 to vector<16x256xi32>
    %742 = arith.cmpi slt, %740, %741 : vector<16x256xi32>
    %c2_i32_245 = arith.constant 2 : i32
    %743 = tpu.dynamic_rotate %739 by %c2_i32_245 dim 0 : vector<16x256xf32>, i32 -> vector<16x256xf32>
    %cst_246 = arith.constant 0.000000e+00 : f32
    %744 = vector.broadcast %cst_246 : f32 to vector<16x256xf32>
    %745 = arith.select %742, %744, %743 : vector<16x256xi1>, vector<16x256xf32>
    %c14_i32_247 = arith.constant 14 : i32
    %746 = vector.broadcast %c14_i32_247 : i32 to vector<16x256xi32>
    %747 = arith.cmpi sge, %740, %746 : vector<16x256xi32>
    %c14_i32_248 = arith.constant 14 : i32
    %748 = tpu.dynamic_rotate %739 by %c14_i32_248 dim 0 : vector<16x256xf32>, i32 -> vector<16x256xf32>
    %cst_249 = arith.constant 0.000000e+00 : f32
    %749 = vector.broadcast %cst_249 : f32 to vector<16x256xf32>
    %750 = arith.select %747, %749, %748 : vector<16x256xi1>, vector<16x256xf32>
    %751 = tpu.concatenate %745, %739, %750 in 1 : vector<16x256xf32>, vector<16x256xf32>, vector<16x256xf32> -> vector<16x768xf32>
    %752 = arith.truncf %751 : vector<16x768xf32> to vector<16x768xbf16>
    %c0_250 = arith.constant 0 : index
    %c0_251 = arith.constant 0 : index
    %753 = vector.load %arg16[%c0_250, %c0_251] : memref<768x16xbf16, #tpu.memory_space<vmem>>, vector<768x16xbf16>
    %cst_252 = arith.constant dense<0.000000e+00> : vector<16x16xf32>
    %754 = tpu.matmul %752, %753, %cst_252 {dimension_numbers = #tpu.dot_dimension_numbers<[1], [0], [0], [1], [0, 0, 1, 1], [], []>} : vector<16x768xbf16>, vector<768x16xbf16>, vector<16x16xf32> -> vector<16x16xf32>
    %c0_253 = arith.constant 0 : index
    %c0_254 = arith.constant 0 : index
    %755 = vector.load %arg17[%c0_253, %c0_254] : memref<1x16xf32, #tpu.memory_space<vmem>>, vector<1x16xf32>
    %756 = vector.broadcast %755 : vector<1x16xf32> to vector<16x16xf32>
    %757 = arith.addf %754, %756 : vector<16x16xf32>
    %cst_255 = arith.constant 0.000000e+00 : f32
    %758 = vector.broadcast %cst_255 : f32 to vector<2x16xf32>
    %cst_256 = arith.constant 0.899999976 : f32
    %759 = vector.broadcast %cst_256 : f32 to vector<2x16xf32>
    %760 = arith.mulf %759, %758 : vector<2x16xf32>
    %761 = vector.extract_strided_slice %757 {offsets = [0, 0], sizes = [2, 16], strides = [1, 1]} : vector<16x16xf32> to vector<2x16xf32>
    %762 = arith.addf %760, %761 : vector<2x16xf32>
    %cst_257 = arith.constant 0.899999976 : f32
    %763 = vector.broadcast %cst_257 : f32 to vector<2x16xf32>
    %764 = arith.mulf %763, %762 : vector<2x16xf32>
    %765 = vector.extract_strided_slice %757 {offsets = [2, 0], sizes = [2, 16], strides = [1, 1]} : vector<16x16xf32> to vector<2x16xf32>
    %766 = arith.addf %764, %765 : vector<2x16xf32>
    %cst_258 = arith.constant 0.899999976 : f32
    %767 = vector.broadcast %cst_258 : f32 to vector<2x16xf32>
    %768 = arith.mulf %767, %766 : vector<2x16xf32>
    %769 = vector.extract_strided_slice %757 {offsets = [4, 0], sizes = [2, 16], strides = [1, 1]} : vector<16x16xf32> to vector<2x16xf32>
    %770 = arith.addf %768, %769 : vector<2x16xf32>
    %cst_259 = arith.constant 0.899999976 : f32
    %771 = vector.broadcast %cst_259 : f32 to vector<2x16xf32>
    %772 = arith.mulf %771, %770 : vector<2x16xf32>
    %773 = vector.extract_strided_slice %757 {offsets = [6, 0], sizes = [2, 16], strides = [1, 1]} : vector<16x16xf32> to vector<2x16xf32>
    %774 = arith.addf %772, %773 : vector<2x16xf32>
    %cst_260 = arith.constant 0.899999976 : f32
    %775 = vector.broadcast %cst_260 : f32 to vector<2x16xf32>
    %776 = arith.mulf %775, %774 : vector<2x16xf32>
    %777 = vector.extract_strided_slice %757 {offsets = [8, 0], sizes = [2, 16], strides = [1, 1]} : vector<16x16xf32> to vector<2x16xf32>
    %778 = arith.addf %776, %777 : vector<2x16xf32>
    %cst_261 = arith.constant 0.899999976 : f32
    %779 = vector.broadcast %cst_261 : f32 to vector<2x16xf32>
    %780 = arith.mulf %779, %778 : vector<2x16xf32>
    %781 = vector.extract_strided_slice %757 {offsets = [10, 0], sizes = [2, 16], strides = [1, 1]} : vector<16x16xf32> to vector<2x16xf32>
    %782 = arith.addf %780, %781 : vector<2x16xf32>
    %cst_262 = arith.constant 0.899999976 : f32
    %783 = vector.broadcast %cst_262 : f32 to vector<2x16xf32>
    %784 = arith.mulf %783, %782 : vector<2x16xf32>
    %785 = vector.extract_strided_slice %757 {offsets = [12, 0], sizes = [2, 16], strides = [1, 1]} : vector<16x16xf32> to vector<2x16xf32>
    %786 = arith.addf %784, %785 : vector<2x16xf32>
    %cst_263 = arith.constant 0.899999976 : f32
    %787 = vector.broadcast %cst_263 : f32 to vector<2x16xf32>
    %788 = arith.mulf %787, %786 : vector<2x16xf32>
    %789 = vector.extract_strided_slice %757 {offsets = [14, 0], sizes = [2, 16], strides = [1, 1]} : vector<16x16xf32> to vector<2x16xf32>
    %790 = arith.addf %788, %789 : vector<2x16xf32>
    %791 = tpu.concatenate %762, %766, %770, %774, %778, %782, %786, %790 in 0 : vector<2x16xf32>, vector<2x16xf32>, vector<2x16xf32>, vector<2x16xf32>, vector<2x16xf32>, vector<2x16xf32>, vector<2x16xf32>, vector<2x16xf32> -> vector<16x16xf32>
    %c0_264 = arith.constant 0 : index
    %c0_265 = arith.constant 0 : index
    %c0_266 = arith.constant 0 : index
    %792 = vector.load %arg18[%c0_264, %c0_265, %c0_266] : memref<1x16x16xf32, #tpu.memory_space<vmem>>, vector<1x16x16xf32>
    %793 = vector.shape_cast %792 : vector<1x16x16xf32> to vector<16x16xf32>
    %794 = vector.shape_cast %791 : vector<16x16xf32> to vector<1x16x16xf32>
    tpu.vector_store %arg18[%c0_264, %c0_265, %c0_266], %794 {strides = array<i32>} : memref<1x16x16xf32, #tpu.memory_space<vmem>>, vector<1x16x16xf32>,
    return
  }
  func.func @transform_0(%arg0: i32) -> (i32, i32, i32) {
    %c0_i32 = arith.constant 0 : i32
    %c0_i32_0 = arith.constant 0 : i32
    %c0_i32_1 = arith.constant 0 : i32
    return %arg0, %c0_i32, %c0_i32_0 : i32, i32, i32
  }
  func.func @transform_1(%arg0: i32) -> (i32, i32) {
    %c0_i32 = arith.constant 0 : i32
    %c0_i32_0 = arith.constant 0 : i32
    %c0_i32_1 = arith.constant 0 : i32
    return %c0_i32, %c0_i32_0 : i32, i32
  }
  func.func @transform_2(%arg0: i32) -> (i32, i32) {
    %c0_i32 = arith.constant 0 : i32
    %c0_i32_0 = arith.constant 0 : i32
    %c0_i32_1 = arith.constant 0 : i32
    return %c0_i32, %c0_i32_0 : i32, i32
  }
  func.func @transform_3(%arg0: i32) -> (i32, i32) {
    %c0_i32 = arith.constant 0 : i32
    %c0_i32_0 = arith.constant 0 : i32
    %c0_i32_1 = arith.constant 0 : i32
    return %c0_i32, %c0_i32_0 : i32, i32
  }
  func.func @transform_4(%arg0: i32) -> (i32, i32) {
    %c0_i32 = arith.constant 0 : i32
    %c0_i32_0 = arith.constant 0 : i32
    %c0_i32_1 = arith.constant 0 : i32
    return %c0_i32, %c0_i32_0 : i32, i32
  }
  func.func @transform_5(%arg0: i32) -> (i32, i32) {
    %c0_i32 = arith.constant 0 : i32
    %c0_i32_0 = arith.constant 0 : i32
    %c0_i32_1 = arith.constant 0 : i32
    return %c0_i32, %c0_i32_0 : i32, i32
  }
  func.func @transform_6(%arg0: i32) -> (i32, i32) {
    %c0_i32 = arith.constant 0 : i32
    %c0_i32_0 = arith.constant 0 : i32
    %c0_i32_1 = arith.constant 0 : i32
    return %c0_i32, %c0_i32_0 : i32, i32
  }
  func.func @transform_7(%arg0: i32) -> (i32, i32) {
    %c0_i32 = arith.constant 0 : i32
    %c0_i32_0 = arith.constant 0 : i32
    %c0_i32_1 = arith.constant 0 : i32
    return %c0_i32, %c0_i32_0 : i32, i32
  }
  func.func @transform_8(%arg0: i32) -> (i32, i32) {
    %c0_i32 = arith.constant 0 : i32
    %c0_i32_0 = arith.constant 0 : i32
    %c0_i32_1 = arith.constant 0 : i32
    return %c0_i32, %c0_i32_0 : i32, i32
  }
  func.func @transform_9(%arg0: i32) -> (i32, i32) {
    %c0_i32 = arith.constant 0 : i32
    %c0_i32_0 = arith.constant 0 : i32
    %c0_i32_1 = arith.constant 0 : i32
    return %c0_i32, %c0_i32_0 : i32, i32
  }
  func.func @transform_10(%arg0: i32) -> (i32, i32) {
    %c0_i32 = arith.constant 0 : i32
    %c0_i32_0 = arith.constant 0 : i32
    %c0_i32_1 = arith.constant 0 : i32
    return %c0_i32, %c0_i32_0 : i32, i32
  }
  func.func @transform_11(%arg0: i32) -> (i32, i32) {
    %c0_i32 = arith.constant 0 : i32
    %c0_i32_0 = arith.constant 0 : i32
    %c0_i32_1 = arith.constant 0 : i32
    return %c0_i32, %c0_i32_0 : i32, i32
  }
  func.func @transform_12(%arg0: i32) -> (i32, i32) {
    %c0_i32 = arith.constant 0 : i32
    %c0_i32_0 = arith.constant 0 : i32
    %c0_i32_1 = arith.constant 0 : i32
    return %c0_i32, %c0_i32_0 : i32, i32
  }
  func.func @transform_13(%arg0: i32) -> (i32, i32) {
    %c0_i32 = arith.constant 0 : i32
    %c0_i32_0 = arith.constant 0 : i32
    %c0_i32_1 = arith.constant 0 : i32
    return %c0_i32, %c0_i32_0 : i32, i32
  }
  func.func @transform_14(%arg0: i32) -> (i32, i32) {
    %c0_i32 = arith.constant 0 : i32
    %c0_i32_0 = arith.constant 0 : i32
    %c0_i32_1 = arith.constant 0 : i32
    return %c0_i32, %c0_i32_0 : i32, i32
  }
  func.func @transform_15(%arg0: i32) -> (i32, i32) {
    %c0_i32 = arith.constant 0 : i32
    %c0_i32_0 = arith.constant 0 : i32
    %c0_i32_1 = arith.constant 0 : i32
    return %c0_i32, %c0_i32_0 : i32, i32
  }
  func.func @transform_16(%arg0: i32) -> (i32, i32) {
    %c0_i32 = arith.constant 0 : i32
    %c0_i32_0 = arith.constant 0 : i32
    %c0_i32_1 = arith.constant 0 : i32
    return %c0_i32, %c0_i32_0 : i32, i32
  }
  func.func @transform_17(%arg0: i32) -> (i32, i32, i32) {
    %c0_i32 = arith.constant 0 : i32
    %c0_i32_0 = arith.constant 0 : i32
    %c0_i32_1 = arith.constant 0 : i32
    return %arg0, %c0_i32, %c0_i32_0 : i32, i32, i32
  }
}

</mosaic_0001>

<bundles_post_ra>
// kernel: res_bottleneck_unet_snn.1
= control target key start
LH: loop header
LB: loop body
LE: loop exit
PB: predicated region body
PF: predicated region fallthrough
CT: control target
= control target key end

     0   :  { %v59_v0 = vlaneseq  ;;  %v4359_v3 = vmov 0.0   ;;  %vm4360_vm0 = vmmov 0   ;;  %s4361_s18 = smov 16   ;;  %s4362_s22 = smov 32   ;;  %vm95_vm4 = vcmask 130048   ;;  %s5470_s0 = inlined_call_operand.vmem [shape: f32[1,16,16], index: 0, kind: input, shape index: {}]   ;;  %s5471_s1 = inlined_call_operand.vmem [shape: bf16[48,128], index: 1, kind: input, shape index: {}]   ;;  %s5472_s3 = inlined_call_operand.vmem [shape: bf16[384,128], index: 3, kind: input, shape index: {}]   ;;  %s5473_s2 = inlined_call_operand.vmem [shape: f32[1,128], index: 2, kind: input, shape index: {}]   ;;  %s5474_s5 = inlined_call_operand.vmem [shape: bf16[384,128], index: 5, kind: input, shape index: {}]   ;;  %s5475_s4 = inlined_call_operand.vmem [shape: f32[1,128], index: 4, kind: input, shape index: {}]   ;;  %s5476_s7 = inlined_call_operand.vmem [shape: bf16[384,128], index: 7, kind: input, shape index: {}]   ;;  %s5477_s6 = inlined_call_operand.vmem [shape: f32[1,128], index: 6, kind: input, shape index: {}]   ;;  %s5478_s9 = inlined_call_operand.vmem [shape: bf16[384,128], index: 9, kind: input, shape index: {}]   ;;  %s5479_s8 = inlined_call_operand.vmem [shape: f32[1,128], index: 8, kind: input, shape index: {}]   ;;  %s5480_s11 = inlined_call_operand.vmem [shape: bf16[384,128], index: 11, kind: input, shape index: {}]   ;;  %s5481_s10 = inlined_call_operand.vmem [shape: f32[1,128], index: 10, kind: input, shape index: {}]   ;;  %s5482_s13 = inlined_call_operand.vmem [shape: bf16[768,128], index: 13, kind: input, shape index: {}]   ;;  %s5483_s12 = inlined_call_operand.vmem [shape: f32[1,128], index: 12, kind: input, shape index: {}]   ;;  %s5484_s15 = inlined_call_operand.vmem [shape: bf16[768,16], index: 15, kind: input, shape index: {}]   ;;  %s5485_s14 = inlined_call_operand.vmem [shape: f32[1,128], index: 14, kind: input, shape index: {}]   ;;  %s5486_s16 = inlined_call_operand.vmem [shape: f32[1,16], index: 16, kind: input, shape index: {}]   ;;  %s5487_s17 = inlined_call_operand.vmem [shape: f32[1,16,16], index: 17, kind: output, shape index: {}]  }
   0x1   :  { %5490 = sst [smem:[#allocation2_spill]] %s5470_s0  ;;  %4015 = vmatprep.subr.bf16.mxu0 %v4359_v3  ;;  %4021 = vmatprep.mubr.msk.bf16.mxu0 %vm4360_vm0, %v4359_v3  ;;  %vm98_vm5 = vcmask 261120   ;;  %vm133_vm6 = vcmask 392192   ;;  %v4143_v32 = vld [vmem:[%s5472_s3 + $0x40] sm:$0xff]   ;;  %v4146_v35 = vld [vmem:[%s5472_s3 + $0x48] sm:$0xff]   ;;  %v4149_v38 = vld [vmem:[%s5472_s3 + $0x50] sm:$0xff]  }
   0x2   :  { %5491 = sst [smem:[#allocation3_spill]] %s5471_s1  ;;  %s5492_s26 = sld [smem:[#allocation2_spill]]  ;;  %v4466_v10 = vshrl.u32 %v59_v0, 7  ;;  %v4144_v33 = vld [vmem:[%s5472_s3] sm:$0xff]   ;;  %3728 = vmatprep.subr.bf16.mxu1 %v4143_v32  ;;  %v4147_v36 = vld [vmem:[%s5472_s3 + $0x8] sm:$0xff]   ;;  %v4150_v39 = vld [vmem:[%s5472_s3 + $0x10] sm:$0xff]  }
   0x3   :  { %s5493_s30 = sld [smem:[#allocation3_spill]]  ;;  %v4145_v34 = vld [vmem:[%s5472_s3 + $0x80] sm:$0xff]   ;;  %3729 = vmatpush3.bf16.msra.mxu1 %v4144_v33  ;;  %v4148_v37 = vld [vmem:[%s5472_s3 + $0x88] sm:$0xff]   ;;  %v4151_v40 = vld [vmem:[%s5472_s3 + $0x90] sm:$0xff]   ;;  %vm256_vm13 = vcmask 1041408   ;;  %vm258_vm15 = vcmask 1043456  }
   0x4   :  { %v4472_v12 = vadd.s32 8, %v4466_v10  ;;  %vm62_vm1 = vcmp.lt.s32.totalorder %v4466_v10, 2  ;;  %vm74_vm2 = vcmp.lt.s32.totalorder %v4466_v10, 6  ;;  %3730 = vmatprep.subr.bf16.mxu1 %v4146_v35  ;;  %v4152_v41 = vld [vmem:[%s5472_s3 + $0x58] sm:$0xff]   ;;  %v4155_v44 = vld [vmem:[%s5472_s3 + $0x60] sm:$0xff]   ;;  %v4158_v47 = vld [vmem:[%s5472_s3 + $0x68] sm:$0xff]  }
   0x5   :  { %v4153_v42 = vld [vmem:[%s5472_s3 + $0x18] sm:$0xff]   ;;  %v4156_v45 = vld [vmem:[%s5472_s3 + $0x20] sm:$0xff]   ;;  %v4159_v48 = vld [vmem:[%s5472_s3 + $0x28] sm:$0xff]  }
   0x6   :  { %vm71_vm3 = vcmp.ge.s32.totalorder %v4472_v12, 14  ;;  %v4154_v43 = vld [vmem:[%s5472_s3 + $0x98] sm:$0xff]   ;;  %v4157_v46 = vld [vmem:[%s5472_s3 + $0xa0] sm:$0xff]   ;;  %v4160_v49 = vld [vmem:[%s5472_s3 + $0xa8] sm:$0xff]  }
   0x7   :  { %3731 = vmatpush3.bf16.msra.mxu1 %v4147_v36  ;;  %v4161_v50 = vld [vmem:[%s5472_s3 + $0x70] sm:$0xff]   ;;  %v4164_v53 = vld [vmem:[%s5472_s3 + $0x78] sm:$0xff]   ;;  %v3368_v56 = vld [vmem:[%s5473_s2] ss:$0 sm:$0xff] }
   0x8   :  { %v57_v1 = vld [vmem:[%s5492_s26] sm:$0xff]  ;;  %v58_v2 = vld [vmem:[%s5492_s26 + $0x8] sm:$0xff]  ;;  %3732 = vmatprep.subr.bf16.mxu1 %v4149_v38  ;;  %v4162_v51 = vld [vmem:[%s5472_s3 + $0x30] sm:$0xff]  }
   0x9   :  { %v65_v4 = vrot.slane %v58_v2, 6  ;;  %v73_v5 = vrot.slane %v58_v2, 2  ;;  %v4130_v6 = vpack.i.bf16 %v58_v2, %v57_v1  ;;  %v64_v7 = vrot.slane %v57_v1, 6  ;;  %v4140_v8 = vld [vmem:[%s5493_s30] sm:$0xff]   ;;  %v4141_v11 = vld [vmem:[%s5493_s30 + $0x8] sm:$0xff]   ;;  %v4142_v18 = vld [vmem:[%s5493_s30 + $0x10] sm:$0xff]  }
   0xa   :  { %v72_v9 = vrot.slane %v57_v1, 2  ;;  %4016 = vmatpush3.bf16.msra.mxu0 %v4140_v8  ;;  %v4163_v52 = vld [vmem:[%s5472_s3 + $0xb0] sm:$0xff]   ;;  %v4165_v54 = vld [vmem:[%s5472_s3 + $0x38] sm:$0xff]  }
   0xb   :  { %4131 = vrot.lane.b32.xlu0 %v4130_v6, %s4361_s18  ;;  %4017 = vmatprep.subr.bf16.mxu0 %v4359_v3  ;;  %v66_v15 = vsel %vm62_vm1, %v64_v7, %v65_v4  ;;  %v67_v16 = vsel %vm62_vm1, %v65_v4, %v64_v7  ;;  %v4166_v55 = vld [vmem:[%s5472_s3 + $0xb8] sm:$0xff]   ;;  %v4347_v10 = vld [vmem:[%s5484_s15 + $0x150] sm:$0xff]  }
   0xc   :  { %v75_v13 = vsel %vm74_vm2, %v72_v9, %v73_v5  ;;  %v76_v14 = vsel %vm74_vm2, %v73_v5, %v72_v9  ;;  %v68_v23 = vsel %vm62_vm1, 0.0, %v67_v16  ;;  %3733 = vmatpush3.bf16.msra.mxu1 %v4150_v39 }
   0xd   :  { %v78_v17 = vsel %vm71_vm3, 0.0, %v76_v14  ;;  %3734 = vmatprep.subr.bf16.mxu1 %v4152_v41 }
   0xe   :  { %4018 = vmatpush3.bf16.msra.mxu0 %v4141_v11  ;;  %v4135_v19 = vpack.i.bf16 %v78_v17, %v75_v13 }
   0xf   :  { %4019 = vmatprep.subr.bf16.mxu0 %v4359_v3 }
  0x10   :  { %4136 = vrot.lane.b32.xlu0 %v4135_v19, %s4362_s22  ;;  %3735 = vmatpush3.bf16.msra.mxu1 %v4153_v42 }
  0x11   :  { %3736 = vmatprep.subr.bf16.mxu1 %v4155_v44 }
  0x12   :  { %4020 = vmatpush3.bf16.msra.mxu0 %v4142_v18 }
  0x13   :  { %4025 = vmatprep.subr.bf16.mxu0 %v4359_v3 }
  0x14   :  { %3737 = vmatpush3.bf16.msra.mxu1 %v4156_v45 }
  0x15   :  { %3738 = vmatprep.subr.bf16.mxu1 %v4158_v47 }
  0x18   :  { %3739 = vmatpush3.bf16.msra.mxu1 %v4159_v48 }
  0x19   :  { %3740 = vmatprep.subr.bf16.mxu1 %v4161_v50 }
  0x1c   :  { %3741 = vmatpush3.bf16.msra.mxu1 %v4162_v51 }
  0x1d   :  { %3742 = vmatprep.subr.bf16.mxu1 %v4164_v53 }
  0x20   :  { %3743 = vmatpush3.bf16.msra.mxu1 %v4165_v54  ;;  %v4348_v54 = vld [vmem:[%s5484_s15 + $0x110] sm:$0xff]  }
  0x7d   :  { %v4132_v20 = vpop.permute.xlu0 %4131 }
  0x7e   :  { %v4134_v21 = vunpack.i.h.bf16 %v4132_v20  ;;  %v4133_v22 = vunpack.i.l.bf16 %v4132_v20 }
  0x80   :  { %v96_v27 = vsel %vm95_vm4, %v68_v23, %v4133_v22  ;;  %v97_v28 = vsel %vm95_vm4, %v66_v15, %v4134_v21 }
  0x82   :  { %v4137_v24 = vpop.permute.xlu0 %4136 }
  0x83   :  { %v4139_v25 = vunpack.i.h.bf16 %v4137_v24  ;;  %v4138_v26 = vunpack.i.l.bf16 %v4137_v24 }
  0x85   :  { %v99_v29 = vsel %vm98_vm5, %v96_v27, %v4138_v26  ;;  %v100_v30 = vsel %vm98_vm5, %v97_v28, %v4139_v25  ;;  %vm260_vm5 = vcmask 1045504  }
  0x86   :  { %v101_v31 = vpack.c.bf16 %v100_v30, %v99_v29 }
  0x88   :  { %4022 = vmatmul.mubr.msk.bf16.vlgmr.msra.gmra.mrb[0].mxu0 %vm133_vm6, %v101_v31 }
  0x89   :  { %4041 = vmatprep.mubr.msk.bf16.mxu0 %vm4360_vm0, %v4359_v3  ;;  %4026 = vmatpush3.bf16.msra.mxu0 %v4145_v34 }
  0x8a   :  { %4027 = vmatprep.subr.bf16.mxu0 %v4359_v3 }
  0x8d   :  { %4028 = vmatpush3.bf16.msra.mxu0 %v4148_v37 }
  0x8e   :  { %4029 = vmatprep.subr.bf16.mxu0 %v4359_v3 }
  0x91   :  { %4030 = vmatpush3.bf16.msra.mxu0 %v4151_v40 }
  0x92   :  { %4031 = vmatprep.subr.bf16.mxu0 %v4359_v3 }
  0x95   :  { %4032 = vmatpush3.bf16.msra.mxu0 %v4154_v43 }
  0x96   :  { %4033 = vmatprep.subr.bf16.mxu0 %v4359_v3 }
  0x99   :  { %4034 = vmatpush3.bf16.msra.mxu0 %v4157_v46 }
  0x9a   :  { %4035 = vmatprep.subr.bf16.mxu0 %v4359_v3 }
  0x9d   :  { %4036 = vmatpush3.bf16.msra.mxu0 %v4160_v49 }
  0x9e   :  { %4037 = vmatprep.subr.bf16.mxu0 %v4359_v3 }
  0xa1   :  { %4038 = vmatpush3.bf16.msra.mxu0 %v4163_v52 }
  0xa2   :  { %4039 = vmatprep.subr.bf16.mxu0 %v4359_v3 }
  0xa5   :  { %4040 = vmatpush3.bf16.msra.mxu0 %v4166_v55 }
  0xa6   :  { %4045 = vmatprep.subr.bf16.mxu0 %v4359_v3 }
 0x15b   :  { %v171_v57 = vpop.f32.mrb[0].mxu0 }
 0x15c   :  { %v172_v58 = vadd.f32 %v3368_v56, %v171_v57  ;;  %v4023_v59 = vpop.f32.mrb[1].mxu0 }
 0x15d   :  { %v174_v60 = vpop.f32.mrb[2].mxu0 }
 0x15e   :  { %vm179_vm7 = vcmp.ge.f32.partialorder %v172_v58, 1.0  ;;  %v4024_v61 = vpop.f32.mrb[3].mxu0  ;;  %v185_v1 = vrot.slane %v172_v58, 2  ;;  %v193_v7 = vrot.slane %v172_v58, 4  ;;  %v201_v13 = vrot.slane %v172_v58, 6 }
 0x15f   :  { %v3373_v62 = vsel %vm179_vm7, 1.0, %v4359_v3  ;;  %v175_v18 = vadd.f32 %v3368_v56, %v174_v60  ;;  %vm3406_vm7 = vmneg %vm62_vm1  ;;  %v4167_v61 = vld [vmem:[%s5474_s5 + $0x40] sm:$0xff]  }
 0x160   :  { %v182_v63 = vsub.f32 %v172_v58, %v3373_v62  ;;  %3759 = vmatprep.subr.bf16.mxu1 %v4167_v61 }
 0x161   :  { %v216_v24 = vrot.slane %v175_v18, 2  ;;  %v224_v30 = vrot.slane %v175_v18, 4  ;;  %v232_v37 = vrot.slane %v175_v18, 6 }
 0x162   :  { %v183_v0 = vmul.f32 0.9, %v182_v63  ;;  %v4169_v63 = vld [vmem:[%s5474_s5 + $0x80] sm:$0xff]  }
 0x164   :  { %v187_v2 = vadd.f32 %v185_v1, %v183_v0  ;;  %v4170_v0 = vld [vmem:[%s5474_s5 + $0x48] sm:$0xff]  }
 0x165   :  { %v4171_v1 = vld [vmem:[%s5474_s5 + $0x8] sm:$0xff]  }
 0x166   :  { %vm188_vm8 = vcmp.ge.f32.partialorder %v187_v2, 1.0 }
 0x167   :  { %v3374_v4 = vsel %vm188_vm8, 1.0, %v4359_v3  ;;  %vm3410_vm8 = vmneg %vm71_vm3 }
 0x168   :  { %v191_v5 = vsub.f32 %v187_v2, %v3374_v4  ;;  %v239_v36 = vrot.slane %v3374_v4, 6  ;;  %v4172_v2 = vld [vmem:[%s5474_s5 + $0x88] sm:$0xff]   ;;  %v4173_v4 = vld [vmem:[%s5474_s5 + $0x50] sm:$0xff]  }
 0x16a   :  { %v192_v6 = vmul.f32 0.9, %v191_v5  ;;  %v257_v43 = vsel %vm256_vm13, %v3373_v62, %v239_v36  ;;  %v4168_v62 = vld [vmem:[%s5474_s5] sm:$0xff]   ;;  %v4174_v5 = vld [vmem:[%s5474_s5 + $0x10] sm:$0xff]  }
 0x16c   :  { %v195_v8 = vadd.f32 %v193_v7, %v192_v6  ;;  %v4175_v6 = vld [vmem:[%s5474_s5 + $0x90] sm:$0xff]   ;;  %v4176_v7 = vld [vmem:[%s5474_s5 + $0x58] sm:$0xff]  }
 0x16e   :  { %vm196_vm9 = vcmp.ge.f32.partialorder %v195_v8, 1.0 }
 0x16f   :  { %v3375_v9 = vsel %vm196_vm9, 1.0, %v4359_v3  ;;  %vm4363_vm9 = vmmov 1  }
 0x170   :  { %v199_v11 = vsub.f32 %v195_v8, %v3375_v9  ;;  %v242_v39 = vrot.slane %v3375_v9, 4  ;;  %v4177_v8 = vld [vmem:[%s5474_s5 + $0x18] sm:$0xff]  }
 0x171   :  { %v4178_v9 = vld [vmem:[%s5474_s5 + $0x98] sm:$0xff]  }
 0x172   :  { %v200_v14 = vmul.f32 0.9, %v199_v11  ;;  %v259_v44 = vsel %vm258_vm15, %v257_v43, %v242_v39  ;;  %v4179_v11 = vld [vmem:[%s5474_s5 + $0x60] sm:$0xff]  }
 0x174   :  { %v203_v15 = vadd.f32 %v201_v13, %v200_v14  ;;  %v4180_v13 = vld [vmem:[%s5474_s5 + $0x20] sm:$0xff]  }
 0x175   :  { %v4181_v14 = vld [vmem:[%s5474_s5 + $0xa0] sm:$0xff]  }
 0x176   :  { %vm204_vm10 = vcmp.ge.f32.partialorder %v203_v15, 1.0 }
 0x177   :  { %v3376_v16 = vsel %vm204_vm10, 1.0, %v4359_v3  ;;  %vm4602_vm10 = vmpackc.low %vm4363_vm9, %vm3406_vm7 }
 0x178   :  { %v207_v17 = vsub.f32 %v203_v15, %v3376_v16  ;;  %v245_v41 = vrot.slane %v3376_v16, 2  ;;  %v4182_v15 = vld [vmem:[%s5474_s5 + $0x68] sm:$0xff]  }
 0x179   :  { %v4183_v16 = vld [vmem:[%s5474_s5 + $0x28] sm:$0xff]  }
 0x17a   :  { %v208_v19 = vmul.f32 0.9, %v207_v17  ;;  %v261_v46 = vsel %vm260_vm5, %v259_v44, %v245_v41  ;;  %v4184_v17 = vld [vmem:[%s5474_s5 + $0xa8] sm:$0xff]  }
 0x17b   :  { %v265_v49 = vrot.slane %v261_v46, 6  ;;  %v271_v51 = vrot.slane %v261_v46, 2 }
 0x17c   :  { %v209_v20 = vadd.f32 %v208_v19, %v175_v18  ;;  %v4185_v18 = vld [vmem:[%s5474_s5 + $0x70] sm:$0xff]  }
 0x17d   :  { %v4186_v19 = vld [vmem:[%s5474_s5 + $0x30] sm:$0xff]  }
 0x17e   :  { %vm210_vm11 = vcmp.ge.f32.partialorder %v209_v20, 1.0 }
 0x17f   :  { %v3377_v21 = vsel %vm210_vm11, 1.0, %v4359_v3  ;;  %vm4606_vm11 = vmpackc.low %vm3410_vm8, %vm4363_vm9 }
 0x180   :  { %v213_v22 = vsub.f32 %v209_v20, %v3377_v21  ;;  %v4187_v20 = vld [vmem:[%s5474_s5 + $0xb0] sm:$0xff]  }
 0x182   :  { %v214_v23 = vmul.f32 0.9, %v213_v22  ;;  %v4189_v22 = vld [vmem:[%s5474_s5 + $0x38] sm:$0xff]  }
 0x184   :  { %v218_v25 = vadd.f32 %v216_v24, %v214_v23  ;;  %v4190_v23 = vld [vmem:[%s5474_s5 + $0xb8] sm:$0xff]  }
 0x186   :  { %vm219_vm12 = vcmp.ge.f32.partialorder %v218_v25, 1.0 }
 0x187   :  { %v3378_v26 = vsel %vm219_vm12, 1.0, %v4359_v3 }
 0x188   :  { %v222_v27 = vsub.f32 %v218_v25, %v3378_v26  ;;  %v248_v28 = vrot.slane %v3378_v26, 6  ;;  %v3381_v26 = vld [vmem:[%s5475_s4] ss:$0 sm:$0xff] }
 0x18a   :  { %v223_v29 = vmul.f32 0.9, %v222_v27  ;;  %v262_v31 = vsel %vm256_vm13, %v3377_v21, %v248_v28  ;;  %v4188_v21 = vld [vmem:[%s5474_s5 + $0x78] sm:$0xff]  }
 0x18c   :  { %v226_v32 = vadd.f32 %v224_v30, %v223_v29 }
 0x18e   :  { %vm227_vm14 = vcmp.ge.f32.partialorder %v226_v32, 1.0 }
 0x18f   :  { %v3379_v33 = vsel %vm227_vm14, 1.0, %v4359_v3 }
 0x190   :  { %v230_v34 = vsub.f32 %v226_v32, %v3379_v33  ;;  %v251_v35 = vrot.slane %v3379_v33, 4 }
 0x192   :  { %v231_v38 = vmul.f32 0.9, %v230_v34  ;;  %v263_v40 = vsel %vm258_vm15, %v262_v31, %v251_v35 }
 0x194   :  { %v234_v42 = vadd.f32 %v232_v37, %v231_v38 }
 0x196   :  { %vm235_vm6 = vcmp.ge.f32.partialorder %v234_v42, 1.0 }
 0x197   :  { %v3380_v45 = vsel %vm235_vm6, 1.0, %v4359_v3 }
 0x198   :  { %v254_v47 = vrot.slane %v3380_v45, 2 }
 0x19a   :  { %v264_v48 = vsel %vm260_vm5, %v263_v40, %v254_v47 }
 0x19b   :  { %v266_v50 = vrot.slane %v264_v48, 6  ;;  %v272_v52 = vrot.slane %v264_v48, 2  ;;  %v4600_v53 = vpack.c.bf16 %v264_v48, %v261_v46 }
 0x19d   :  { %v273_v12 = vsel %vm74_vm2, %v271_v51, %v272_v52  ;;  %v274_v56 = vsel %vm74_vm2, %v272_v52, %v271_v51  ;;  %511 = vmatprep.mubr.bf16.mxu1 %v4600_v53  ;;  %v267_v57 = vsel %vm62_vm1, %v265_v49, %v266_v50  ;;  %v268_v58 = vsel %vm62_vm1, %v266_v50, %v265_v49 }
 0x19e   :  { %v4619_v59 = vpack.c.bf16 %v274_v56, %v273_v12  ;;  %v4621_v60 = vpack.c.bf16 %v267_v57, %v268_v58 }
 0x1a0   :  { %3409 = vmatmul.mubr.msk.bf16.vlgmr.msra.gmra.mrb[0].mxu1 %vm4602_vm10, %v4621_v60  ;;  %4042 = vmatmul.mubr.msk.bf16.vlgmr.msra.gmra.mrb[4].mxu0 %vm4606_vm11, %v4619_v59 }
 0x1a1   :  { %4061 = vmatprep.mubr.msk.bf16.mxu0 %vm4360_vm0, %v4359_v3  ;;  %3760 = vmatpush3.bf16.msra.mxu1 %v4168_v62 }
 0x1a2   :  { %4046 = vmatpush3.bf16.msra.mxu0 %v4169_v63  ;;  %3761 = vmatprep.subr.bf16.mxu1 %v4170_v0 }
 0x1a3   :  { %4047 = vmatprep.subr.bf16.mxu0 %v4359_v3 }
 0x1a5   :  { %3762 = vmatpush3.bf16.msra.mxu1 %v4171_v1 }
 0x1a6   :  { %4048 = vmatpush3.bf16.msra.mxu0 %v4172_v2  ;;  %3763 = vmatprep.subr.bf16.mxu1 %v4173_v4 }
 0x1a7   :  { %4049 = vmatprep.subr.bf16.mxu0 %v4359_v3 }
 0x1a9   :  { %3764 = vmatpush3.bf16.msra.mxu1 %v4174_v5 }
 0x1aa   :  { %4050 = vmatpush3.bf16.msra.mxu0 %v4175_v6  ;;  %3765 = vmatprep.subr.bf16.mxu1 %v4176_v7 }
 0x1ab   :  { %4051 = vmatprep.subr.bf16.mxu0 %v4359_v3 }
 0x1ad   :  { %3766 = vmatpush3.bf16.msra.mxu1 %v4177_v8 }
 0x1ae   :  { %4052 = vmatpush3.bf16.msra.mxu0 %v4178_v9  ;;  %3767 = vmatprep.subr.bf16.mxu1 %v4179_v11 }
 0x1af   :  { %4053 = vmatprep.subr.bf16.mxu0 %v4359_v3 }
 0x1b1   :  { %3768 = vmatpush3.bf16.msra.mxu1 %v4180_v13 }
 0x1b2   :  { %4054 = vmatpush3.bf16.msra.mxu0 %v4181_v14  ;;  %3769 = vmatprep.subr.bf16.mxu1 %v4182_v15 }
 0x1b3   :  { %4055 = vmatprep.subr.bf16.mxu0 %v4359_v3 }
 0x1b5   :  { %3770 = vmatpush3.bf16.msra.mxu1 %v4183_v16 }
 0x1b6   :  { %4056 = vmatpush3.bf16.msra.mxu0 %v4184_v17  ;;  %3771 = vmatprep.subr.bf16.mxu1 %v4185_v18 }
 0x1b7   :  { %4057 = vmatprep.subr.bf16.mxu0 %v4359_v3 }
 0x1b9   :  { %3772 = vmatpush3.bf16.msra.mxu1 %v4186_v19 }
 0x1ba   :  { %4058 = vmatpush3.bf16.msra.mxu0 %v4187_v20  ;;  %3773 = vmatprep.subr.bf16.mxu1 %v4188_v21 }
 0x1bb   :  { %4059 = vmatprep.subr.bf16.mxu0 %v4359_v3 }
 0x1bd   :  { %3774 = vmatpush3.bf16.msra.mxu1 %v4189_v22 }
 0x1be   :  { %4060 = vmatpush3.bf16.msra.mxu0 %v4190_v23 }
 0x1bf   :  { %4065 = vmatprep.subr.bf16.mxu0 %v4359_v3 }
 0x273   :  { %v3744_v24 = vpop.f32.mrb[0].mxu1  ;;  %v554_v25 = vpop.f32.mrb[4].mxu0 }
 0x274   :  { %v3745_v27 = vpop.f32.mrb[1].mxu1  ;;  %v4043_v28 = vpop.f32.mrb[5].mxu0 }
 0x275   :  { %v3746_v29 = vadd.f32 %v3745_v27, %v3744_v24  ;;  %v3747_v30 = vpop.f32.mrb[2].mxu1  ;;  %v557_v31 = vpop.f32.mrb[6].mxu0 }
 0x276   :  { %v3748_v32 = vpop.f32.mrb[3].mxu1  ;;  %v4044_v33 = vpop.f32.mrb[7].mxu0 }
 0x277   :  { %v514_v34 = vadd.f32 %v3746_v29, %v3381_v26  ;;  %v3749_v35 = vadd.f32 %v3748_v32, %v3747_v30 }
 0x279   :  { %v555_v36 = vadd.f32 %v554_v25, %v514_v34  ;;  %v517_v37 = vadd.f32 %v3749_v35, %v3381_v26 }
 0x27b   :  { %v558_v38 = vadd.f32 %v557_v31, %v517_v37  ;;  %vm562_vm3 = vcmp.ge.f32.partialorder %v555_v36, 1.0  ;;  %v568_v41 = vrot.slane %v555_v36, 2  ;;  %v576_v46 = vrot.slane %v555_v36, 4 }
 0x27c   :  { %v3414_v39 = vsel %vm562_vm3, 1.0, %v4359_v3  ;;  %v584_v52 = vrot.slane %v555_v36, 6 }
 0x27d   :  { %v565_v40 = vsub.f32 %v555_v36, %v3414_v39  ;;  %v599_v0 = vrot.slane %v558_v38, 2  ;;  %v607_v7 = vrot.slane %v558_v38, 4  ;;  %v615_v17 = vrot.slane %v558_v38, 6 }
 0x27f   :  { %v566_v42 = vmul.f32 0.9, %v565_v40  ;;  %v4191_v40 = vld [vmem:[%s5476_s7 + $0x40] sm:$0xff]  }
 0x280   :  { %3790 = vmatprep.subr.bf16.mxu1 %v4191_v40 }
 0x281   :  { %v570_v43 = vadd.f32 %v568_v41, %v566_v42  ;;  %v4192_v41 = vld [vmem:[%s5476_s7] sm:$0xff]  }
 0x282   :  { %v4193_v42 = vld [vmem:[%s5476_s7 + $0x80] sm:$0xff]  }
 0x283   :  { %vm571_vm12 = vcmp.ge.f32.partialorder %v570_v43, 1.0 }
 0x284   :  { %v3415_v44 = vsel %vm571_vm12, 1.0, %v4359_v3 }
 0x285   :  { %v574_v45 = vsub.f32 %v570_v43, %v3415_v44  ;;  %v622_v16 = vrot.slane %v3415_v44, 6  ;;  %v4194_v43 = vld [vmem:[%s5476_s7 + $0x48] sm:$0xff]  }
 0x286   :  { %v4195_v44 = vld [vmem:[%s5476_s7 + $0x8] sm:$0xff]  }
 0x287   :  { %v575_v47 = vmul.f32 0.9, %v574_v45  ;;  %v639_v23 = vsel %vm256_vm13, %v3414_v39, %v622_v16  ;;  %v4196_v45 = vld [vmem:[%s5476_s7 + $0x88] sm:$0xff]  }
 0x289   :  { %v578_v48 = vadd.f32 %v576_v46, %v575_v47  ;;  %v4197_v46 = vld [vmem:[%s5476_s7 + $0x50] sm:$0xff]  }
 0x28a   :  { %v4198_v47 = vld [vmem:[%s5476_s7 + $0x10] sm:$0xff]  }
 0x28b   :  { %vm579_vm14 = vcmp.ge.f32.partialorder %v578_v48, 1.0 }
 0x28c   :  { %v3416_v49 = vsel %vm579_vm14, 1.0, %v4359_v3 }
 0x28d   :  { %v582_v50 = vsub.f32 %v578_v48, %v3416_v49  ;;  %v625_v19 = vrot.slane %v3416_v49, 4  ;;  %v4199_v48 = vld [vmem:[%s5476_s7 + $0x90] sm:$0xff]   ;;  %v4200_v49 = vld [vmem:[%s5476_s7 + $0x58] sm:$0xff]  }
 0x28f   :  { %v583_v51 = vmul.f32 0.9, %v582_v50  ;;  %v640_v24 = vsel %vm258_vm15, %v639_v23, %v625_v19  ;;  %v4201_v50 = vld [vmem:[%s5476_s7 + $0x18] sm:$0xff]  }
 0x291   :  { %v586_v12 = vadd.f32 %v584_v52, %v583_v51  ;;  %v4202_v51 = vld [vmem:[%s5476_s7 + $0x98] sm:$0xff]   ;;  %v4203_v52 = vld [vmem:[%s5476_s7 + $0x60] sm:$0xff]  }
 0x293   :  { %vm587_vm6 = vcmp.ge.f32.partialorder %v586_v12, 1.0 }
 0x294   :  { %v3417_v56 = vsel %vm587_vm6, 1.0, %v4359_v3 }
 0x295   :  { %v590_v57 = vsub.f32 %v586_v12, %v3417_v56  ;;  %v628_v21 = vrot.slane %v3417_v56, 2  ;;  %v4204_v12 = vld [vmem:[%s5476_s7 + $0x20] sm:$0xff]  }
 0x296   :  { %v4205_v56 = vld [vmem:[%s5476_s7 + $0xa0] sm:$0xff]  }
 0x297   :  { %v591_v58 = vmul.f32 0.9, %v590_v57  ;;  %v641_v26 = vsel %vm260_vm5, %v640_v24, %v628_v21  ;;  %v4206_v57 = vld [vmem:[%s5476_s7 + $0x68] sm:$0xff]  }
 0x298   :  { %v645_v29 = vrot.slane %v641_v26, 6  ;;  %v651_v31 = vrot.slane %v641_v26, 2 }
 0x299   :  { %v592_v61 = vadd.f32 %v591_v58, %v558_v38  ;;  %v4207_v58 = vld [vmem:[%s5476_s7 + $0x28] sm:$0xff]  }
 0x29b   :  { %vm593_vm7 = vcmp.ge.f32.partialorder %v592_v61, 1.0 }
 0x29c   :  { %v3418_v62 = vsel %vm593_vm7, 1.0, %v4359_v3 }
 0x29d   :  { %v596_v63 = vsub.f32 %v592_v61, %v3418_v62  ;;  %v4208_v61 = vld [vmem:[%s5476_s7 + $0xa8] sm:$0xff]  }
 0x29f   :  { %v597_v1 = vmul.f32 0.9, %v596_v63  ;;  %v4210_v63 = vld [vmem:[%s5476_s7 + $0x30] sm:$0xff]  }
 0x2a1   :  { %v601_v2 = vadd.f32 %v599_v0, %v597_v1  ;;  %v4211_v0 = vld [vmem:[%s5476_s7 + $0xb0] sm:$0xff]   ;;  %v4212_v1 = vld [vmem:[%s5476_s7 + $0x78] sm:$0xff]  }
 0x2a3   :  { %vm602_vm8 = vcmp.ge.f32.partialorder %v601_v2, 1.0 }
 0x2a4   :  { %v3419_v4 = vsel %vm602_vm8, 1.0, %v4359_v3 }
 0x2a5   :  { %v605_v5 = vsub.f32 %v601_v2, %v3419_v4  ;;  %v631_v6 = vrot.slane %v3419_v4, 6  ;;  %v4213_v2 = vld [vmem:[%s5476_s7 + $0x38] sm:$0xff]  }
 0x2a6   :  { %v4214_v4 = vld [vmem:[%s5476_s7 + $0xb8] sm:$0xff]  }
 0x2a7   :  { %v606_v8 = vmul.f32 0.9, %v605_v5  ;;  %v642_v9 = vsel %vm256_vm13, %v3418_v62, %v631_v6  ;;  %v4209_v62 = vld [vmem:[%s5476_s7 + $0x70] sm:$0xff]  }
 0x2a9   :  { %v609_v11 = vadd.f32 %v607_v7, %v606_v8  ;;  %v3422_v7 = vld [vmem:[%s5477_s6] ss:$0 sm:$0xff] }
 0x2ab   :  { %vm610_vm9 = vcmp.ge.f32.partialorder %v609_v11, 1.0 }
 0x2ac   :  { %v3420_v13 = vsel %vm610_vm9, 1.0, %v4359_v3 }
 0x2ad   :  { %v613_v14 = vsub.f32 %v609_v11, %v3420_v13  ;;  %v634_v15 = vrot.slane %v3420_v13, 4 }
 0x2af   :  { %v614_v18 = vmul.f32 0.9, %v613_v14  ;;  %v643_v20 = vsel %vm258_vm15, %v642_v9, %v634_v15 }
 0x2b1   :  { %v617_v22 = vadd.f32 %v615_v17, %v614_v18 }
 0x2b3   :  { %vm618_vm3 = vcmp.ge.f32.partialorder %v617_v22, 1.0 }
 0x2b4   :  { %v3421_v25 = vsel %vm618_vm3, 1.0, %v4359_v3 }
 0x2b5   :  { %v637_v27 = vrot.slane %v3421_v25, 2 }
 0x2b7   :  { %v644_v28 = vsel %vm260_vm5, %v643_v20, %v637_v27 }
 0x2b8   :  { %v646_v30 = vrot.slane %v644_v28, 6  ;;  %v652_v32 = vrot.slane %v644_v28, 2  ;;  %v4728_v33 = vpack.c.bf16 %v644_v28, %v641_v26 }
 0x2ba   :  { %891 = vmatprep.mubr.bf16.mxu1 %v4728_v33  ;;  %v647_v34 = vsel %vm62_vm1, %v645_v29, %v646_v30  ;;  %v648_v35 = vsel %vm62_vm1, %v646_v30, %v645_v29  ;;  %v653_v36 = vsel %vm74_vm2, %v651_v31, %v652_v32  ;;  %v654_v37 = vsel %vm74_vm2, %v652_v32, %v651_v31 }
 0x2bb   :  { %v4739_v38 = vpack.c.bf16 %v647_v34, %v648_v35  ;;  %v4741_v39 = vpack.c.bf16 %v654_v37, %v653_v36 }
 0x2bd   :  { %3450 = vmatmul.mubr.msk.bf16.vlgmr.msra.gmra.mrb[4].mxu1 %vm4602_vm10, %v4739_v38  ;;  %4062 = vmatmul.mubr.msk.bf16.vlgmr.msra.gmra.mrb[8].mxu0 %vm4606_vm11, %v4741_v39 }
 0x2be   :  { %4081 = vmatprep.mubr.msk.bf16.mxu0 %vm4360_vm0, %v4359_v3  ;;  %3791 = vmatpush3.bf16.msra.mxu1 %v4192_v41 }
 0x2bf   :  { %4066 = vmatpush3.bf16.msra.mxu0 %v4193_v42  ;;  %3792 = vmatprep.subr.bf16.mxu1 %v4194_v43 }
 0x2c0   :  { %4067 = vmatprep.subr.bf16.mxu0 %v4359_v3 }
 0x2c2   :  { %3793 = vmatpush3.bf16.msra.mxu1 %v4195_v44 }
 0x2c3   :  { %4068 = vmatpush3.bf16.msra.mxu0 %v4196_v45  ;;  %3794 = vmatprep.subr.bf16.mxu1 %v4197_v46 }
 0x2c4   :  { %4069 = vmatprep.subr.bf16.mxu0 %v4359_v3 }
 0x2c6   :  { %3795 = vmatpush3.bf16.msra.mxu1 %v4198_v47 }
 0x2c7   :  { %4070 = vmatpush3.bf16.msra.mxu0 %v4199_v48  ;;  %3796 = vmatprep.subr.bf16.mxu1 %v4200_v49 }
 0x2c8   :  { %4071 = vmatprep.subr.bf16.mxu0 %v4359_v3 }
 0x2ca   :  { %3797 = vmatpush3.bf16.msra.mxu1 %v4201_v50 }
 0x2cb   :  { %4072 = vmatpush3.bf16.msra.mxu0 %v4202_v51  ;;  %3798 = vmatprep.subr.bf16.mxu1 %v4203_v52 }
 0x2cc   :  { %4073 = vmatprep.subr.bf16.mxu0 %v4359_v3 }
 0x2ce   :  { %3799 = vmatpush3.bf16.msra.mxu1 %v4204_v12 }
 0x2cf   :  { %4074 = vmatpush3.bf16.msra.mxu0 %v4205_v56  ;;  %3800 = vmatprep.subr.bf16.mxu1 %v4206_v57 }
 0x2d0   :  { %4075 = vmatprep.subr.bf16.mxu0 %v4359_v3 }
 0x2d2   :  { %3801 = vmatpush3.bf16.msra.mxu1 %v4207_v58 }
 0x2d3   :  { %4076 = vmatpush3.bf16.msra.mxu0 %v4208_v61  ;;  %3802 = vmatprep.subr.bf16.mxu1 %v4209_v62 }
 0x2d4   :  { %4077 = vmatprep.subr.bf16.mxu0 %v4359_v3 }
 0x2d6   :  { %3803 = vmatpush3.bf16.msra.mxu1 %v4210_v63 }
 0x2d7   :  { %4078 = vmatpush3.bf16.msra.mxu0 %v4211_v0  ;;  %3804 = vmatprep.subr.bf16.mxu1 %v4212_v1 }
 0x2d8   :  { %4079 = vmatprep.subr.bf16.mxu0 %v4359_v3 }
 0x2da   :  { %3805 = vmatpush3.bf16.msra.mxu1 %v4213_v2 }
 0x2db   :  { %4080 = vmatpush3.bf16.msra.mxu0 %v4214_v4 }
 0x2dc   :  { %4085 = vmatprep.subr.bf16.mxu0 %v4359_v3 }
 0x390   :  { %v3775_v5 = vpop.f32.mrb[4].mxu1  ;;  %v934_v6 = vpop.f32.mrb[8].mxu0 }
 0x391   :  { %v3776_v8 = vpop.f32.mrb[5].mxu1  ;;  %v4063_v9 = vpop.f32.mrb[9].mxu0 }
 0x392   :  { %v3777_v11 = vadd.f32 %v3776_v8, %v3775_v5  ;;  %v3778_v13 = vpop.f32.mrb[6].mxu1  ;;  %v937_v14 = vpop.f32.mrb[10].mxu0 }
 0x393   :  { %v3779_v15 = vpop.f32.mrb[7].mxu1  ;;  %v4064_v16 = vpop.f32.mrb[11].mxu0 }
 0x394   :  { %v894_v17 = vadd.f32 %v3777_v11, %v3422_v7  ;;  %v3780_v18 = vadd.f32 %v3779_v15, %v3778_v13 }
 0x396   :  { %v935_v19 = vadd.f32 %v934_v6, %v894_v17  ;;  %v897_v20 = vadd.f32 %v3780_v18, %v3422_v7 }
 0x398   :  { %vm942_vm12 = vcmp.ge.f32.partialorder %v935_v19, 1.0  ;;  %v938_v22 = vadd.f32 %v937_v14, %v897_v20  ;;  %v948_v25 = vrot.slane %v935_v19, 2  ;;  %v956_v30 = vrot.slane %v935_v19, 4 }
 0x399   :  { %v3455_v21 = vsel %vm942_vm12, 1.0, %v4359_v3  ;;  %v964_v35 = vrot.slane %v935_v19, 6 }
 0x39a   :  { %v945_v23 = vsub.f32 %v935_v19, %v3455_v21  ;;  %v979_v47 = vrot.slane %v938_v22, 2  ;;  %v987_v12 = vrot.slane %v938_v22, 4  ;;  %v995_v0 = vrot.slane %v938_v22, 6 }
 0x39c   :  { %v946_v24 = vmul.f32 0.9, %v945_v23 }
 0x39e   :  { %v950_v26 = vadd.f32 %v948_v25, %v946_v24 }
 0x3a0   :  { %vm951_vm14 = vcmp.ge.f32.partialorder %v950_v26, 1.0 }
 0x3a1   :  { %v3456_v27 = vsel %vm951_vm14, 1.0, %v4359_v3 }
 0x3a2   :  { %v954_v28 = vsub.f32 %v950_v26, %v3456_v27  ;;  %v1002_v63 = vrot.slane %v3456_v27, 6  ;;  %v4215_v26 = vld [vmem:[%s5478_s9 + $0x40] sm:$0xff]  }
 0x3a3   :  { %v4216_v27 = vld [vmem:[%s5478_s9] sm:$0xff]   ;;  %3821 = vmatprep.subr.bf16.mxu1 %v4215_v26 }
 0x3a4   :  { %v955_v29 = vmul.f32 0.9, %v954_v28  ;;  %v1019_v7 = vsel %vm256_vm13, %v3455_v21, %v1002_v63  ;;  %v4217_v28 = vld [vmem:[%s5478_s9 + $0x80] sm:$0xff]  }
 0x3a6   :  { %v958_v31 = vadd.f32 %v956_v30, %v955_v29  ;;  %v4218_v29 = vld [vmem:[%s5478_s9 + $0x48] sm:$0xff]  }
 0x3a7   :  { %v4219_v30 = vld [vmem:[%s5478_s9 + $0x8] sm:$0xff]  }
 0x3a8   :  { %vm959_vm6 = vcmp.ge.f32.partialorder %v958_v31, 1.0 }
 0x3a9   :  { %v3457_v32 = vsel %vm959_vm6, 1.0, %v4359_v3 }
 0x3aa   :  { %v962_v34 = vsub.f32 %v958_v31, %v3457_v32  ;;  %v1005_v2 = vrot.slane %v3457_v32, 4  ;;  %v4220_v31 = vld [vmem:[%s5478_s9 + $0x88] sm:$0xff]   ;;  %v4221_v32 = vld [vmem:[%s5478_s9 + $0x50] sm:$0xff]  }
 0x3ac   :  { %v963_v36 = vmul.f32 0.9, %v962_v34  ;;  %v1020_v8 = vsel %vm258_vm15, %v1019_v7, %v1005_v2  ;;  %v4222_v34 = vld [vmem:[%s5478_s9 + $0x10] sm:$0xff]  }
 0x3ae   :  { %v966_v37 = vadd.f32 %v964_v35, %v963_v36  ;;  %v4223_v35 = vld [vmem:[%s5478_s9 + $0x90] sm:$0xff]   ;;  %v4224_v36 = vld [vmem:[%s5478_s9 + $0x58] sm:$0xff]  }
 0x3b0   :  { %vm967_vm7 = vcmp.ge.f32.partialorder %v966_v37, 1.0 }
 0x3b1   :  { %v3458_v40 = vsel %vm967_vm7, 1.0, %v4359_v3 }
 0x3b2   :  { %v970_v41 = vsub.f32 %v966_v37, %v3458_v40  ;;  %v1008_v5 = vrot.slane %v3458_v40, 2  ;;  %v4225_v37 = vld [vmem:[%s5478_s9 + $0x18] sm:$0xff]  }
 0x3b3   :  { %v4226_v40 = vld [vmem:[%s5478_s9 + $0x98] sm:$0xff]  }
 0x3b4   :  { %v971_v42 = vmul.f32 0.9, %v970_v41  ;;  %v4847_v11 = vsel %vm260_vm5, %v1020_v8, %v1008_v5  ;;  %v4227_v41 = vld [vmem:[%s5478_s9 + $0x60] sm:$0xff]  }
 0x3b5   :  { %v1025_v15 = vrot.slane %v4847_v11, 6  ;;  %v1031_v17 = vrot.slane %v4847_v11, 2 }
 0x3b6   :  { %v972_v43 = vadd.f32 %v971_v42, %v938_v22  ;;  %v4228_v42 = vld [vmem:[%s5478_s9 + $0x20] sm:$0xff]  }
 0x3b8   :  { %vm973_vm8 = vcmp.ge.f32.partialorder %v972_v43, 1.0 }
 0x3b9   :  { %v3459_v44 = vsel %vm973_vm8, 1.0, %v4359_v3 }
 0x3ba   :  { %v976_v45 = vsub.f32 %v972_v43, %v3459_v44  ;;  %v4229_v43 = vld [vmem:[%s5478_s9 + $0xa0] sm:$0xff]  }
 0x3bc   :  { %v977_v46 = vmul.f32 0.9, %v976_v45  ;;  %v4231_v45 = vld [vmem:[%s5478_s9 + $0x28] sm:$0xff]  }
 0x3be   :  { %v981_v48 = vadd.f32 %v979_v47, %v977_v46  ;;  %v4232_v46 = vld [vmem:[%s5478_s9 + $0xa8] sm:$0xff]   ;;  %v4233_v47 = vld [vmem:[%s5478_s9 + $0x70] sm:$0xff]  }
 0x3c0   :  { %vm982_vm9 = vcmp.ge.f32.partialorder %v981_v48, 1.0 }
 0x3c1   :  { %v3460_v49 = vsel %vm982_vm9, 1.0, %v4359_v3 }
 0x3c2   :  { %v985_v50 = vsub.f32 %v981_v48, %v3460_v49  ;;  %v1011_v51 = vrot.slane %v3460_v49, 6  ;;  %v4234_v48 = vld [vmem:[%s5478_s9 + $0x30] sm:$0xff]  }
 0x3c3   :  { %v4235_v49 = vld [vmem:[%s5478_s9 + $0xb0] sm:$0xff]  }
 0x3c4   :  { %v986_v52 = vmul.f32 0.9, %v985_v50  ;;  %v1022_v56 = vsel %vm256_vm13, %v3459_v44, %v1011_v51  ;;  %v4230_v44 = vld [vmem:[%s5478_s9 + $0x68] sm:$0xff]   ;;  %v4236_v50 = vld [vmem:[%s5478_s9 + $0x78] sm:$0xff]  }
 0x3c5   :  { %v4237_v51 = vld [vmem:[%s5478_s9 + $0x38] sm:$0xff]  }
 0x3c6   :  { %v989_v57 = vadd.f32 %v987_v12, %v986_v52  ;;  %v4238_v52 = vld [vmem:[%s5478_s9 + $0xb8] sm:$0xff]  }
 0x3c8   :  { %vm990_vm3 = vcmp.ge.f32.partialorder %v989_v57, 1.0 }
 0x3c9   :  { %v3461_v58 = vsel %vm990_vm3, 1.0, %v4359_v3 }
 0x3ca   :  { %v993_v61 = vsub.f32 %v989_v57, %v3461_v58  ;;  %v1014_v62 = vrot.slane %v3461_v58, 4  ;;  %v3463_v57 = vld [vmem:[%s5479_s8] ss:$0 sm:$0xff] }
 0x3cc   :  { %v994_v1 = vmul.f32 0.9, %v993_v61  ;;  %v1023_v4 = vsel %vm258_vm15, %v1022_v56, %v1014_v62 }
 0x3ce   :  { %v997_v6 = vadd.f32 %v995_v0, %v994_v1 }
 0x3d0   :  { %vm998_vm12 = vcmp.ge.f32.partialorder %v997_v6, 1.0 }
 0x3d1   :  { %v3462_v9 = vsel %vm998_vm12, 1.0, %v4359_v3 }
 0x3d2   :  { %v1017_v13 = vrot.slane %v3462_v9, 2 }
 0x3d4   :  { %v4850_v14 = vsel %vm260_vm5, %v1023_v4, %v1017_v13 }
 0x3d5   :  { %v1026_v16 = vrot.slane %v4850_v14, 6  ;;  %v1032_v18 = vrot.slane %v4850_v14, 2  ;;  %v1038_v19 = vpack.c.bf16 %v4850_v14, %v4847_v11 }
 0x3d7   :  { %1271 = vmatprep.mubr.bf16.mxu1 %v1038_v19  ;;  %v1027_v20 = vsel %vm62_vm1, %v1025_v15, %v1026_v16  ;;  %v1028_v21 = vsel %vm62_vm1, %v1026_v16, %v1025_v15  ;;  %v1033_v22 = vsel %vm74_vm2, %v1031_v17, %v1032_v18  ;;  %v1034_v23 = vsel %vm74_vm2, %v1032_v18, %v1031_v17 }
 0x3d8   :  { %v3490_v24 = vpack.c.bf16 %v1027_v20, %v1028_v21  ;;  %v3494_v25 = vpack.c.bf16 %v1034_v23, %v1033_v22 }
 0x3da   :  { %3491 = vmatmul.mubr.msk.bf16.vlgmr.msra.gmra.mrb[8].mxu1 %vm4602_vm10, %v3490_v24  ;;  %4082 = vmatmul.mubr.msk.bf16.vlgmr.msra.gmra.mrb[12].mxu0 %vm4606_vm11, %v3494_v25 }
 0x3db   :  { %4101 = vmatprep.mubr.msk.bf16.mxu0 %vm4360_vm0, %v4359_v3  ;;  %3822 = vmatpush3.bf16.msra.mxu1 %v4216_v27 }
 0x3dc   :  { %4086 = vmatpush3.bf16.msra.mxu0 %v4217_v28  ;;  %3823 = vmatprep.subr.bf16.mxu1 %v4218_v29 }
 0x3dd   :  { %4087 = vmatprep.subr.bf16.mxu0 %v4359_v3 }
 0x3df   :  { %3824 = vmatpush3.bf16.msra.mxu1 %v4219_v30 }
 0x3e0   :  { %4088 = vmatpush3.bf16.msra.mxu0 %v4220_v31  ;;  %3825 = vmatprep.subr.bf16.mxu1 %v4221_v32 }
 0x3e1   :  { %4089 = vmatprep.subr.bf16.mxu0 %v4359_v3 }
 0x3e3   :  { %3826 = vmatpush3.bf16.msra.mxu1 %v4222_v34 }
 0x3e4   :  { %4090 = vmatpush3.bf16.msra.mxu0 %v4223_v35  ;;  %3827 = vmatprep.subr.bf16.mxu1 %v4224_v36 }
 0x3e5   :  { %4091 = vmatprep.subr.bf16.mxu0 %v4359_v3 }
 0x3e7   :  { %3828 = vmatpush3.bf16.msra.mxu1 %v4225_v37 }
 0x3e8   :  { %4092 = vmatpush3.bf16.msra.mxu0 %v4226_v40  ;;  %3829 = vmatprep.subr.bf16.mxu1 %v4227_v41 }
 0x3e9   :  { %4093 = vmatprep.subr.bf16.mxu0 %v4359_v3 }
 0x3eb   :  { %3830 = vmatpush3.bf16.msra.mxu1 %v4228_v42 }
 0x3ec   :  { %4094 = vmatpush3.bf16.msra.mxu0 %v4229_v43  ;;  %3831 = vmatprep.subr.bf16.mxu1 %v4230_v44 }
 0x3ed   :  { %4095 = vmatprep.subr.bf16.mxu0 %v4359_v3 }
 0x3ef   :  { %3832 = vmatpush3.bf16.msra.mxu1 %v4231_v45 }
 0x3f0   :  { %4096 = vmatpush3.bf16.msra.mxu0 %v4232_v46  ;;  %3833 = vmatprep.subr.bf16.mxu1 %v4233_v47 }
 0x3f1   :  { %4097 = vmatprep.subr.bf16.mxu0 %v4359_v3 }
 0x3f3   :  { %3834 = vmatpush3.bf16.msra.mxu1 %v4234_v48 }
 0x3f4   :  { %4098 = vmatpush3.bf16.msra.mxu0 %v4235_v49  ;;  %3835 = vmatprep.subr.bf16.mxu1 %v4236_v50 }
 0x3f5   :  { %4099 = vmatprep.subr.bf16.mxu0 %v4359_v3 }
 0x3f7   :  { %3836 = vmatpush3.bf16.msra.mxu1 %v4237_v51 }
 0x3f8   :  { %4100 = vmatpush3.bf16.msra.mxu0 %v4238_v52 }
 0x3f9   :  { %4105 = vmatprep.subr.bf16.mxu0 %v4359_v3 }
 0x4ad   :  { %v3806_v12 = vpop.f32.mrb[8].mxu1  ;;  %v1314_v56 = vpop.f32.mrb[12].mxu0 }
 0x4ae   :  { %v3807_v58 = vpop.f32.mrb[9].mxu1  ;;  %v4083_v61 = vpop.f32.mrb[13].mxu0 }
 0x4af   :  { %v3808_v62 = vadd.f32 %v3807_v58, %v3806_v12  ;;  %v3809_v63 = vpop.f32.mrb[10].mxu1  ;;  %v1317_v0 = vpop.f32.mrb[14].mxu0 }
 0x4b0   :  { %v3810_v1 = vpop.f32.mrb[11].mxu1  ;;  %v4084_v2 = vpop.f32.mrb[15].mxu0 }
 0x4b1   :  { %v1274_v4 = vadd.f32 %v3808_v62, %v3463_v57  ;;  %v3811_v5 = vadd.f32 %v3810_v1, %v3809_v63 }
 0x4b3   :  { %v1315_v6 = vadd.f32 %v1314_v56, %v1274_v4  ;;  %v1277_v7 = vadd.f32 %v3811_v5, %v3463_v57 }
 0x4b5   :  { %v1318_v8 = vadd.f32 %v1317_v0, %v1277_v7  ;;  %vm1322_vm14 = vcmp.ge.f32.partialorder %v1315_v6, 1.0  ;;  %v1328_v15 = vrot.slane %v1315_v6, 2  ;;  %v1336_v20 = vrot.slane %v1315_v6, 4 }
 0x4b6   :  { %v3496_v9 = vsel %vm1322_vm14, 1.0, %v4359_v3  ;;  %v1344_v26 = vrot.slane %v1315_v6, 6 }
 0x4b7   :  { %v1325_v13 = vsub.f32 %v1315_v6, %v3496_v9  ;;  %v1359_v35 = vrot.slane %v1318_v8, 2  ;;  %v1367_v43 = vrot.slane %v1318_v8, 4  ;;  %v1375_v51 = vrot.slane %v1318_v8, 6 }
 0x4b9   :  { %v1326_v16 = vmul.f32 0.9, %v1325_v13 }
 0x4bb   :  { %v1330_v17 = vadd.f32 %v1328_v15, %v1326_v16 }
 0x4bd   :  { %vm1331_vm6 = vcmp.ge.f32.partialorder %v1330_v17, 1.0 }
 0x4be   :  { %v3497_v18 = vsel %vm1331_vm6, 1.0, %v4359_v3 }
 0x4bf   :  { %v1334_v19 = vsub.f32 %v1330_v17, %v3497_v18  ;;  %v1382_v50 = vrot.slane %v3497_v18, 6 }
 0x4c1   :  { %v1335_v21 = vmul.f32 0.9, %v1334_v19  ;;  %v1399_v61 = vsel %vm256_vm13, %v3496_v9, %v1382_v50  ;;  %v4239_v19 = vld [vmem:[%s5480_s11 + $0x40] sm:$0xff]  }
 0x4c2   :  { %3852 = vmatprep.subr.bf16.mxu1 %v4239_v19 }
 0x4c3   :  { %v1338_v22 = vadd.f32 %v1336_v20, %v1335_v21  ;;  %v4240_v20 = vld [vmem:[%s5480_s11] sm:$0xff]  }
 0x4c4   :  { %v4241_v21 = vld [vmem:[%s5480_s11 + $0x80] sm:$0xff]  }
 0x4c5   :  { %vm1339_vm7 = vcmp.ge.f32.partialorder %v1338_v22, 1.0 }
 0x4c6   :  { %v3498_v23 = vsel %vm1339_vm7, 1.0, %v4359_v3 }
 0x4c7   :  { %v1342_v24 = vsub.f32 %v1338_v22, %v3498_v23  ;;  %v1385_v12 = vrot.slane %v3498_v23, 4  ;;  %v4242_v22 = vld [vmem:[%s5480_s11 + $0x48] sm:$0xff]  }
 0x4c8   :  { %v4243_v23 = vld [vmem:[%s5480_s11 + $0x8] sm:$0xff]  }
 0x4c9   :  { %v1343_v25 = vmul.f32 0.9, %v1342_v24  ;;  %v1400_v62 = vsel %vm258_vm15, %v1399_v61, %v1385_v12  ;;  %v4244_v24 = vld [vmem:[%s5480_s11 + $0x88] sm:$0xff]  }
 0x4cb   :  { %v1346_v27 = vadd.f32 %v1344_v26, %v1343_v25  ;;  %v4245_v25 = vld [vmem:[%s5480_s11 + $0x50] sm:$0xff]  }
 0x4cc   :  { %v4246_v26 = vld [vmem:[%s5480_s11 + $0x10] sm:$0xff]  }
 0x4cd   :  { %vm1347_vm8 = vcmp.ge.f32.partialorder %v1346_v27, 1.0 }
 0x4ce   :  { %v3499_v28 = vsel %vm1347_vm8, 1.0, %v4359_v3 }
 0x4cf   :  { %v1350_v29 = vsub.f32 %v1346_v27, %v3499_v28  ;;  %v1388_v57 = vrot.slane %v3499_v28, 2  ;;  %v4247_v27 = vld [vmem:[%s5480_s11 + $0x90] sm:$0xff]   ;;  %v4248_v28 = vld [vmem:[%s5480_s11 + $0x58] sm:$0xff]  }
 0x4d1   :  { %v1351_v30 = vmul.f32 0.9, %v1350_v29  ;;  %v1401_v0 = vsel %vm260_vm5, %v1400_v62, %v1388_v57  ;;  %v4249_v29 = vld [vmem:[%s5480_s11 + $0x18] sm:$0xff]  }
 0x4d2   :  { %v1405_v4 = vrot.slane %v1401_v0, 6  ;;  %v1411_v6 = vrot.slane %v1401_v0, 2 }
 0x4d3   :  { %v1352_v31 = vadd.f32 %v1351_v30, %v1318_v8  ;;  %v4250_v30 = vld [vmem:[%s5480_s11 + $0x98] sm:$0xff]  }
 0x4d5   :  { %vm1353_vm9 = vcmp.ge.f32.partialorder %v1352_v31, 1.0 }
 0x4d6   :  { %v3500_v32 = vsel %vm1353_vm9, 1.0, %v4359_v3 }
 0x4d7   :  { %v1356_v34 = vsub.f32 %v1352_v31, %v3500_v32  ;;  %v4251_v31 = vld [vmem:[%s5480_s11 + $0x60] sm:$0xff]  }
 0x4d9   :  { %v1357_v36 = vmul.f32 0.9, %v1356_v34  ;;  %v4253_v34 = vld [vmem:[%s5480_s11 + $0xa0] sm:$0xff]  }
 0x4db   :  { %v1361_v37 = vadd.f32 %v1359_v35, %v1357_v36  ;;  %v4254_v35 = vld [vmem:[%s5480_s11 + $0x68] sm:$0xff]  }
 0x4dc   :  { %v4255_v36 = vld [vmem:[%s5480_s11 + $0x28] sm:$0xff]  }
 0x4dd   :  { %vm1362_vm3 = vcmp.ge.f32.partialorder %v1361_v37, 1.0 }
 0x4de   :  { %v3501_v40 = vsel %vm1362_vm3, 1.0, %v4359_v3 }
 0x4df   :  { %v1365_v41 = vsub.f32 %v1361_v37, %v3501_v40  ;;  %v1391_v42 = vrot.slane %v3501_v40, 6  ;;  %v4256_v37 = vld [vmem:[%s5480_s11 + $0xa8] sm:$0xff]   ;;  %v4257_v40 = vld [vmem:[%s5480_s11 + $0x70] sm:$0xff]  }
 0x4e1   :  { %v1366_v44 = vmul.f32 0.9, %v1365_v41  ;;  %v1402_v45 = vsel %vm256_vm13, %v3500_v32, %v1391_v42  ;;  %v4252_v32 = vld [vmem:[%s5480_s11 + $0x20] sm:$0xff]   ;;  %v4258_v41 = vld [vmem:[%s5480_s11 + $0x30] sm:$0xff]  }
 0x4e2   :  { %v4259_v42 = vld [vmem:[%s5480_s11 + $0xb0] sm:$0xff]  }
 0x4e3   :  { %v1369_v46 = vadd.f32 %v1367_v43, %v1366_v44  ;;  %v4260_v43 = vld [vmem:[%s5480_s11 + $0x78] sm:$0xff]  }
 0x4e4   :  { %v4261_v44 = vld [vmem:[%s5480_s11 + $0x38] sm:$0xff]  }
 0x4e5   :  { %vm1370_vm12 = vcmp.ge.f32.partialorder %v1369_v46, 1.0 }
 0x4e6   :  { %v3502_v47 = vsel %vm1370_vm12, 1.0, %v4359_v3 }
 0x4e7   :  { %v1373_v48 = vsub.f32 %v1369_v46, %v3502_v47  ;;  %v1394_v49 = vrot.slane %v3502_v47, 4 }
 0x4e9   :  { %v1374_v52 = vmul.f32 0.9, %v1373_v48  ;;  %v1403_v56 = vsel %vm258_vm15, %v1402_v45, %v1394_v49  ;;  %v4262_v45 = vld [vmem:[%s5480_s11 + $0xb8] sm:$0xff]   ;;  %v3504_v48 = vld [vmem:[%s5481_s10] ss:$0 sm:$0xff] }
 0x4eb   :  { %v1377_v58 = vadd.f32 %v1375_v51, %v1374_v52 }
 0x4ed   :  { %vm1378_vm14 = vcmp.ge.f32.partialorder %v1377_v58, 1.0 }
 0x4ee   :  { %v3503_v63 = vsel %vm1378_vm14, 1.0, %v4359_v3 }
 0x4ef   :  { %v1397_v1 = vrot.slane %v3503_v63, 2 }
 0x4f1   :  { %v1404_v2 = vsel %vm260_vm5, %v1403_v56, %v1397_v1 }
 0x4f2   :  { %v1406_v5 = vrot.slane %v1404_v2, 6  ;;  %v1412_v7 = vrot.slane %v1404_v2, 2  ;;  %v1418_v8 = vpack.c.bf16 %v1404_v2, %v1401_v0 }
 0x4f4   :  { %1651 = vmatprep.mubr.bf16.mxu1 %v1418_v8  ;;  %v1407_v13 = vsel %vm62_vm1, %v1405_v4, %v1406_v5  ;;  %v1408_v9 = vsel %vm62_vm1, %v1406_v5, %v1405_v4  ;;  %v1413_v15 = vsel %vm74_vm2, %v1411_v6, %v1412_v7  ;;  %v1414_v16 = vsel %vm74_vm2, %v1412_v7, %v1411_v6 }
 0x4f5   :  { %v3531_v17 = vpack.c.bf16 %v1407_v13, %v1408_v9  ;;  %v3535_v18 = vpack.c.bf16 %v1414_v16, %v1413_v15 }
 0x4f7   :  { %3532 = vmatmul.mubr.msk.bf16.vlgmr.msra.gmra.mrb[12].mxu1 %vm4602_vm10, %v3531_v17  ;;  %4102 = vmatmul.mubr.msk.bf16.vlgmr.msra.gmra.mrb[16].mxu0 %vm4606_vm11, %v3535_v18 }
 0x4f8   :  { %4121 = vmatprep.mubr.msk.bf16.mxu0 %vm4360_vm0, %v4359_v3  ;;  %3853 = vmatpush3.bf16.msra.mxu1 %v4240_v20 }
 0x4f9   :  { %4106 = vmatpush3.bf16.msra.mxu0 %v4241_v21  ;;  %3854 = vmatprep.subr.bf16.mxu1 %v4242_v22 }
 0x4fa   :  { %4107 = vmatprep.subr.bf16.mxu0 %v4359_v3 }
 0x4fc   :  { %3855 = vmatpush3.bf16.msra.mxu1 %v4243_v23 }
 0x4fd   :  { %4108 = vmatpush3.bf16.msra.mxu0 %v4244_v24  ;;  %3856 = vmatprep.subr.bf16.mxu1 %v4245_v25 }
 0x4fe   :  { %4109 = vmatprep.subr.bf16.mxu0 %v4359_v3 }
 0x500   :  { %3857 = vmatpush3.bf16.msra.mxu1 %v4246_v26 }
 0x501   :  { %4110 = vmatpush3.bf16.msra.mxu0 %v4247_v27  ;;  %3858 = vmatprep.subr.bf16.mxu1 %v4248_v28 }
 0x502   :  { %4111 = vmatprep.subr.bf16.mxu0 %v4359_v3 }
 0x504   :  { %3859 = vmatpush3.bf16.msra.mxu1 %v4249_v29 }
 0x505   :  { %4112 = vmatpush3.bf16.msra.mxu0 %v4250_v30  ;;  %3860 = vmatprep.subr.bf16.mxu1 %v4251_v31 }
 0x506   :  { %4113 = vmatprep.subr.bf16.mxu0 %v4359_v3 }
 0x508   :  { %3861 = vmatpush3.bf16.msra.mxu1 %v4252_v32 }
 0x509   :  { %4114 = vmatpush3.bf16.msra.mxu0 %v4253_v34  ;;  %3862 = vmatprep.subr.bf16.mxu1 %v4254_v35 }
 0x50a   :  { %4115 = vmatprep.subr.bf16.mxu0 %v4359_v3 }
 0x50c   :  { %3863 = vmatpush3.bf16.msra.mxu1 %v4255_v36 }
 0x50d   :  { %4116 = vmatpush3.bf16.msra.mxu0 %v4256_v37  ;;  %3864 = vmatprep.subr.bf16.mxu1 %v4257_v40 }
 0x50e   :  { %4117 = vmatprep.subr.bf16.mxu0 %v4359_v3 }
 0x510   :  { %3865 = vmatpush3.bf16.msra.mxu1 %v4258_v41 }
 0x511   :  { %4118 = vmatpush3.bf16.msra.mxu0 %v4259_v42  ;;  %3866 = vmatprep.subr.bf16.mxu1 %v4260_v43 }
 0x512   :  { %4119 = vmatprep.subr.bf16.mxu0 %v4359_v3 }
 0x514   :  { %3867 = vmatpush3.bf16.msra.mxu1 %v4261_v44 }
 0x515   :  { %4120 = vmatpush3.bf16.msra.mxu0 %v4262_v45 }
 0x5ca   :  { %v3837_v46 = vpop.f32.mrb[12].mxu1  ;;  %v1694_v47 = vpop.f32.mrb[16].mxu0 }
 0x5cb   :  { %v3838_v49 = vpop.f32.mrb[13].mxu1  ;;  %v4103_v50 = vpop.f32.mrb[17].mxu0 }
 0x5cc   :  { %v3839_v51 = vadd.f32 %v3838_v49, %v3837_v46  ;;  %v3840_v52 = vpop.f32.mrb[14].mxu1  ;;  %v1697_v12 = vpop.f32.mrb[18].mxu0 }
 0x5cd   :  { %v3841_v56 = vpop.f32.mrb[15].mxu1  ;;  %v4104_v57 = vpop.f32.mrb[19].mxu0 }
 0x5ce   :  { %v1654_v58 = vadd.f32 %v3839_v51, %v3504_v48  ;;  %v3842_v61 = vadd.f32 %v3841_v56, %v3840_v52 }
 0x5d0   :  { %v1695_v62 = vadd.f32 %v1694_v47, %v1654_v58  ;;  %v1657_v63 = vadd.f32 %v3842_v61, %v3504_v48 }
 0x5d2   :  { %vm1702_vm0 = vcmp.ge.f32.partialorder %v1695_v62, 1.0  ;;  %v1698_v1 = vadd.f32 %v1697_v12, %v1657_v63  ;;  %v1708_v5 = vrot.slane %v1695_v62, 2  ;;  %v1716_v9 = vrot.slane %v1695_v62, 4 }
 0x5d3   :  { %v3537_v0 = vsel %vm1702_vm0, 1.0, %v4359_v3  ;;  %v1724_v18 = vrot.slane %v1695_v62, 6 }
 0x5d4   :  { %v1705_v2 = vsub.f32 %v1695_v62, %v3537_v0  ;;  %v1739_v28 = vrot.slane %v1698_v1, 2  ;;  %v1747_v35 = vrot.slane %v1698_v1, 4  ;;  %v1755_v47 = vrot.slane %v1698_v1, 6 }
 0x5d6   :  { %v1706_v4 = vmul.f32 0.9, %v1705_v2 }
 0x5d8   :  { %v1710_v6 = vadd.f32 %v1708_v5, %v1706_v4 }
 0x5da   :  { %vm1711_vm6 = vcmp.ge.f32.partialorder %v1710_v6, 1.0 }
 0x5db   :  { %v3538_v7 = vsel %vm1711_vm6, 1.0, %v4359_v3 }
 0x5dc   :  { %v1714_v8 = vsub.f32 %v1710_v6, %v3538_v7  ;;  %v1762_v41 = vrot.slane %v3538_v7, 6 }
 0x5de   :  { %v1715_v13 = vmul.f32 0.9, %v1714_v8  ;;  %v1779_v49 = vsel %vm256_vm13, %v3537_v0, %v1762_v41  ;;  %v4263_v8 = vld [vmem:[%s5482_s13 + $0xc0] sm:$0xff]   ;;  %v4291_v41 = vld [vmem:[%s5482_s13 + $0xf8] sm:$0xff]  }
 0x5df   :  { %3905 = vmatprep.subr.bf16.mxu0 %v4263_v8 }
 0x5e0   :  { %v1718_v15 = vadd.f32 %v1716_v9, %v1715_v13  ;;  %v4264_v13 = vld [vmem:[%s5482_s13 + $0x80] sm:$0xff]  }
 0x5e1   :  { %v4265_v9 = vld [vmem:[%s5482_s13 + $0x40] sm:$0xff]  }
 0x5e2   :  { %vm1719_vm7 = vcmp.ge.f32.partialorder %v1718_v15, 1.0  ;;  %3883 = vmatprep.subr.bf16.mxu1 %v4265_v9 }
 0x5e3   :  { %v3539_v16 = vsel %vm1719_vm7, 1.0, %v4359_v3 }
 0x5e4   :  { %v1722_v17 = vsub.f32 %v1718_v15, %v3539_v16  ;;  %v1765_v43 = vrot.slane %v3539_v16, 4  ;;  %v4268_v15 = vld [vmem:[%s5482_s13 + $0x88] sm:$0xff]  }
 0x5e5   :  { %v4269_v16 = vld [vmem:[%s5482_s13 + $0x48] sm:$0xff]  }
 0x5e6   :  { %v1723_v19 = vmul.f32 0.9, %v1722_v17  ;;  %v1780_v51 = vsel %vm258_vm15, %v1779_v49, %v1765_v43  ;;  %v4270_v17 = vld [vmem:[%s5482_s13 + $0x8] sm:$0xff]   ;;  %v4293_v43 = vld [vmem:[%s5482_s13 + $0x78] sm:$0xff]  }
 0x5e8   :  { %v1726_v20 = vadd.f32 %v1724_v18, %v1723_v19  ;;  %v4271_v18 = vld [vmem:[%s5482_s13 + $0xd0] sm:$0xff]  }
 0x5e9   :  { %v4272_v19 = vld [vmem:[%s5482_s13 + $0x90] sm:$0xff]  }
 0x5ea   :  { %vm1727_vm8 = vcmp.ge.f32.partialorder %v1726_v20, 1.0 }
 0x5eb   :  { %v3540_v21 = vsel %vm1727_vm8, 1.0, %v4359_v3 }
 0x5ec   :  { %v1730_v22 = vsub.f32 %v1726_v20, %v3540_v21  ;;  %v1768_v45 = vrot.slane %v3540_v21, 2  ;;  %v4273_v20 = vld [vmem:[%s5482_s13 + $0x50] sm:$0xff]  }
 0x5ed   :  { %v4274_v21 = vld [vmem:[%s5482_s13 + $0x10] sm:$0xff]  }
 0x5ee   :  { %v1731_v23 = vmul.f32 0.9, %v1730_v22  ;;  %v1781_v52 = vsel %vm260_vm5, %v1780_v51, %v1768_v45  ;;  %v4275_v22 = vld [vmem:[%s5482_s13 + $0xd8] sm:$0xff]   ;;  %v4295_v45 = vld [vmem:[%s5482_s13 + $0x140] sm:$0xff]  }
 0x5ef   :  { %v1785_v57 = vadd.f32 %v1781_v52, %v4847_v11 }
 0x5f0   :  { %v1732_v24 = vadd.f32 %v1731_v23, %v1698_v1  ;;  %v4276_v23 = vld [vmem:[%s5482_s13 + $0x98] sm:$0xff]  }
 0x5f1   :  { %v1787_v62 = vrot.slane %v1785_v57, 6  ;;  %v1793_v1 = vrot.slane %v1785_v57, 2 }
 0x5f2   :  { %vm1733_vm9 = vcmp.ge.f32.partialorder %v1732_v24, 1.0 }
 0x5f3   :  { %v3541_v25 = vsel %vm1733_vm9, 1.0, %v4359_v3 }
 0x5f4   :  { %v1736_v26 = vsub.f32 %v1732_v24, %v3541_v25  ;;  %v4277_v24 = vld [vmem:[%s5482_s13 + $0x58] sm:$0xff]  }
 0x5f6   :  { %v1737_v27 = vmul.f32 0.9, %v1736_v26  ;;  %v4279_v26 = vld [vmem:[%s5482_s13 + $0xe0] sm:$0xff]  }
 0x5f8   :  { %v1741_v29 = vadd.f32 %v1739_v28, %v1737_v27  ;;  %v4280_v27 = vld [vmem:[%s5482_s13 + $0xa0] sm:$0xff]  }
 0x5f9   :  { %v4281_v28 = vld [vmem:[%s5482_s13 + $0x60] sm:$0xff]  }
 0x5fa   :  { %vm1742_vm3 = vcmp.ge.f32.partialorder %v1741_v29, 1.0 }
 0x5fb   :  { %v3542_v30 = vsel %vm1742_vm3, 1.0, %v4359_v3 }
 0x5fc   :  { %v1745_v31 = vsub.f32 %v1741_v29, %v3542_v30  ;;  %v1771_v32 = vrot.slane %v3542_v30, 6  ;;  %v4282_v29 = vld [vmem:[%s5482_s13 + $0x20] sm:$0xff]   ;;  %v4283_v30 = vld [vmem:[%s5482_s13 + $0xe8] sm:$0xff]  }
 0x5fe   :  { %v1746_v34 = vmul.f32 0.9, %v1745_v31  ;;  %v1782_v36 = vsel %vm256_vm13, %v3541_v25, %v1771_v32  ;;  %v4278_v25 = vld [vmem:[%s5482_s13 + $0x18] sm:$0xff]   ;;  %v4284_v31 = vld [vmem:[%s5482_s13 + $0xa8] sm:$0xff]  }
 0x5ff   :  { %v4285_v32 = vld [vmem:[%s5482_s13 + $0x68] sm:$0xff]  }
 0x600   :  { %v1749_v37 = vadd.f32 %v1747_v35, %v1746_v34  ;;  %v4286_v34 = vld [vmem:[%s5482_s13 + $0x28] sm:$0xff]   ;;  %v4287_v35 = vld [vmem:[%s5482_s13 + $0xf0] sm:$0xff]  }
 0x602   :  { %vm1750_vm12 = vcmp.ge.f32.partialorder %v1749_v37, 1.0 }
 0x603   :  { %v3543_v40 = vsel %vm1750_vm12, 1.0, %v4359_v3 }
 0x604   :  { %v1753_v42 = vsub.f32 %v1749_v37, %v3543_v40  ;;  %v1774_v44 = vrot.slane %v3543_v40, 4  ;;  %v4289_v37 = vld [vmem:[%s5482_s13 + $0x70] sm:$0xff]  }
 0x605   :  { %v4290_v40 = vld [vmem:[%s5482_s13 + $0x30] sm:$0xff]  }
 0x606   :  { %v1754_v46 = vmul.f32 0.9, %v1753_v42  ;;  %v1783_v48 = vsel %vm258_vm15, %v1782_v36, %v1774_v44  ;;  %v4288_v36 = vld [vmem:[%s5482_s13 + $0xb0] sm:$0xff]   ;;  %v4292_v42 = vld [vmem:[%s5482_s13 + $0xb8] sm:$0xff]  }
 0x607   :  { %v4294_v44 = vld [vmem:[%s5482_s13 + $0x38] sm:$0xff]  }
 0x608   :  { %v1757_v50 = vadd.f32 %v1755_v47, %v1754_v46 }
 0x60a   :  { %vm1758_vm14 = vcmp.ge.f32.partialorder %v1757_v50, 1.0 }
 0x60b   :  { %v3544_v12 = vsel %vm1758_vm14, 1.0, %v4359_v3 }
 0x60c   :  { %v1777_v56 = vrot.slane %v3544_v12, 2 }
 0x60e   :  { %v1784_v58 = vsel %vm260_vm5, %v1783_v48, %v1777_v56  ;;  %v3545_v48 = vld [vmem:[%s5483_s12] ss:$0 sm:$0xff] }
 0x60f   :  { %v1786_v61 = vadd.f32 %v1784_v58, %v4850_v14 }
 0x611   :  { %v1788_v63 = vrot.slane %v1786_v61, 6  ;;  %v1794_v2 = vrot.slane %v1786_v61, 2  ;;  %v1800_v0 = vpack.c.bf16 %v1786_v61, %v1785_v57 }
 0x613   :  { %2033 = vmatprep.mubr.bf16.mxu1 %v1800_v0  ;;  %v1789_v4 = vsel %vm62_vm1, %v1787_v62, %v1788_v63  ;;  %v1790_v5 = vsel %vm62_vm1, %v1788_v63, %v1787_v62  ;;  %v1795_v6 = vsel %vm74_vm2, %v1793_v1, %v1794_v2  ;;  %v1796_v11 = vsel %vm74_vm2, %v1794_v2, %v1793_v1 }
 0x614   :  { %v3572_v7 = vpack.c.bf16 %v1789_v4, %v1790_v5  ;;  %v3576_v14 = vpack.c.bf16 %v1796_v11, %v1795_v6 }
 0x616   :  { %3573 = vmatmul.mubr.msk.bf16.vlgmr.msra.gmra.mrb[16].mxu1 %vm4602_vm10, %v3572_v7  ;;  %4122 = vmatmul.mubr.msk.bf16.vlgmr.msra.gmra.mrb[20].mxu0 %vm4606_vm11, %v3576_v14 }
 0x617   :  { %3638 = vmatprep.mubr.msk.bf16.mxu1 %vm4602_vm10, %v4739_v38  ;;  %2646 = vmatprep.mubr.bf16.mxu0 %v4728_v33  ;;  %v4266_v38 = vld [vmem:[%s5482_s13] sm:$0xff]   ;;  %v4267_v33 = vld [vmem:[%s5482_s13 + $0xc8] sm:$0xff]  }
 0x618   :  { %3906 = vmatpush3.bf16.msra.mxu0 %v4264_v13  ;;  %3884 = vmatpush3.bf16.msra.mxu1 %v4266_v38 }
 0x619   :  { %3907 = vmatprep.subr.bf16.mxu0 %v4267_v33  ;;  %3885 = vmatprep.subr.bf16.mxu1 %v4269_v16 }
 0x61c   :  { %3908 = vmatpush3.bf16.msra.mxu0 %v4268_v15  ;;  %3886 = vmatpush3.bf16.msra.mxu1 %v4270_v17 }
 0x61d   :  { %3909 = vmatprep.subr.bf16.mxu0 %v4271_v18  ;;  %3887 = vmatprep.subr.bf16.mxu1 %v4273_v20 }
 0x620   :  { %3910 = vmatpush3.bf16.msra.mxu0 %v4272_v19  ;;  %3888 = vmatpush3.bf16.msra.mxu1 %v4274_v21 }
 0x621   :  { %3911 = vmatprep.subr.bf16.mxu0 %v4275_v22  ;;  %3889 = vmatprep.subr.bf16.mxu1 %v4277_v24 }
 0x624   :  { %3912 = vmatpush3.bf16.msra.mxu0 %v4276_v23  ;;  %3890 = vmatpush3.bf16.msra.mxu1 %v4278_v25 }
 0x625   :  { %3913 = vmatprep.subr.bf16.mxu0 %v4279_v26  ;;  %3891 = vmatprep.subr.bf16.mxu1 %v4281_v28 }
 0x628   :  { %3914 = vmatpush3.bf16.msra.mxu0 %v4280_v27  ;;  %3892 = vmatpush3.bf16.msra.mxu1 %v4282_v29 }
 0x629   :  { %3915 = vmatprep.subr.bf16.mxu0 %v4283_v30  ;;  %3893 = vmatprep.subr.bf16.mxu1 %v4285_v32 }
 0x62c   :  { %3916 = vmatpush3.bf16.msra.mxu0 %v4284_v31  ;;  %3894 = vmatpush3.bf16.msra.mxu1 %v4286_v34 }
 0x62d   :  { %3917 = vmatprep.subr.bf16.mxu0 %v4287_v35  ;;  %3895 = vmatprep.subr.bf16.mxu1 %v4289_v37 }
 0x630   :  { %3918 = vmatpush3.bf16.msra.mxu0 %v4288_v36  ;;  %3896 = vmatpush3.bf16.msra.mxu1 %v4290_v40 }
 0x631   :  { %3919 = vmatprep.subr.bf16.mxu0 %v4291_v41  ;;  %3897 = vmatprep.subr.bf16.mxu1 %v4293_v43 }
 0x634   :  { %3920 = vmatpush3.bf16.msra.mxu0 %v4292_v42  ;;  %3898 = vmatpush3.bf16.msra.mxu1 %v4294_v44 }
 0x635   :  { %3927 = vmatprep.subr.bf16.mxu1 %v4295_v45 }
 0x6e9   :  { %v3868_v46 = vpop.f32.mrb[16].mxu1  ;;  %v2076_v47 = vpop.f32.mrb[20].mxu0 }
 0x6ea   :  { %v3869_v49 = vpop.f32.mrb[17].mxu1  ;;  %v4123_v50 = vpop.f32.mrb[21].mxu0 }
 0x6eb   :  { %v3870_v51 = vadd.f32 %v3869_v49, %v3868_v46  ;;  %v3871_v52 = vpop.f32.mrb[18].mxu1  ;;  %v2079_v12 = vpop.f32.mrb[22].mxu0 }
 0x6ec   :  { %v3872_v56 = vpop.f32.mrb[19].mxu1  ;;  %v4124_v57 = vpop.f32.mrb[23].mxu0 }
 0x6ed   :  { %v2036_v58 = vadd.f32 %v3870_v51, %v3545_v48  ;;  %v3873_v61 = vadd.f32 %v3872_v56, %v3871_v52 }
 0x6ef   :  { %v2077_v62 = vadd.f32 %v2076_v47, %v2036_v58  ;;  %v2039_v63 = vadd.f32 %v3873_v61, %v3545_v48 }
 0x6f1   :  { %vm2084_vm0 = vcmp.ge.f32.partialorder %v2077_v62, 1.0  ;;  %v2080_v2 = vadd.f32 %v2079_v12, %v2039_v63  ;;  %v2090_v5 = vrot.slane %v2077_v62, 2  ;;  %v2098_v8 = vrot.slane %v2077_v62, 4  ;;  %v4296_v63 = vld [vmem:[%s5482_s13 + $0x100] sm:$0xff]  }
 0x6f2   :  { %v3578_v1 = vsel %vm2084_vm0, 1.0, %v4359_v3  ;;  %v2106_v33 = vrot.slane %v2077_v62, 6 }
 0x6f3   :  { %v2087_v0 = vsub.f32 %v2077_v62, %v3578_v1  ;;  %v2121_v24 = vrot.slane %v2080_v2, 2  ;;  %v2129_v30 = vrot.slane %v2080_v2, 4  ;;  %v2137_v41 = vrot.slane %v2080_v2, 6 }
 0x6f5   :  { %v2088_v4 = vmul.f32 0.9, %v2087_v0 }
 0x6f7   :  { %v2092_v6 = vadd.f32 %v2090_v5, %v2088_v4  ;;  %v4297_v4 = vld [vmem:[%s5482_s13 + $0x148] sm:$0xff]  }
 0x6f9   :  { %vm2093_vm6 = vcmp.ge.f32.partialorder %v2092_v6, 1.0 }
 0x6fa   :  { %v3579_v11 = vsel %vm2093_vm6, 1.0, %v4359_v3 }
 0x6fb   :  { %v2096_v7 = vsub.f32 %v2092_v6, %v3579_v11  ;;  %v2144_v37 = vrot.slane %v3579_v11, 6  ;;  %v4298_v6 = vld [vmem:[%s5482_s13 + $0x108] sm:$0xff]   ;;  %v4300_v11 = vld [vmem:[%s5482_s13 + $0x110] sm:$0xff]  }
 0x6fd   :  { %v2097_v14 = vmul.f32 0.9, %v2096_v7  ;;  %v2161_v46 = vsel %vm256_vm13, %v3578_v1, %v2144_v37  ;;  %v4301_v7 = vld [vmem:[%s5482_s13 + $0x158] sm:$0xff]   ;;  %v4331_v37 = vld [vmem:[%s5484_s15 + $0xe8] sm:$0xff]  }
 0x6ff   :  { %v2100_v13 = vadd.f32 %v2098_v8, %v2097_v14  ;;  %v4303_v14 = vld [vmem:[%s5482_s13 + $0x160] sm:$0xff]  }
 0x700   :  { %v4304_v8 = vld [vmem:[%s5482_s13 + $0x120] sm:$0xff]  }
 0x701   :  { %vm2101_vm7 = vcmp.ge.f32.partialorder %v2100_v13, 1.0 }
 0x702   :  { %v3580_v9 = vsel %vm2101_vm7, 1.0, %v4359_v3 }
 0x703   :  { %v2104_v38 = vsub.f32 %v2100_v13, %v3580_v9  ;;  %v2147_v42 = vrot.slane %v3580_v9, 4  ;;  %v4305_v13 = vld [vmem:[%s5482_s13 + $0x168] sm:$0xff]  }
 0x704   :  { %v4306_v9 = vld [vmem:[%s5482_s13 + $0x128] sm:$0xff]  }
 0x705   :  { %v2105_v15 = vmul.f32 0.9, %v2104_v38  ;;  %v2162_v47 = vsel %vm258_vm15, %v2161_v46, %v2147_v42  ;;  %v4307_v38 = vld [vmem:[%s5482_s13 + $0x170] sm:$0xff]   ;;  %v4334_v42 = vld [vmem:[%s5484_s15 + $0x28] sm:$0xff]  }
 0x706   :  { %v4338_v46 = vld [vmem:[%s5484_s15 + $0x30] sm:$0xff]  }
 0x707   :  { %v2108_v16 = vadd.f32 %v2106_v33, %v2105_v15  ;;  %v4308_v33 = vld [vmem:[%s5482_s13 + $0x130] sm:$0xff]   ;;  %v4309_v15 = vld [vmem:[%s5482_s13 + $0x178] sm:$0xff]  }
 0x709   :  { %vm2109_vm8 = vcmp.ge.f32.partialorder %v2108_v16, 1.0 }
 0x70a   :  { %v3581_v17 = vsel %vm2109_vm8, 1.0, %v4359_v3 }
 0x70b   :  { %v2112_v18 = vsub.f32 %v2108_v16, %v3581_v17  ;;  %v2150_v44 = vrot.slane %v3581_v17, 2  ;;  %v4310_v16 = vld [vmem:[%s5482_s13 + $0x138] sm:$0xff]   ;;  %v4311_v17 = vld [vmem:[%s5484_s15 + $0xc0] sm:$0xff]  }
 0x70d   :  { %v2113_v19 = vmul.f32 0.9, %v2112_v18  ;;  %v2163_v49 = vsel %vm260_vm5, %v2162_v47, %v2150_v44  ;;  %v4312_v18 = vld [vmem:[%s5484_s15 + $0x80] sm:$0xff]   ;;  %v4336_v44 = vld [vmem:[%s5484_s15 + $0xb0] sm:$0xff]   ;;  %v4339_v47 = vld [vmem:[%s5484_s15 + $0xf8] sm:$0xff]  }
 0x70e   :  { %v2167_v52 = vrot.slane %v2163_v49, 6  ;;  %v2173_v56 = vrot.slane %v2163_v49, 2 }
 0x70f   :  { %v2114_v20 = vadd.f32 %v2113_v19, %v2080_v2  ;;  %v4313_v19 = vld [vmem:[%s5484_s15 + $0x40] sm:$0xff]  }
 0x710   :  { %3949 = vmatprep.subr.bf16.mxu0 %v4313_v19 }
 0x711   :  { %vm2115_vm9 = vcmp.ge.f32.partialorder %v2114_v20, 1.0 }
 0x712   :  { %v3582_v21 = vsel %vm2115_vm9, 1.0, %v4359_v3 }
 0x713   :  { %v2118_v22 = vsub.f32 %v2114_v20, %v3582_v21  ;;  %v4314_v20 = vld [vmem:[%s5484_s15] sm:$0xff]  }
 0x715   :  { %v2119_v23 = vmul.f32 0.9, %v2118_v22  ;;  %v4317_v22 = vld [vmem:[%s5484_s15 + $0x48] sm:$0xff]  }
 0x717   :  { %v2123_v25 = vadd.f32 %v2121_v24, %v2119_v23  ;;  %v4318_v23 = vld [vmem:[%s5484_s15 + $0x8] sm:$0xff]   ;;  %v4319_v24 = vld [vmem:[%s5484_s15 + $0xd0] sm:$0xff]  }
 0x719   :  { %vm2124_vm3 = vcmp.ge.f32.partialorder %v2123_v25, 1.0 }
 0x71a   :  { %v3583_v26 = vsel %vm2124_vm3, 1.0, %v4359_v3 }
 0x71b   :  { %v2127_v27 = vsub.f32 %v2123_v25, %v3583_v26  ;;  %v2153_v28 = vrot.slane %v3583_v26, 6  ;;  %v4320_v25 = vld [vmem:[%s5484_s15 + $0x90] sm:$0xff]  }
 0x71c   :  { %v4321_v26 = vld [vmem:[%s5484_s15 + $0x50] sm:$0xff]  }
 0x71d   :  { %v2128_v29 = vmul.f32 0.9, %v2127_v27  ;;  %v2164_v31 = vsel %vm256_vm13, %v3582_v21, %v2153_v28  ;;  %v4316_v21 = vld [vmem:[%s5484_s15 + $0x88] sm:$0xff]   ;;  %v4322_v27 = vld [vmem:[%s5484_s15 + $0x10] sm:$0xff]   ;;  %v4323_v28 = vld [vmem:[%s5484_s15 + $0xd8] sm:$0xff]  }
 0x71f   :  { %v2131_v32 = vadd.f32 %v2129_v30, %v2128_v29  ;;  %v4324_v29 = vld [vmem:[%s5484_s15 + $0x98] sm:$0xff]  }
 0x720   :  { %v4325_v30 = vld [vmem:[%s5484_s15 + $0x58] sm:$0xff]  }
 0x721   :  { %vm2132_vm12 = vcmp.ge.f32.partialorder %v2131_v32, 1.0 }
 0x722   :  { %v3584_v34 = vsel %vm2132_vm12, 1.0, %v4359_v3 }
 0x723   :  { %v2135_v35 = vsub.f32 %v2131_v32, %v3584_v34  ;;  %v2156_v36 = vrot.slane %v3584_v34, 4  ;;  %v4327_v32 = vld [vmem:[%s5484_s15 + $0xe0] sm:$0xff]  }
 0x724   :  { %v4328_v34 = vld [vmem:[%s5484_s15 + $0xa0] sm:$0xff]  }
 0x725   :  { %v2136_v40 = vmul.f32 0.9, %v2135_v35  ;;  %v2165_v43 = vsel %vm258_vm15, %v2164_v31, %v2156_v36  ;;  %v4326_v31 = vld [vmem:[%s5484_s15 + $0x18] sm:$0xff]   ;;  %v4329_v35 = vld [vmem:[%s5484_s15 + $0x60] sm:$0xff]  }
 0x726   :  { %v4330_v36 = vld [vmem:[%s5484_s15 + $0x20] sm:$0xff]  }
 0x727   :  { %v2139_v45 = vadd.f32 %v2137_v41, %v2136_v40  ;;  %v4332_v40 = vld [vmem:[%s5484_s15 + $0xa8] sm:$0xff]  }
 0x728   :  { %v4333_v41 = vld [vmem:[%s5484_s15 + $0x68] sm:$0xff]  }
 0x729   :  { %vm2140_vm14 = vcmp.ge.f32.partialorder %v2139_v45, 1.0  ;;  %v4337_v45 = vld [vmem:[%s5484_s15 + $0x70] sm:$0xff]  }
 0x72a   :  { %v3585_v48 = vsel %vm2140_vm14, 1.0, %v4359_v3 }
 0x72b   :  { %v2159_v50 = vrot.slane %v3585_v48, 2  ;;  %v4340_v48 = vld [vmem:[%s5484_s15 + $0xb8] sm:$0xff]  }
 0x72d   :  { %v2166_v51 = vsel %vm260_vm5, %v2165_v43, %v2159_v50  ;;  %v4335_v43 = vld [vmem:[%s5484_s15 + $0xf0] sm:$0xff]   ;;  %v4342_v50 = vld [vmem:[%s5484_s15 + $0x38] sm:$0xff]  }
 0x72e   :  { %v2168_v12 = vrot.slane %v2166_v51, 6  ;;  %v2174_v57 = vrot.slane %v2166_v51, 2  ;;  %v2180_v58 = vpack.c.bf16 %v2166_v51, %v2163_v49  ;;  %v4341_v49 = vld [vmem:[%s5484_s15 + $0x78] sm:$0xff]   ;;  %v4343_v51 = vld [vmem:[%s5484_s15 + $0x140] sm:$0xff]  }
 0x730   :  { %2647 = vmatmul.mubr.bf16.vlgmr.msra.gmra.mrb[24].mxu0 %v2180_v58  ;;  %v2169_v61 = vsel %vm62_vm1, %v2167_v52, %v2168_v12  ;;  %v2170_v62 = vsel %vm62_vm1, %v2168_v12, %v2167_v52  ;;  %v2175_v1 = vsel %vm74_vm2, %v2173_v56, %v2174_v57  ;;  %v2176_v2 = vsel %vm74_vm2, %v2174_v57, %v2173_v56 }
 0x731   :  { %3711 = vmatprep.mubr.msk.bf16.mxu0 %vm4602_vm10, %v4621_v60  ;;  %v3641_v0 = vpack.c.bf16 %v2169_v61, %v2170_v62  ;;  %v3649_v5 = vpack.c.bf16 %v2176_v2, %v2175_v1  ;;  %v4299_v60 = vld [vmem:[%s5482_s13 + $0x150] sm:$0xff]   ;;  %3950 = vmatpush3.bf16.msra.mxu0 %v4314_v20 }
 0x732   :  { %3951 = vmatprep.subr.bf16.mxu0 %v4317_v22 }
 0x733   :  { %3642 = vmatmul.mubr.msk.bf16.vlgmr.msra.gmra.mrb[20].mxu1 %vm4602_vm10, %v3641_v0 }
 0x734   :  { %3928 = vmatpush3.bf16.msra.mxu1 %v4296_v63  ;;  %3646 = vmatprep.mubr.msk.bf16.mxu1 %vm4606_vm11, %v4741_v39  ;;  %v4302_v39 = vld [vmem:[%s5482_s13 + $0x118] sm:$0xff]   ;;  %v3586_v63 = vld [vmem:[%s5485_s14] ss:$0 sm:$0xff] }
 0x735   :  { %3929 = vmatprep.subr.bf16.mxu1 %v4297_v4  ;;  %3952 = vmatpush3.bf16.msra.mxu0 %v4318_v23 }
 0x736   :  { %3953 = vmatprep.subr.bf16.mxu0 %v4321_v26 }
 0x738   :  { %3930 = vmatpush3.bf16.msra.mxu1 %v4298_v6 }
 0x739   :  { %3931 = vmatprep.subr.bf16.mxu1 %v4299_v60  ;;  %3954 = vmatpush3.bf16.msra.mxu0 %v4322_v27 }
 0x73a   :  { %3955 = vmatprep.subr.bf16.mxu0 %v4325_v30 }
 0x73c   :  { %3932 = vmatpush3.bf16.msra.mxu1 %v4300_v11 }
 0x73d   :  { %3933 = vmatprep.subr.bf16.mxu1 %v4301_v7  ;;  %3956 = vmatpush3.bf16.msra.mxu0 %v4326_v31 }
 0x73e   :  { %3957 = vmatprep.subr.bf16.mxu0 %v4329_v35 }
 0x740   :  { %3934 = vmatpush3.bf16.msra.mxu1 %v4302_v39 }
 0x741   :  { %3935 = vmatprep.subr.bf16.mxu1 %v4303_v14  ;;  %3958 = vmatpush3.bf16.msra.mxu0 %v4330_v36 }
 0x742   :  { %3959 = vmatprep.subr.bf16.mxu0 %v4333_v41 }
 0x744   :  { %3936 = vmatpush3.bf16.msra.mxu1 %v4304_v8 }
 0x745   :  { %3937 = vmatprep.subr.bf16.mxu1 %v4305_v13  ;;  %3960 = vmatpush3.bf16.msra.mxu0 %v4334_v42 }
 0x746   :  { %3961 = vmatprep.subr.bf16.mxu0 %v4337_v45 }
 0x748   :  { %3938 = vmatpush3.bf16.msra.mxu1 %v4306_v9 }
 0x749   :  { %3939 = vmatprep.subr.bf16.mxu1 %v4307_v38  ;;  %3962 = vmatpush3.bf16.msra.mxu0 %v4338_v46 }
 0x74a   :  { %3963 = vmatprep.subr.bf16.mxu0 %v4341_v49 }
 0x74c   :  { %3940 = vmatpush3.bf16.msra.mxu1 %v4308_v33 }
 0x74d   :  { %3941 = vmatprep.subr.bf16.mxu1 %v4309_v15  ;;  %3964 = vmatpush3.bf16.msra.mxu0 %v4342_v50 }
 0x74e   :  { %3993 = vmatprep.subr.bf16.mxu0 %v4343_v51 }
 0x750   :  { %3942 = vmatpush3.bf16.msra.mxu1 %v4310_v16 }
 0x751   :  { %3971 = vmatprep.subr.bf16.mxu1 %v4311_v17 }
 0x753   :  { %3650 = vmatmul.mubr.msk.bf16.vlgmr.msra.gmra.mrb[24].mxu1 %vm4606_vm11, %v3649_v5 }
 0x754   :  { %3259 = vmatprep.mubr.bf16.mxu1 %v4600_v53  ;;  %3972 = vmatpush3.bf16.msra.mxu1 %v4312_v18  ;;  %v4315_v53 = vld [vmem:[%s5484_s15 + $0xc8] sm:$0xff]  }
 0x755   :  { %3973 = vmatprep.subr.bf16.mxu1 %v4315_v53 }
 0x758   :  { %3974 = vmatpush3.bf16.msra.mxu1 %v4316_v21 }
 0x759   :  { %3975 = vmatprep.subr.bf16.mxu1 %v4319_v24 }
 0x75c   :  { %3976 = vmatpush3.bf16.msra.mxu1 %v4320_v25 }
 0x75d   :  { %3977 = vmatprep.subr.bf16.mxu1 %v4323_v28 }
 0x760   :  { %3978 = vmatpush3.bf16.msra.mxu1 %v4324_v29 }
 0x761   :  { %3979 = vmatprep.subr.bf16.mxu1 %v4327_v32 }
 0x764   :  { %3980 = vmatpush3.bf16.msra.mxu1 %v4328_v34 }
 0x765   :  { %3981 = vmatprep.subr.bf16.mxu1 %v4331_v37 }
 0x768   :  { %3982 = vmatpush3.bf16.msra.mxu1 %v4332_v40 }
 0x769   :  { %3983 = vmatprep.subr.bf16.mxu1 %v4335_v43 }
 0x76c   :  { %3984 = vmatpush3.bf16.msra.mxu1 %v4336_v44 }
 0x76d   :  { %3985 = vmatprep.subr.bf16.mxu1 %v4339_v47 }
 0x770   :  { %3986 = vmatpush3.bf16.msra.mxu1 %v4340_v48 }
 0x803   :  { %v3921_v52 = vpop.f32.mrb[24].mxu0 }
 0x804   :  { %v3922_v12 = vpop.f32.mrb[25].mxu0 }
 0x805   :  { %v3923_v56 = vadd.f32 %v3922_v12, %v3921_v52  ;;  %v3924_v57 = vpop.f32.mrb[26].mxu0 }
 0x806   :  { %v3899_v58 = vpop.f32.mrb[20].mxu1  ;;  %v3925_v61 = vpop.f32.mrb[27].mxu0 }
 0x807   :  { %v3926_v62 = vadd.f32 %v3925_v61, %v3924_v57  ;;  %v3900_v1 = vpop.f32.mrb[21].mxu1 }
 0x808   :  { %v3901_v2 = vadd.f32 %v3900_v1, %v3899_v58  ;;  %v3902_v0 = vpop.f32.mrb[22].mxu1 }
 0x809   :  { %v3903_v4 = vpop.f32.mrb[23].mxu1 }
 0x80a   :  { %v2608_v5 = vadd.f32 %v3901_v2, %v3586_v63  ;;  %v3904_v6 = vadd.f32 %v3903_v4, %v3902_v0 }
 0x80c   :  { %v2611_v60 = vadd.f32 %v3904_v6, %v3586_v63  ;;  %v2649_v11 = vadd.f32 %v3923_v56, %v2608_v5 }
 0x80e   :  { %v2652_v7 = vadd.f32 %v3926_v62, %v2611_v60 }
 0x826   :  { %v3943_v39 = vpop.f32.mrb[24].mxu1 }
 0x827   :  { %v3944_v14 = vpop.f32.mrb[25].mxu1 }
 0x828   :  { %v3945_v8 = vadd.f32 %v3944_v14, %v3943_v39  ;;  %v3946_v13 = vpop.f32.mrb[26].mxu1 }
 0x829   :  { %v3947_v9 = vpop.f32.mrb[27].mxu1 }
 0x82a   :  { %v2690_v38 = vadd.f32 %v3945_v8, %v2649_v11  ;;  %v3948_v33 = vadd.f32 %v3947_v9, %v3946_v13 }
 0x82c   :  { %vm2697_vm0 = vcmp.ge.f32.partialorder %v2690_v38, 1.0  ;;  %v2693_v16 = vadd.f32 %v3948_v33, %v2652_v7  ;;  %v2703_v19 = vrot.slane %v2690_v38, 2  ;;  %v2711_v23 = vrot.slane %v2690_v38, 4  ;;  %v4345_v33 = vld [vmem:[%s5484_s15 + $0x148] sm:$0xff]  }
 0x82d   :  { %v3651_v15 = vsel %vm2697_vm0, 1.0, %v4359_v3  ;;  %v2719_v27 = vrot.slane %v2690_v38, 6 }
 0x82e   :  { %v2700_v17 = vsub.f32 %v2690_v38, %v3651_v15  ;;  %v2734_v40 = vrot.slane %v2693_v16, 2  ;;  %v2742_v46 = vrot.slane %v2693_v16, 4  ;;  %v2750_v56 = vrot.slane %v2693_v16, 6 }
 0x830   :  { %v2701_v18 = vmul.f32 0.9, %v2700_v17  ;;  %v4349_v17 = vld [vmem:[%s5484_s15 + $0x158] sm:$0xff]  }
 0x832   :  { %v2705_v20 = vadd.f32 %v2703_v19, %v2701_v18  ;;  %v4351_v18 = vld [vmem:[%s5484_s15 + $0x160] sm:$0xff]  }
 0x833   :  { %v4352_v19 = vld [vmem:[%s5484_s15 + $0x120] sm:$0xff]  }
 0x834   :  { %vm2706_vm6 = vcmp.ge.f32.partialorder %v2705_v20, 1.0 }
 0x835   :  { %v3652_v53 = vsel %vm2706_vm6, 1.0, %v4359_v3 }
 0x836   :  { %v2709_v21 = vsub.f32 %v2705_v20, %v3652_v53  ;;  %v2757_v52 = vrot.slane %v3652_v53, 6  ;;  %v4353_v20 = vld [vmem:[%s5484_s15 + $0x168] sm:$0xff]  }
 0x837   :  { %v4354_v53 = vld [vmem:[%s5484_s15 + $0x128] sm:$0xff]  }
 0x838   :  { %v2710_v22 = vmul.f32 0.9, %v2709_v21  ;;  %v2774_v63 = vsel %vm256_vm13, %v3651_v15, %v2757_v52  ;;  %v4355_v21 = vld [vmem:[%s5484_s15 + $0x170] sm:$0xff]  }
 0x83a   :  { %v2713_v24 = vadd.f32 %v2711_v23, %v2710_v22  ;;  %v4356_v22 = vld [vmem:[%s5484_s15 + $0x130] sm:$0xff]   ;;  %v4357_v23 = vld [vmem:[%s5484_s15 + $0x178] sm:$0xff]  }
 0x83c   :  { %vm2714_vm7 = vcmp.ge.f32.partialorder %v2713_v24, 1.0 }
 0x83d   :  { %v3653_v25 = vsel %vm2714_vm7, 1.0, %v4359_v3 }
 0x83e   :  { %v2717_v26 = vsub.f32 %v2713_v24, %v3653_v25  ;;  %v2760_v57 = vrot.slane %v3653_v25, 4  ;;  %v4358_v24 = vld [vmem:[%s5484_s15 + $0x138] sm:$0xff]  }
 0x840   :  { %v2718_v28 = vmul.f32 0.9, %v2717_v26  ;;  %v2775_v1 = vsel %vm258_vm15, %v2774_v63, %v2760_v57 }
 0x842   :  { %v2721_v29 = vadd.f32 %v2719_v27, %v2718_v28 }
 0x844   :  { %vm2722_vm8 = vcmp.ge.f32.partialorder %v2721_v29, 1.0 }
 0x845   :  { %v3654_v30 = vsel %vm2722_vm8, 1.0, %v4359_v3 }
 0x846   :  { %v2725_v31 = vsub.f32 %v2721_v29, %v3654_v30  ;;  %v2763_v61 = vrot.slane %v3654_v30, 2 }
 0x848   :  { %v2726_v32 = vmul.f32 0.9, %v2725_v31  ;;  %v2776_v0 = vsel %vm260_vm5, %v2775_v1, %v2763_v61 }
 0x849   :  { %v2780_v6 = vrot.slane %v2776_v0, 6  ;;  %v2786_v11 = vrot.slane %v2776_v0, 2 }
 0x84a   :  { %v2727_v34 = vadd.f32 %v2726_v32, %v2693_v16  ;;  %v4346_v16 = vld [vmem:[%s5484_s15 + $0x108] sm:$0xff]   ;;  %v3659_v32 = vld [vmem:[%s5486_s16] ss:$0 sm:$0xff] }
 0x84c   :  { %vm2728_vm9 = vcmp.ge.f32.partialorder %v2727_v34, 1.0 }
 0x84d   :  { %v3655_v35 = vsel %vm2728_vm9, 1.0, %v4359_v3 }
 0x84e   :  { %v2731_v36 = vsub.f32 %v2727_v34, %v3655_v35 }
 0x850   :  { %v2732_v37 = vmul.f32 0.9, %v2731_v36 }
 0x852   :  { %v2736_v41 = vadd.f32 %v2734_v40, %v2732_v37 }
 0x854   :  { %vm2737_vm3 = vcmp.ge.f32.partialorder %v2736_v41, 1.0 }
 0x855   :  { %v3656_v42 = vsel %vm2737_vm3, 1.0, %v4359_v3 }
 0x856   :  { %v2740_v43 = vsub.f32 %v2736_v41, %v3656_v42  ;;  %v2766_v44 = vrot.slane %v3656_v42, 6 }
 0x858   :  { %v2741_v45 = vmul.f32 0.9, %v2740_v43  ;;  %v2777_v47 = vsel %vm256_vm13, %v3655_v35, %v2766_v44 }
 0x85a   :  { %v2744_v48 = vadd.f32 %v2742_v46, %v2741_v45 }
 0x85c   :  { %vm2745_vm12 = vcmp.ge.f32.partialorder %v2744_v48, 1.0 }
 0x85d   :  { %v3657_v49 = vsel %vm2745_vm12, 1.0, %v4359_v3 }
 0x85e   :  { %v2748_v50 = vsub.f32 %v2744_v48, %v3657_v49  ;;  %v2769_v51 = vrot.slane %v3657_v49, 4 }
 0x860   :  { %v2749_v12 = vmul.f32 0.9, %v2748_v50  ;;  %v2778_v58 = vsel %vm258_vm15, %v2777_v47, %v2769_v51 }
 0x862   :  { %v2752_v62 = vadd.f32 %v2750_v56, %v2749_v12 }
 0x864   :  { %vm2753_vm14 = vcmp.ge.f32.partialorder %v2752_v62, 1.0 }
 0x865   :  { %v3658_v2 = vsel %vm2753_vm14, 1.0, %v4359_v3  ;;  %v4344_v3 = vld [vmem:[%s5484_s15 + $0x100] sm:$0xff]  }
 0x866   :  { %v2772_v4 = vrot.slane %v3658_v2, 2 }
 0x868   :  { %v2779_v5 = vsel %vm260_vm5, %v2778_v58, %v2772_v4 }
 0x869   :  { %v2781_v60 = vrot.slane %v2779_v5, 6  ;;  %v2787_v7 = vrot.slane %v2779_v5, 2  ;;  %v2793_v39 = vpack.c.bf16 %v2779_v5, %v2776_v0 }
 0x86b   :  { %3260 = vmatmul.mubr.bf16.vlgmr.msra.gmra.mrb[28].mxu1 %v2793_v39  ;;  %v2782_v14 = vsel %vm62_vm1, %v2780_v6, %v2781_v60  ;;  %v2783_v8 = vsel %vm62_vm1, %v2781_v60, %v2780_v6  ;;  %v2788_v13 = vsel %vm74_vm2, %v2786_v11, %v2787_v7  ;;  %v2789_v9 = vsel %vm74_vm2, %v2787_v7, %v2786_v11 }
 0x86c   :  { %v3714_v38 = vpack.c.bf16 %v2782_v14, %v2783_v8  ;;  %v3722_v15 = vpack.c.bf16 %v2789_v9, %v2788_v13 }
 0x86e   :  { %3715 = vmatmul.mubr.msk.bf16.vlgmr.msra.gmra.mrb[28].mxu0 %vm4602_vm10, %v3714_v38 }
 0x86f   :  { %3994 = vmatpush3.bf16.msra.mxu0 %v4344_v3  ;;  %3719 = vmatprep.mubr.msk.bf16.mxu0 %vm4606_vm11, %v4619_v59  ;;  %v4350_v59 = vld [vmem:[%s5484_s15 + $0x118] sm:$0xff]  }
 0x870   :  { %3995 = vmatprep.subr.bf16.mxu0 %v4345_v33 }
 0x873   :  { %3996 = vmatpush3.bf16.msra.mxu0 %v4346_v16 }
 0x874   :  { %3997 = vmatprep.subr.bf16.mxu0 %v4347_v10 }
 0x877   :  { %3998 = vmatpush3.bf16.msra.mxu0 %v4348_v54 }
 0x878   :  { %3999 = vmatprep.subr.bf16.mxu0 %v4349_v17 }
 0x87b   :  { %4000 = vmatpush3.bf16.msra.mxu0 %v4350_v59 }
 0x87c   :  { %4001 = vmatprep.subr.bf16.mxu0 %v4351_v18 }
 0x87f   :  { %4002 = vmatpush3.bf16.msra.mxu0 %v4352_v19 }
 0x880   :  { %4003 = vmatprep.subr.bf16.mxu0 %v4353_v20 }
 0x883   :  { %4004 = vmatpush3.bf16.msra.mxu0 %v4354_v53 }
 0x884   :  { %4005 = vmatprep.subr.bf16.mxu0 %v4355_v21 }
 0x887   :  { %4006 = vmatpush3.bf16.msra.mxu0 %v4356_v22 }
 0x888   :  { %4007 = vmatprep.subr.bf16.mxu0 %v4357_v23 }
 0x88b   :  { %4008 = vmatpush3.bf16.msra.mxu0 %v4358_v24 }
 0x88e   :  { %3723 = vmatmul.mubr.msk.bf16.vlgmr.msra.gmra.mrb[32].mxu0 %vm4606_vm11, %v3722_v15 }
 0x93e   :  { %v3987_v25 = vpop.f32.mrb[28].mxu1 }
 0x93f   :  { %v3988_v26 = vpop.f32.mrb[29].mxu1 }
 0x940   :  { %v3989_v27 = vadd.f32 %v3988_v26, %v3987_v25  ;;  %v3990_v28 = vpop.f32.mrb[30].mxu1 }
 0x941   :  { %v3965_v29 = vpop.f32.mrb[28].mxu0  ;;  %v3991_v30 = vpop.f32.mrb[31].mxu1 }
 0x942   :  { %v3992_v31 = vadd.f32 %v3991_v30, %v3990_v28  ;;  %v3966_v34 = vpop.f32.mrb[29].mxu0 }
 0x943   :  { %v3967_v35 = vadd.f32 %v3966_v34, %v3965_v29  ;;  %v3968_v36 = vpop.f32.mrb[30].mxu0 }
 0x944   :  { %v3969_v37 = vpop.f32.mrb[31].mxu0 }
 0x945   :  { %v3221_v40 = vadd.f32 %v3967_v35, %v3659_v32  ;;  %v3970_v41 = vadd.f32 %v3969_v37, %v3968_v36 }
 0x947   :  { %v3224_v42 = vadd.f32 %v3970_v41, %v3659_v32  ;;  %v3262_v55 = vadd.f32 %v3989_v27, %v3221_v40 }
 0x949   :  { %v3265_v43 = vadd.f32 %v3992_v31, %v3224_v42 }
 0x961   :  { %v4009_v44 = vpop.f32.mrb[32].mxu0 }
 0x962   :  { %v4010_v45 = vpop.f32.mrb[33].mxu0 }
 0x963   :  { %v4011_v46 = vadd.f32 %v4010_v45, %v4009_v44  ;;  %v4012_v47 = vpop.f32.mrb[34].mxu0 }
 0x964   :  { %v4013_v48 = vpop.f32.mrb[35].mxu0 }
 0x965   :  { %v3303_v49 = vadd.f32 %v4011_v46, %v3262_v55  ;;  %v4014_v50 = vadd.f32 %v4013_v48, %v4012_v47 }
 0x967   :  { %v3310_v51 = vmul.f32 0.9, %v3303_v49  ;;  %v3312_v52 = vrot.slane %v3303_v49, 2  ;;  %v3306_v12 = vadd.f32 %v4014_v50, %v3265_v43  ;;  %v3316_v58 = vrot.slane %v3303_v49, 4 }
 0x968   :  { %v3320_v62 = vrot.slane %v3303_v49, 6 }
 0x969   :  { %v3314_v56 = vadd.f32 %v3312_v52, %v3310_v51  ;;  %v3327_v14 = vrot.slane %v3306_v12, 2  ;;  %v3331_v13 = vrot.slane %v3306_v12, 4  ;;  %v3335_v16 = vrot.slane %v3306_v12, 6 }
 0x96b   :  { %v3315_v57 = vmul.f32 0.9, %v3314_v56  ;;  %v3339_v63 = vrot.slane %v3314_v56, 6 }
 0x96d   :  { %v3318_v61 = vadd.f32 %v3316_v58, %v3315_v57  ;;  %v3356_v4 = vsel %vm256_vm13, %v3303_v49, %v3339_v63 }
 0x96f   :  { %v3319_v1 = vmul.f32 0.9, %v3318_v61  ;;  %v3342_v2 = vrot.slane %v3318_v61, 4 }
 0x971   :  { %v3322_v0 = vadd.f32 %v3320_v62, %v3319_v1  ;;  %v3357_v60 = vsel %vm258_vm15, %v3356_v4, %v3342_v2 }
 0x973   :  { %v3323_v5 = vmul.f32 0.9, %v3322_v0  ;;  %v3345_v6 = vrot.slane %v3322_v0, 2 }
 0x975   :  { %v3324_v11 = vadd.f32 %v3323_v5, %v3306_v12  ;;  %v3358_v7 = vsel %vm260_vm5, %v3357_v60, %v3345_v6 }
 0x976   :  { %3362 = vst.msk [vmem:[%s5487_s17] sm:$0xff] %vm95_vm4, %v3358_v7 }
 0x977   :  { %v3325_v39 = vmul.f32 0.9, %v3324_v11 }
 0x979   :  { %v3329_v8 = vadd.f32 %v3327_v14, %v3325_v39 }
 0x97b   :  { %v3330_v3 = vmul.f32 0.9, %v3329_v8  ;;  %v3348_v9 = vrot.slane %v3329_v8, 6 }
 0x97d   :  { %v3333_v38 = vadd.f32 %v3331_v13, %v3330_v3  ;;  %v3359_v33 = vsel %vm256_vm13, %v3324_v11, %v3348_v9 }
 0x97f   :  { %v3334_v15 = vmul.f32 0.9, %v3333_v38  ;;  %v3351_v10 = vrot.slane %v3333_v38, 4 }
 0x981   :  { %v3337_v54 = vadd.f32 %v3335_v16, %v3334_v15  ;;  %v3360_v17 = vsel %vm258_vm15, %v3359_v33, %v3351_v10 }
 0x983   :  { %v3354_v59 = vrot.slane %v3337_v54, 2 }
 0x985   :  { %v3361_v18 = vsel %vm260_vm5, %v3360_v17, %v3354_v59 }
 0x986   :  { %3363 = vst.msk [vmem:[%s5487_s17 + $0x8] sm:$0xff] %vm95_vm4, %v3361_v18 }

</bundles_post_ra>
